<compile_context>
chip_gen: v5e
topology: v5e:2x2
jax: 0.10.0
libtpu: 0.0.40
codegen_flags: <defaults>
</compile_context>

<pallas_src>
import jax
import jax.numpy as jnp
from jax.experimental import pallas as pl
from jax.experimental.pallas import tpu as pltpu

D_IN = 128
D_HID = 1000
D_OUT = 21

# Lane/sublane-aligned (padded) dims.
D_HID_P = 1024        # 1000 -> 1024  (8 * 128)
D_OUT_P = 128         # 21   -> 128
B_TILE_LARGE = 256    # batch tile when batch is large (multiple of 128)


def _round_up(x, m):
    return ((x + m - 1) // m) * m


def _fused_mlp_kernel(x_ref, w1_ref, b1_ref, w2_ref, b2_ref, w3_ref, b3_ref, o_ref):
    # Layer 1: h1 = relu(x @ W1 + b1)            [bt, D_HID_P], f32 accumulate
    x = x_ref[...].astype(jnp.bfloat16)
    h1 = jnp.dot(x, w1_ref[...], preferred_element_type=jnp.float32)
    h1 = jnp.maximum(h1 + b1_ref[...], 0.0).astype(jnp.bfloat16)

    # Layer 2: h2 = relu(h1 @ W2 + b2)           [bt, D_HID_P]
    h2 = jnp.dot(h1, w2_ref[...], preferred_element_type=jnp.float32)
    h2 = jnp.maximum(h2 + b2_ref[...], 0.0).astype(jnp.bfloat16)

    # Layer 3: y = h2 @ W3 + b3                  [bt, D_OUT_P]
    y = jnp.dot(h2, w3_ref[...], preferred_element_type=jnp.float32)
    o_ref[...] = (y + b3_ref[...]).astype(o_ref.dtype)


def fused_mlp(x_pad, w1, b1, w2, b2, w3, b3, *, b_tile):
    """Fused 3-layer MLP over batch tiles. Weights stay VMEM-resident across
    the batch grid (constant index_maps). Returns [B_pad, D_OUT_P] f32."""
    b_pad = x_pad.shape[0]
    n_tiles = b_pad // b_tile
    return pl.pallas_call(
        _fused_mlp_kernel,
        out_shape=jax.ShapeDtypeStruct((b_pad, D_OUT_P), jnp.float32),
        grid_spec=pltpu.PrefetchScalarGridSpec(
            num_scalar_prefetch=0,
            grid=(n_tiles,),
            in_specs=[
                pl.BlockSpec((b_tile, D_IN), lambda i: (i, 0)),       # x batch tile
                pl.BlockSpec((D_IN, D_HID_P), lambda i: (0, 0)),      # W1 (resident)
                pl.BlockSpec((1, D_HID_P), lambda i: (0, 0)),         # b1
                pl.BlockSpec((D_HID_P, D_HID_P), lambda i: (0, 0)),   # W2 (resident)
                pl.BlockSpec((1, D_HID_P), lambda i: (0, 0)),         # b2
                pl.BlockSpec((D_HID_P, D_OUT_P), lambda i: (0, 0)),   # W3 (resident)
                pl.BlockSpec((1, D_OUT_P), lambda i: (0, 0)),         # b3
            ],
            out_specs=pl.BlockSpec((b_tile, D_OUT_P), lambda i: (i, 0)),
        ),
        compiler_params=pltpu.CompilerParams(
            dimension_semantics=("parallel",),
        ),
    )(x_pad, w1, b1, w2, b2, w3, b3)


def init_params(key):
    """Deterministic init matching PyTorch Linear shapes (weights stored [out,in])."""
    dims = [(D_IN, D_HID), (D_HID, D_HID), (D_HID, D_OUT)]
    params = []
    for fan_in, fan_out in dims:
        kw, kb, key = jax.random.split(key, 3)
        bound = 1.0 / jnp.sqrt(fan_in)
        w = jax.random.uniform(kw, (fan_out, fan_in), jnp.float32, -bound, bound)
        b = jax.random.uniform(kb, (fan_out,), jnp.float32, -bound, bound)
        params.append((w, b))
    return params


def prepare_params(params):
    """One-time conversion (OUTSIDE the jitted hot path):
    transpose PyTorch-layout [out,in] weights to [in,out], cast to bf16, and
    zero-pad feature dims to lane-aligned sizes. Biases stay f32 (added to the
    f32 accumulator in-kernel)."""
    (w1, b1), (w2, b2), (w3, b3) = params

    def pad_w(a, shape):
        out = jnp.zeros(shape, jnp.bfloat16)
        return out.at[: a.shape[0], : a.shape[1]].set(a.astype(jnp.bfloat16))

    def pad_bias(b, width):
        out = jnp.zeros((1, width), jnp.float32)
        return out.at[0, : b.shape[0]].set(b)

    w1_t = pad_w(w1.T, (D_IN, D_HID_P))
    w2_t = pad_w(w2.T, (D_HID_P, D_HID_P))
    w3_t = pad_w(w3.T, (D_HID_P, D_OUT_P))
    b1_p = pad_bias(b1, D_HID_P)
    b2_p = pad_bias(b2, D_HID_P)
    b3_p = pad_bias(b3, D_OUT_P)
    return (w1_t, b1_p, w2_t, b2_p, w3_t, b3_p)


@jax.jit
def fully_connected_net(x, prepared):
    """Forward pass. x: [B, 128] f32. prepared: output of prepare_params."""
    w1, b1, w2, b2, w3, b3 = prepared
    B = x.shape[0]
    # Small batches: one tile padded to an 8-row sublane multiple.
    # Large batches: 256-row tiles (multiple of 128 -> fills the MXU rows).
    if B <= B_TILE_LARGE:
        b_tile = _round_up(max(B, 8), 8)
    else:
        b_tile = B_TILE_LARGE
    b_pad = _round_up(B, b_tile)
    x_pad = jnp.pad(x, ((0, b_pad - B), (0, 0)))
    out = fused_mlp(x_pad, w1, b1, w2, b2, w3, b3, b_tile=b_tile)  # [b_pad, 128]
    return out[:B, :D_OUT]


def reference(x, params):
    (w1, b1), (w2, b2), (w3, b3) = params
    y = jnp.maximum(x @ w1.T + b1, 0.0)
    y = jnp.maximum(y @ w2.T + b2, 0.0)
    return y @ w3.T + b3


if __name__ == "__main__":
    key = jax.random.PRNGKey(0)
    kx, kp = jax.random.split(key)
    batch = 2
    x = jax.random.normal(kx, (batch, D_IN), jnp.float32)
    params = init_params(kp)
    prepared = jax.tree_util.tree_map(jax.block_until_ready, prepare_params(params))

    out = fully_connected_net(x, prepared)
    out = jax.block_until_ready(out)

    ref = reference(x, params)
    assert out.shape == (batch, D_OUT), out.shape
    # bf16 weights/activations (f32 accumulate) -> loosened tolerance vs f32 ref.
    max_err = float(jnp.max(jnp.abs(out - ref)))
    assert max_err < 5e-2, max_err
    print("KERNEL_OK")
</pallas_src>

<mosaic_0001>
module attributes {stable_mosaic.version = 11 : i64} {
  func.func @_fused_mlp_kernel(%arg0: i32, %arg1: memref<8x128xf32, #tpu.memory_space<vmem>>, %arg2: memref<128x1024xbf16, #tpu.memory_space<vmem>>, %arg3: memref<1x1024xf32, #tpu.memory_space<vmem>>, %arg4: memref<1024x1024xbf16, #tpu.memory_space<vmem>>, %arg5: memref<1x1024xf32, #tpu.memory_space<vmem>>, %arg6: memref<1024x128xbf16, #tpu.memory_space<vmem>>, %arg7: memref<1x128xf32, #tpu.memory_space<vmem>>, %arg8: memref<8x128xf32, #tpu.memory_space<vmem>>) attributes {dimension_semantics = [#tpu.dimension_semantics<parallel>], iteration_bounds = array<i64: 1>, scalar_prefetch = 0 : i64, scratch_operands = 0 : i64, tpu.core_type = #tpu.core_type<tc>, window_params = [{transform_indices = @transform_0, window_bounds = array<i64: 8, 128>}, {pipeline_mode = #tpu.pipeline_mode<synchronous>, transform_indices = @transform_1, window_bounds = array<i64: 128, 1024>}, {pipeline_mode = #tpu.pipeline_mode<synchronous>, transform_indices = @transform_2, window_bounds = array<i64: 1, 1024>}, {pipeline_mode = #tpu.pipeline_mode<synchronous>, transform_indices = @transform_3, window_bounds = array<i64: 1024, 1024>}, {pipeline_mode = #tpu.pipeline_mode<synchronous>, transform_indices = @transform_4, window_bounds = array<i64: 1, 1024>}, {pipeline_mode = #tpu.pipeline_mode<synchronous>, transform_indices = @transform_5, window_bounds = array<i64: 1024, 128>}, {pipeline_mode = #tpu.pipeline_mode<synchronous>, transform_indices = @transform_6, window_bounds = array<i64: 1, 128>}, {transform_indices = @transform_7, window_bounds = array<i64: 8, 128>}]} {
    %c0 = arith.constant 0 : index
    %c0_0 = arith.constant 0 : index
    %0 = vector.load %arg1[%c0, %c0_0] : memref<8x128xf32, #tpu.memory_space<vmem>>, vector<8x128xf32>
    %1 = arith.truncf %0 : vector<8x128xf32> to vector<8x128xbf16>
    %c0_1 = arith.constant 0 : index
    %c0_2 = arith.constant 0 : index
    %2 = vector.load %arg2[%c0_1, %c0_2] : memref<128x1024xbf16, #tpu.memory_space<vmem>>, vector<128x1024xbf16>
    %cst = arith.constant dense<0.000000e+00> : vector<8x1024xf32>
    %3 = tpu.matmul %1, %2, %cst {dimension_numbers = #tpu.dot_dimension_numbers<[1], [0], [0], [1], [0, 0, 1, 1], [], []>} : vector<8x128xbf16>, vector<128x1024xbf16>, vector<8x1024xf32> -> vector<8x1024xf32>
    %c0_3 = arith.constant 0 : index
    %c0_4 = arith.constant 0 : index
    %4 = vector.load %arg3[%c0_3, %c0_4] : memref<1x1024xf32, #tpu.memory_space<vmem>>, vector<1x1024xf32>
    %5 = vector.broadcast %4 : vector<1x1024xf32> to vector<8x1024xf32>
    %6 = arith.addf %3, %5 : vector<8x1024xf32>
    %cst_5 = arith.constant 0.000000e+00 : f32
    %7 = vector.broadcast %cst_5 : f32 to vector<8x1024xf32>
    %8 = arith.maximumf %6, %7 : vector<8x1024xf32>
    %9 = arith.truncf %8 : vector<8x1024xf32> to vector<8x1024xbf16>
    %c0_6 = arith.constant 0 : index
    %c0_7 = arith.constant 0 : index
    %10 = vector.load %arg4[%c0_6, %c0_7] : memref<1024x1024xbf16, #tpu.memory_space<vmem>>, vector<1024x1024xbf16>
    %cst_8 = arith.constant dense<0.000000e+00> : vector<8x1024xf32>
    %11 = tpu.matmul %9, %10, %cst_8 {dimension_numbers = #tpu.dot_dimension_numbers<[1], [0], [0], [1], [0, 0, 1, 1], [], []>} : vector<8x1024xbf16>, vector<1024x1024xbf16>, vector<8x1024xf32> -> vector<8x1024xf32>
    %c0_9 = arith.constant 0 : index
    %c0_10 = arith.constant 0 : index
    %12 = vector.load %arg5[%c0_9, %c0_10] : memref<1x1024xf32, #tpu.memory_space<vmem>>, vector<1x1024xf32>
    %13 = vector.broadcast %12 : vector<1x1024xf32> to vector<8x1024xf32>
    %14 = arith.addf %11, %13 : vector<8x1024xf32>
    %cst_11 = arith.constant 0.000000e+00 : f32
    %15 = vector.broadcast %cst_11 : f32 to vector<8x1024xf32>
    %16 = arith.maximumf %14, %15 : vector<8x1024xf32>
    %17 = arith.truncf %16 : vector<8x1024xf32> to vector<8x1024xbf16>
    %c0_12 = arith.constant 0 : index
    %c0_13 = arith.constant 0 : index
    %18 = vector.load %arg6[%c0_12, %c0_13] : memref<1024x128xbf16, #tpu.memory_space<vmem>>, vector<1024x128xbf16>
    %cst_14 = arith.constant dense<0.000000e+00> : vector<8x128xf32>
    %19 = tpu.matmul %17, %18, %cst_14 {dimension_numbers = #tpu.dot_dimension_numbers<[1], [0], [0], [1], [0, 0, 1, 1], [], []>} : vector<8x1024xbf16>, vector<1024x128xbf16>, vector<8x128xf32> -> vector<8x128xf32>
    %c0_15 = arith.constant 0 : index
    %c0_16 = arith.constant 0 : index
    %20 = vector.load %arg7[%c0_15, %c0_16] : memref<1x128xf32, #tpu.memory_space<vmem>>, vector<1x128xf32>
    %21 = vector.broadcast %20 : vector<1x128xf32> to vector<8x128xf32>
    %22 = arith.addf %19, %21 : vector<8x128xf32>
    %c0_17 = arith.constant 0 : index
    %c0_18 = arith.constant 0 : index
    %23 = vector.load %arg8[%c0_17, %c0_18] : memref<8x128xf32, #tpu.memory_space<vmem>>, vector<8x128xf32>
    tpu.vector_store %arg8[%c0_17, %c0_18], %22 {strides = array<i32>} : memref<8x128xf32, #tpu.memory_space<vmem>>, vector<8x128xf32>,
    return
  }
  func.func @transform_0(%arg0: i32) -> (i32, i32) {
    %c0_i32 = arith.constant 0 : i32
    %c0_i32_0 = arith.constant 0 : i32
    return %arg0, %c0_i32 : i32, i32
  }
  func.func @transform_1(%arg0: i32) -> (i32, i32) {
    %c0_i32 = arith.constant 0 : i32
    %c0_i32_0 = arith.constant 0 : i32
    %c0_i32_1 = arith.constant 0 : i32
    return %c0_i32, %c0_i32_0 : i32, i32
  }
  func.func @transform_2(%arg0: i32) -> (i32, i32) {
    %c0_i32 = arith.constant 0 : i32
    %c0_i32_0 = arith.constant 0 : i32
    %c0_i32_1 = arith.constant 0 : i32
    return %c0_i32, %c0_i32_0 : i32, i32
  }
  func.func @transform_3(%arg0: i32) -> (i32, i32) {
    %c0_i32 = arith.constant 0 : i32
    %c0_i32_0 = arith.constant 0 : i32
    %c0_i32_1 = arith.constant 0 : i32
    return %c0_i32, %c0_i32_0 : i32, i32
  }
  func.func @transform_4(%arg0: i32) -> (i32, i32) {
    %c0_i32 = arith.constant 0 : i32
    %c0_i32_0 = arith.constant 0 : i32
    %c0_i32_1 = arith.constant 0 : i32
    return %c0_i32, %c0_i32_0 : i32, i32
  }
  func.func @transform_5(%arg0: i32) -> (i32, i32) {
    %c0_i32 = arith.constant 0 : i32
    %c0_i32_0 = arith.constant 0 : i32
    %c0_i32_1 = arith.constant 0 : i32
    return %c0_i32, %c0_i32_0 : i32, i32
  }
  func.func @transform_6(%arg0: i32) -> (i32, i32) {
    %c0_i32 = arith.constant 0 : i32
    %c0_i32_0 = arith.constant 0 : i32
    %c0_i32_1 = arith.constant 0 : i32
    return %c0_i32, %c0_i32_0 : i32, i32
  }
  func.func @transform_7(%arg0: i32) -> (i32, i32) {
    %c0_i32 = arith.constant 0 : i32
    %c0_i32_0 = arith.constant 0 : i32
    return %arg0, %c0_i32 : i32, i32
  }
}

</mosaic_0001>

<bundles_post_ra>
// kernel: fully_connected_net.1
= control target key start
LH: loop header
LB: loop body
LE: loop exit
PB: predicated region body
PF: predicated region fallthrough
CT: control target
= control target key end

     0   :  { %12 = vsyncpa [#allocation3], 0  ;;  %s8809_s0 = inlined_call_operand.vmem [shape: f32[8,128], index: 0, kind: input, shape index: {}]   ;;  %s8810_s1 = inlined_call_operand.hbm [shape: bf16[128,1024], index: 1, kind: input, shape index: {}]   ;;  %s8811_s2 = inlined_call_operand.hbm [shape: f32[1,1024], index: 2, kind: input, shape index: {}]   ;;  %s8812_s3 = inlined_call_operand.hbm [shape: bf16[1024,1024], index: 3, kind: input, shape index: {}]   ;;  %s8813_s4 = inlined_call_operand.hbm [shape: f32[1,1024], index: 4, kind: input, shape index: {}]   ;;  %s8814_s5 = inlined_call_operand.hbm [shape: bf16[1024,128], index: 5, kind: input, shape index: {}]   ;;  %s8815_s6 = inlined_call_operand.hbm [shape: f32[1,128], index: 6, kind: input, shape index: {}]   ;;  %s8816_s7 = inlined_call_operand.vmem [shape: f32[8,128], index: 7, kind: output, shape index: {}]  }
   0x1   :  { %13 = vsyncpa [#allocation5], 0 }
   0x2   :  { %14 = vsyncpa [#allocation8], 0  ;;  %s36_s26 = sshll.u32 %s8811_s2, 4  ;;  %s37_s26 = int_to_ptr.hbm [resolvable:$true] %s36_s26 }
   0x3   :  { %15 = vsyncpa [#allocation11], 0  ;;  %s8570_s27 = smov [#allocation4]   ;;  %s60_s8 = sshll.u32 %s8813_s4, 4  ;;  %s61_s8 = int_to_ptr.hbm [resolvable:$true] %s60_s8 }
   0x4   :  { %s38_s28 = sshll.u32 %s8570_s27, 4  ;;  %s8571_s9 = smov [#allocation7]   ;;  %s39_s28 = int_to_ptr.vmem [resolvable:$true] %s38_s28 }
   0x5   :  { %41 = dma.hbm_to_vmem [thread:$0]  %s37_s26, 128, %s39_s28, [#allocation5]  }
   0x6   :  { %s62_s10 = sshll.u32 %s8571_s9, 4  ;;  %s22_s13 = sshll.u32 %s8810_s1, 4  ;;  %s63_s10 = int_to_ptr.vmem [resolvable:$true] %s62_s10  ;;  %s23_s13 = int_to_ptr.hbm [resolvable:$true] %s22_s13 }
   0x7   :  { %65 = dma.hbm_to_vmem [thread:$0]  %s61_s8, 128, %s63_s10, [#allocation8]  }
   0x8   :  { %s8572_s2 = smov [#allocation2]   ;;  %s46_s17 = sshll.u32 %s8812_s3, 4  ;;  %s47_s17 = int_to_ptr.hbm [resolvable:$true] %s46_s17 }
   0x9   :  { %s24_s14 = sshll.u32 %s8572_s2, 4  ;;  %s8573_s18 = smov 512   ;;  %s25_s14 = int_to_ptr.vmem [resolvable:$true] %s24_s14 }
   0xa   :  { %s8574_s4 = smov 32   ;;  %s8575_s19 = smov [#allocation6]  }
   0xb   :  { %30 = dma.hbm_to_vmem [thread:$0]  %s23_s13, 8192, %s25_s14, [#allocation3], %s8573_s18, %s8573_s18, %s8574_s4  }
   0xc   :  { %s48_s20 = sshll.u32 %s8575_s19, 4  ;;  %s70_s1 = sshll.u32 %s8814_s5, 4  ;;  %s49_s20 = int_to_ptr.vmem [resolvable:$true] %s48_s20  ;;  %s71_s1 = int_to_ptr.hbm [resolvable:$true] %s70_s1 }
   0xd   :  { %54 = dma.hbm_to_vmem [thread:$0]  %s47_s17, 65536, %s49_s20, [#allocation5], %s8573_s18, %s8573_s18, %s8574_s4  }
   0xe   :  { %s8576_s23 = smov [#allocation9]   ;;  %s84_s3 = sshll.u32 %s8815_s6, 4  ;;  %s85_s3 = int_to_ptr.hbm [resolvable:$true] %s84_s3 }
   0xf   :  { %s72_s24 = sshll.u32 %s8576_s23, 4  ;;  %s8577_s27 = smov 64   ;;  %s73_s24 = int_to_ptr.vmem [resolvable:$true] %s72_s24 }
  0x10   :  { %s8578_s28 = smov 4   ;;  %s8579_s29 = smov [#allocation10]  }
  0x11   :  { %78 = dma.hbm_to_vmem [thread:$0]  %s71_s1, 8192, %s73_s24, [#allocation8], %s8577_s27, %s8577_s27, %s8578_s28  }
  0x12   :  { %s86_s30 = sshll.u32 %s8579_s29, 4  ;;  %s87_s30 = int_to_ptr.vmem [resolvable:$true] %s86_s30 }
  0x13   :  { %89 = dma.hbm_to_vmem [thread:$0]  %s85_s3, 16, %s87_s30, [#allocation11]  }
  0x14   :  { %8562 = dma.done.wait [#allocation3], 8192  }
  0x15   :  { %8563 = vsyncadd [#allocation3], 4294959104 }
  0x16   :  { %8564 = dma.done.wait [#allocation5], 65664  }
  0x17   :  { %8565 = vsyncadd [#allocation5], 4294901632 }
  0x18   :  { %8566 = dma.done.wait [#allocation8], 8320  }
  0x19   :  { %8567 = vsyncadd [#allocation8], 4294958976 }
  0x1a   :  { %8568 = dma.done.wait [#allocation11], 16  }
  0x1b   :  { %8569 = vsyncadd [#allocation11], 4294967280  ;;  %v5431_v0 = vld [vmem:[#allocation2 + $0x1c0] sm:$0xf]  ;;  %v7821_v2 = vld [vmem:[#allocation2 + $0x1c4] sm:$0xf] }
  0x1c   :  { %v7825_v1 = vld [vmem:[#allocation2 + $0x1dc] sm:$0xf0]  ;;  %v5433_v4 = vld [vmem:[#allocation2 + $0x1e0] sm:$0xf0]  ;;  %v5439_v5 = vld [vmem:[#allocation2 + $0x1c8] sm:$0xf] }
  0x1d   :  { %v5432_v3 = vor.u32 %v7825_v1, %v5431_v0  ;;  %v7826_v6 = vld [vmem:[#allocation2 + $0x1e4] sm:$0xf0]  ;;  %v5436_v7 = vor.u32 %v7821_v2, %v5433_v4  ;;  %v7822_v9 = vld [vmem:[#allocation2 + $0x1cc] sm:$0xf]  ;;  %v5399_v11 = vld [vmem:[#allocation2 + $0x180] sm:$0xf] }
  0x1e   :  { %v5440_v8 = vor.u32 %v7826_v6, %v5439_v5  ;;  %v5441_v10 = vld [vmem:[#allocation2 + $0x1e8] sm:$0xf0]  ;;  %v7817_v13 = vld [vmem:[#allocation2 + $0x19c] sm:$0xf0]  ;;  %v7813_v14 = vld [vmem:[#allocation2 + $0x184] sm:$0xf] }
  0x1f   :  { %518 = vmatpush.bf16.msra.mxu0 %v5432_v3  ;;  %v5444_v12 = vor.u32 %v7822_v9, %v5441_v10  ;;  %v5401_v15 = vld [vmem:[#allocation2 + $0x1a0] sm:$0xf0]  ;;  %531 = vmatpush.bf16.msra.mxu1 %v5436_v7  ;;  %v5400_v16 = vor.u32 %v7817_v13, %v5399_v11  ;;  %v5407_v18 = vld [vmem:[#allocation2 + $0x188] sm:$0xf]  ;;  %v7814_v20 = vld [vmem:[#allocation2 + $0x18c] sm:$0xf] }
  0x20   :  { %544 = vmatpush.bf16.msra.mxu2 %v5440_v8  ;;  %v5404_v17 = vor.u32 %v7813_v14, %v5401_v15  ;;  %v7818_v19 = vld [vmem:[#allocation2 + $0x1a4] sm:$0xf0]  ;;  %v5409_v22 = vld [vmem:[#allocation2 + $0x1a8] sm:$0xf0]  ;;  %v5367_v23 = vld [vmem:[#allocation2 + $0x140] sm:$0xf] }
  0x21   :  { %557 = vmatpush.bf16.msra.mxu3 %v5444_v12  ;;  %v5408_v21 = vor.u32 %v7818_v19, %v5407_v18  ;;  %v7809_v24 = vld [vmem:[#allocation2 + $0x15c] sm:$0xf0]  ;;  %v5412_v25 = vor.u32 %v7814_v20, %v5409_v22  ;;  %v7805_v26 = vld [vmem:[#allocation2 + $0x144] sm:$0xf]  ;;  %v5375_v28 = vld [vmem:[#allocation2 + $0x148] sm:$0xf] }
  0x22   :  { %v5369_v27 = vld [vmem:[#allocation2 + $0x160] sm:$0xf0]  ;;  %v5368_v29 = vor.u32 %v7809_v24, %v5367_v23  ;;  %v7810_v30 = vld [vmem:[#allocation2 + $0x164] sm:$0xf0]  ;;  %v7806_v31 = vld [vmem:[#allocation2 + $0x14c] sm:$0xf] }
  0x23   :  { %519 = vmatpush.bf16.msra.mxu0 %v5400_v16  ;;  %v5377_v32 = vld [vmem:[#allocation2 + $0x168] sm:$0xf0]  ;;  %532 = vmatpush.bf16.msra.mxu1 %v5404_v17  ;;  %v5372_v33 = vor.u32 %v7805_v26, %v5369_v27  ;;  %v5376_v34 = vor.u32 %v7810_v30, %v5375_v28  ;;  %v5335_v35 = vld [vmem:[#allocation2 + $0x100] sm:$0xf]  ;;  %v7797_v37 = vld [vmem:[#allocation2 + $0x104] sm:$0xf] }
  0x24   :  { %545 = vmatpush.bf16.msra.mxu2 %v5408_v21  ;;  %v7801_v36 = vld [vmem:[#allocation2 + $0x11c] sm:$0xf0]  ;;  %v5380_v38 = vor.u32 %v7806_v31, %v5377_v32  ;;  %v5337_v39 = vld [vmem:[#allocation2 + $0x120] sm:$0xf0]  ;;  %v5343_v40 = vld [vmem:[#allocation2 + $0x108] sm:$0xf] }
  0x25   :  { %558 = vmatpush.bf16.msra.mxu3 %v5412_v25  ;;  %v7802_v41 = vld [vmem:[#allocation2 + $0x124] sm:$0xf0]  ;;  %v7798_v42 = vld [vmem:[#allocation2 + $0x10c] sm:$0xf]  ;;  %v5336_v44 = vor.u32 %v7801_v36, %v5335_v35  ;;  %v5340_v45 = vor.u32 %v7797_v37, %v5337_v39  ;;  %v5303_v47 = vld [vmem:[#allocation2 + $0xc0] sm:$0xf] }
  0x26   :  { %v5345_v43 = vld [vmem:[#allocation2 + $0x128] sm:$0xf0]  ;;  %v5344_v46 = vor.u32 %v7802_v41, %v5343_v40  ;;  %v7793_v48 = vld [vmem:[#allocation2 + $0xdc] sm:$0xf0]  ;;  %v7789_v49 = vld [vmem:[#allocation2 + $0xc4] sm:$0xf] }
  0x27   :  { %520 = vmatpush.bf16.msra.mxu0 %v5368_v29  ;;  %533 = vmatpush.bf16.msra.mxu1 %v5372_v33  ;;  %v5348_v50 = vor.u32 %v7798_v42, %v5345_v43  ;;  %v5305_v51 = vld [vmem:[#allocation2 + $0xe0] sm:$0xf0]  ;;  %v5311_v52 = vld [vmem:[#allocation2 + $0xc8] sm:$0xf]  ;;  %v7790_v54 = vld [vmem:[#allocation2 + $0xcc] sm:$0xf]  ;;  %v5304_v56 = vor.u32 %v7793_v48, %v5303_v47 }
  0x28   :  { %546 = vmatpush.bf16.msra.mxu2 %v5376_v34  ;;  %v7794_v53 = vld [vmem:[#allocation2 + $0xe4] sm:$0xf0]  ;;  %v5313_v55 = vld [vmem:[#allocation2 + $0xe8] sm:$0xf0]  ;;  %v5308_v57 = vor.u32 %v7789_v49, %v5305_v51  ;;  %v5271_v59 = vld [vmem:[#allocation2 + $0x80] sm:$0xf] }
  0x29   :  { %559 = vmatpush.bf16.msra.mxu3 %v5380_v38  ;;  %v5312_v58 = vor.u32 %v7794_v53, %v5311_v52  ;;  %v7785_v60 = vld [vmem:[#allocation2 + $0x9c] sm:$0xf0]  ;;  %v7781_v61 = vld [vmem:[#allocation2 + $0x84] sm:$0xf]  ;;  %v5316_v62 = vor.u32 %v7790_v54, %v5313_v55  ;;  %v5279_v0 = vld [vmem:[#allocation2 + $0x88] sm:$0xf] }
  0x2a   :  { %v5273_v63 = vld [vmem:[#allocation2 + $0xa0] sm:$0xf0]  ;;  %v7786_v1 = vld [vmem:[#allocation2 + $0xa4] sm:$0xf0]  ;;  %v7782_v2 = vld [vmem:[#allocation2 + $0x8c] sm:$0xf]  ;;  %v5272_v4 = vor.u32 %v7785_v60, %v5271_v59 }
  0x2b   :  { %521 = vmatpush.bf16.msra.mxu0 %v5336_v44  ;;  %534 = vmatpush.bf16.msra.mxu1 %v5340_v45  ;;  %v5281_v3 = vld [vmem:[#allocation2 + $0xa8] sm:$0xf0]  ;;  %v5276_v5 = vor.u32 %v7781_v61, %v5273_v63  ;;  %v5280_v6 = vor.u32 %v7786_v1, %v5279_v0  ;;  %v5239_v7 = vld [vmem:[#allocation2 + $0x40] sm:$0xf]  ;;  %v7773_v9 = vld [vmem:[#allocation2 + $0x44] sm:$0xf] }
  0x2c   :  { %547 = vmatpush.bf16.msra.mxu2 %v5344_v46  ;;  %v7777_v8 = vld [vmem:[#allocation2 + $0x5c] sm:$0xf0]  ;;  %v5284_v10 = vor.u32 %v7782_v2, %v5281_v3  ;;  %v5241_v11 = vld [vmem:[#allocation2 + $0x60] sm:$0xf0]  ;;  %v5247_v12 = vld [vmem:[#allocation2 + $0x48] sm:$0xf] }
  0x2d   :  { %560 = vmatpush.bf16.msra.mxu3 %v5348_v50  ;;  %v7778_v13 = vld [vmem:[#allocation2 + $0x64] sm:$0xf0]  ;;  %v7774_v14 = vld [vmem:[#allocation2 + $0x4c] sm:$0xf]  ;;  %v5240_v16 = vor.u32 %v7777_v8, %v5239_v7  ;;  %v5207_v17 = vld [vmem:[#allocation2] sm:$0xf]  ;;  %v5244_v19 = vor.u32 %v7773_v9, %v5241_v11 }
  0x2e   :  { %v5249_v15 = vld [vmem:[#allocation2 + $0x68] sm:$0xf0]  ;;  %v7769_v18 = vld [vmem:[#allocation2 + $0x1c] sm:$0xf0]  ;;  %v5248_v20 = vor.u32 %v7778_v13, %v5247_v12  ;;  %v7765_v21 = vld [vmem:[#allocation2 + $0x4] sm:$0xf] }
  0x2f   :  { %522 = vmatpush.bf16.msra.mxu0 %v5304_v56  ;;  %535 = vmatpush.bf16.msra.mxu1 %v5308_v57  ;;  %v5209_v22 = vld [vmem:[#allocation2 + $0x20] sm:$0xf0]  ;;  %v5215_v23 = vld [vmem:[#allocation2 + $0x8] sm:$0xf]  ;;  %v5252_v24 = vor.u32 %v7774_v14, %v5249_v15  ;;  %v7766_v26 = vld [vmem:[#allocation2 + $0xc] sm:$0xf]  ;;  %v5208_v31 = vor.u32 %v7769_v18, %v5207_v17 }
  0x30   :  { %548 = vmatpush.bf16.msra.mxu2 %v5312_v58  ;;  %v7770_v25 = vld [vmem:[#allocation2 + $0x24] sm:$0xf0]  ;;  %v5217_v27 = vld [vmem:[#allocation2 + $0x28] sm:$0xf0]  ;;  %v5447_v28 = vld [vmem:[#allocation2 + $0x1d0] sm:$0xf]  ;;  %v5212_v35 = vor.u32 %v7765_v21, %v5209_v22 }
  0x31   :  { %561 = vmatpush.bf16.msra.mxu3 %v5316_v62  ;;  %v7827_v29 = vld [vmem:[#allocation2 + $0x1ec] sm:$0xf0]  ;;  %v7823_v30 = vld [vmem:[#allocation2 + $0x1d4] sm:$0xf]  ;;  %v5455_v33 = vld [vmem:[#allocation2 + $0x1d8] sm:$0xf]  ;;  %v5216_v36 = vor.u32 %v7770_v25, %v5215_v23  ;;  %v5220_v40 = vor.u32 %v7766_v26, %v5217_v27 }
  0x32   :  { %v5449_v32 = vld [vmem:[#allocation2 + $0x1f0] sm:$0xf0]  ;;  %v7828_v34 = vld [vmem:[#allocation2 + $0x1f4] sm:$0xf0]  ;;  %v7824_v37 = vld [vmem:[#allocation2 + $0x1dc] sm:$0xf]  ;;  %v5448_v41 = vor.u32 %v7827_v29, %v5447_v28 }
  0x33   :  { %523 = vmatpush.bf16.msra.mxu0 %v5272_v4  ;;  %536 = vmatpush.bf16.msra.mxu1 %v5276_v5  ;;  %v5457_v38 = vld [vmem:[#allocation2 + $0x1f8] sm:$0xf0]  ;;  %v114_v39 = vld [vmem:[%s8809_s0] sm:$0xff]  ;;  %v5452_v42 = vor.u32 %v7823_v30, %v5449_v32  ;;  %v5456_v43 = vor.u32 %v7828_v34, %v5455_v33  ;;  %v5415_v44 = vld [vmem:[#allocation2 + $0x190] sm:$0xf] }
  0x34   :  { %549 = vmatpush.bf16.msra.mxu2 %v5280_v6  ;;  %v7819_v45 = vld [vmem:[#allocation2 + $0x1ac] sm:$0xf0]  ;;  %v7815_v46 = vld [vmem:[#allocation2 + $0x194] sm:$0xf]  ;;  %v5460_v47 = vor.u32 %v7824_v37, %v5457_v38  ;;  %v8641_v48 = vpack.c.bf16 %v114_v39, %v114_v39  ;;  %v5423_v50 = vld [vmem:[#allocation2 + $0x198] sm:$0xf] }
  0x35   :  { %562 = vmatpush.bf16.msra.mxu3 %v5284_v10  ;;  %v5417_v49 = vld [vmem:[#allocation2 + $0x1b0] sm:$0xf0]  ;;  %v7820_v51 = vld [vmem:[#allocation2 + $0x1b4] sm:$0xf0]  ;;  %v7816_v52 = vld [vmem:[#allocation2 + $0x19c] sm:$0xf]  ;;  %v5416_v54 = vor.u32 %v7819_v45, %v5415_v44 }
  0x36   :  { %v5425_v53 = vld [vmem:[#allocation2 + $0x1b8] sm:$0xf0]  ;;  %v5420_v55 = vor.u32 %v7815_v46, %v5417_v49  ;;  %v5424_v56 = vor.u32 %v7820_v51, %v5423_v50  ;;  %v5383_v57 = vld [vmem:[#allocation2 + $0x150] sm:$0xf]  ;;  %v7807_v59 = vld [vmem:[#allocation2 + $0x154] sm:$0xf] }
  0x37   :  { %524 = vmatpush.bf16.msra.mxu0 %v5240_v16  ;;  %537 = vmatpush.bf16.msra.mxu1 %v5244_v19  ;;  %v7811_v58 = vld [vmem:[#allocation2 + $0x16c] sm:$0xf0]  ;;  %v5428_v60 = vor.u32 %v7816_v52, %v5425_v53  ;;  %v5385_v61 = vld [vmem:[#allocation2 + $0x170] sm:$0xf0]  ;;  %v5391_v62 = vld [vmem:[#allocation2 + $0x158] sm:$0xf] }
  0x38   :  { %550 = vmatpush.bf16.msra.mxu2 %v5248_v20  ;;  %v7812_v63 = vld [vmem:[#allocation2 + $0x174] sm:$0xf0]  ;;  %v7808_v0 = vld [vmem:[#allocation2 + $0x15c] sm:$0xf]  ;;  %v5384_v2 = vor.u32 %v7811_v58, %v5383_v57  ;;  %v5388_v3 = vor.u32 %v7807_v59, %v5385_v61  ;;  %v5351_v5 = vld [vmem:[#allocation2 + $0x110] sm:$0xf] }
  0x39   :  { %563 = vmatpush.bf16.msra.mxu3 %v5252_v24  ;;  %v5393_v1 = vld [vmem:[#allocation2 + $0x178] sm:$0xf0]  ;;  %v5392_v4 = vor.u32 %v7812_v63, %v5391_v62  ;;  %v7803_v6 = vld [vmem:[#allocation2 + $0x12c] sm:$0xf0]  ;;  %v7799_v7 = vld [vmem:[#allocation2 + $0x114] sm:$0xf] }
  0x3a   :  { %v5396_v8 = vor.u32 %v7808_v0, %v5393_v1  ;;  %v5353_v9 = vld [vmem:[#allocation2 + $0x130] sm:$0xf0]  ;;  %v5359_v10 = vld [vmem:[#allocation2 + $0x118] sm:$0xf]  ;;  %v7800_v12 = vld [vmem:[#allocation2 + $0x11c] sm:$0xf]  ;;  %v5352_v14 = vor.u32 %v7803_v6, %v5351_v5 }
  0x3b   :  { %525 = vmatpush.bf16.msra.mxu0 %v5208_v31  ;;  %538 = vmatpush.bf16.msra.mxu1 %v5212_v35  ;;  %v7804_v11 = vld [vmem:[#allocation2 + $0x134] sm:$0xf0]  ;;  %v5361_v13 = vld [vmem:[#allocation2 + $0x138] sm:$0xf0]  ;;  %v5356_v15 = vor.u32 %v7799_v7, %v5353_v9  ;;  %v5319_v17 = vld [vmem:[#allocation2 + $0xd0] sm:$0xf] }
  0x3c   :  { %551 = vmatpush.bf16.msra.mxu2 %v5216_v36  ;;  %v5360_v16 = vor.u32 %v7804_v11, %v5359_v10  ;;  %v7795_v18 = vld [vmem:[#allocation2 + $0xec] sm:$0xf0]  ;;  %v7791_v19 = vld [vmem:[#allocation2 + $0xd4] sm:$0xf]  ;;  %v5364_v20 = vor.u32 %v7800_v12, %v5361_v13  ;;  %v5327_v22 = vld [vmem:[#allocation2 + $0xd8] sm:$0xf] }
  0x3d   :  { %564 = vmatpush.bf16.msra.mxu3 %v5220_v40  ;;  %v5321_v21 = vld [vmem:[#allocation2 + $0xf0] sm:$0xf0]  ;;  %v7796_v23 = vld [vmem:[#allocation2 + $0xf4] sm:$0xf0]  ;;  %v7792_v24 = vld [vmem:[#allocation2 + $0xdc] sm:$0xf]  ;;  %v5320_v26 = vor.u32 %v7795_v18, %v5319_v17 }
  0x3e   :  { %526 = vmatmul.bf16.vlgmr.msra.gmra.mxu0 %v8641_v48  ;;  %539 = vmatmul.bf16.vlgmr.msra.gmra.mxu1 %v8641_v48  ;;  %v5329_v25 = vld [vmem:[#allocation2 + $0xf8] sm:$0xf0]  ;;  %v5324_v27 = vor.u32 %v7791_v19, %v5321_v21  ;;  %v5328_v28 = vor.u32 %v7796_v23, %v5327_v22  ;;  %v5287_v29 = vld [vmem:[#allocation2 + $0x90] sm:$0xf]  ;;  %v7783_v31 = vld [vmem:[#allocation2 + $0x94] sm:$0xf] }
  0x3f   :  { %570 = vmatpush.bf16.msrb.mxu0 %v5448_v41  ;;  %583 = vmatpush.bf16.msrb.mxu1 %v5452_v42  ;;  %v7787_v30 = vld [vmem:[#allocation2 + $0xac] sm:$0xf0]  ;;  %v5332_v32 = vor.u32 %v7792_v24, %v5329_v25  ;;  %v5289_v33 = vld [vmem:[#allocation2 + $0xb0] sm:$0xf0]  ;;  %v5295_v34 = vld [vmem:[#allocation2 + $0x98] sm:$0xf] }
  0x40   :  { %596 = vmatpush.bf16.msrb.mxu2 %v5456_v43  ;;  %565 = vmatmul.bf16.vlgmr.msra.gmra.mxu3 %v8641_v48  ;;  %v7788_v35 = vld [vmem:[#allocation2 + $0xb4] sm:$0xf0]  ;;  %v7784_v36 = vld [vmem:[#allocation2 + $0x9c] sm:$0xf]  ;;  %v5288_v38 = vor.u32 %v7787_v30, %v5287_v29  ;;  %v5292_v39 = vor.u32 %v7783_v31, %v5289_v33  ;;  %v5255_v41 = vld [vmem:[#allocation2 + $0x50] sm:$0xf] }
  0x41   :  { %609 = vmatpush.bf16.msrb.mxu3 %v5460_v47  ;;  %552 = vmatmul.bf16.vlgmr.msra.gmra.mxu2 %v8641_v48  ;;  %v5297_v37 = vld [vmem:[#allocation2 + $0xb8] sm:$0xf0]  ;;  %v5296_v40 = vor.u32 %v7788_v35, %v5295_v34  ;;  %v7779_v42 = vld [vmem:[#allocation2 + $0x6c] sm:$0xf0]  ;;  %v7775_v43 = vld [vmem:[#allocation2 + $0x54] sm:$0xf] }
  0x42   :  { %v5300_v44 = vor.u32 %v7784_v36, %v5297_v37  ;;  %v5257_v45 = vld [vmem:[#allocation2 + $0x70] sm:$0xf0]  ;;  %v5263_v46 = vld [vmem:[#allocation2 + $0x58] sm:$0xf]  ;;  %v7776_v49 = vld [vmem:[#allocation2 + $0x5c] sm:$0xf]  ;;  %v5256_v51 = vor.u32 %v7779_v42, %v5255_v41 }
  0x43   :  { %571 = vmatpush.bf16.msrb.mxu0 %v5416_v54  ;;  %584 = vmatpush.bf16.msrb.mxu1 %v5420_v55  ;;  %v7780_v47 = vld [vmem:[#allocation2 + $0x74] sm:$0xf0]  ;;  %v5265_v50 = vld [vmem:[#allocation2 + $0x78] sm:$0xf0]  ;;  %v5223_v52 = vld [vmem:[#allocation2 + $0x10] sm:$0xf]  ;;  %v5260_v53 = vor.u32 %v7775_v43, %v5257_v45 }
  0x44   :  { %597 = vmatpush.bf16.msrb.mxu2 %v5424_v56  ;;  %v5264_v54 = vor.u32 %v7780_v47, %v5263_v46  ;;  %v7771_v55 = vld [vmem:[#allocation2 + $0x2c] sm:$0xf0]  ;;  %v7767_v56 = vld [vmem:[#allocation2 + $0x14] sm:$0xf]  ;;  %v5268_v58 = vor.u32 %v7776_v49, %v5265_v50  ;;  %v5231_v59 = vld [vmem:[#allocation2 + $0x18] sm:$0xf] }
  0x45   :  { %610 = vmatpush.bf16.msrb.mxu3 %v5428_v60  ;;  %v5225_v57 = vld [vmem:[#allocation2 + $0x30] sm:$0xf0]  ;;  %v7772_v60 = vld [vmem:[#allocation2 + $0x34] sm:$0xf0]  ;;  %v7768_v61 = vld [vmem:[#allocation2 + $0x1c] sm:$0xf]  ;;  %v5224_v1 = vor.u32 %v7771_v55, %v5223_v52 }
  0x46   :  { %v5233_v62 = vld [vmem:[#allocation2 + $0x38] sm:$0xf0]  ;;  %v5687_v63 = vld [vmem:[#allocation6 + $0x1c0] sm:$0xf]  ;;  %v5232_v5 = vor.u32 %v7772_v60, %v5231_v59 }
  0x47   :  { %572 = vmatpush.bf16.msrb.mxu0 %v5384_v2  ;;  %585 = vmatpush.bf16.msrb.mxu1 %v5388_v3  ;;  %v7889_v0 = vld [vmem:[#allocation6 + $0x1dc] sm:$0xf0]  ;;  %v5236_v6 = vor.u32 %v7768_v61, %v5233_v62 }
  0x48   :  { %598 = vmatpush.bf16.msrb.mxu2 %v5392_v4  ;;  %v5943_v2 = vld [vmem:[#allocation6 + $0x3c0] sm:$0xf]  ;;  %v5228_v4 = vor.u32 %v7767_v56, %v5225_v57  ;;  %v5688_v7 = vor.u32 %v7889_v0, %v5687_v63 }
  0x49   :  { %611 = vmatpush.bf16.msrb.mxu3 %v5396_v8  ;;  %v7953_v3 = vld [vmem:[#allocation6 + $0x3dc] sm:$0xf0] }
  0x4a   :  { %v5655_v8 = vld [vmem:[#allocation6 + $0x180] sm:$0xf]  ;;  %v5944_v11 = vor.u32 %v7953_v3, %v5943_v2 }
  0x4b   :  { %573 = vmatpush.bf16.msrb.mxu0 %v5352_v14  ;;  %586 = vmatpush.bf16.msrb.mxu1 %v5356_v15  ;;  %v6199_v9 = vld [vmem:[#allocation6 + $0x5c0] sm:$0xf] }
  0x4c   :  { %599 = vmatpush.bf16.msrb.mxu2 %v5360_v16  ;;  %v8017_v10 = vld [vmem:[#allocation6 + $0x5dc] sm:$0xf0] }
  0x4d   :  { %612 = vmatpush.bf16.msrb.mxu3 %v5364_v20  ;;  %v7881_v12 = vld [vmem:[#allocation6 + $0x19c] sm:$0xf0]  ;;  %v6200_v17 = vor.u32 %v8017_v10, %v6199_v9 }
  0x4e   :  { %v6455_v13 = vld [vmem:[#allocation6 + $0x7c0] sm:$0xf]  ;;  %v5656_v18 = vor.u32 %v7881_v12, %v5655_v8 }
  0x4f   :  { %574 = vmatpush.bf16.msrb.mxu0 %v5320_v26  ;;  %587 = vmatpush.bf16.msrb.mxu1 %v5324_v27  ;;  %v8081_v14 = vld [vmem:[#allocation6 + $0x7dc] sm:$0xf0] }
  0x50   :  { %600 = vmatpush.bf16.msrb.mxu2 %v5328_v28  ;;  %v5911_v15 = vld [vmem:[#allocation6 + $0x380] sm:$0xf]  ;;  %v6456_v19 = vor.u32 %v8081_v14, %v6455_v13 }
  0x51   :  { %613 = vmatpush.bf16.msrb.mxu3 %v5332_v32  ;;  %v7945_v16 = vld [vmem:[#allocation6 + $0x39c] sm:$0xf0] }
  0x52   :  { %v5623_v20 = vld [vmem:[#allocation6 + $0x140] sm:$0xf]  ;;  %v5912_v23 = vor.u32 %v7945_v16, %v5911_v15 }
  0x53   :  { %575 = vmatpush.bf16.msrb.mxu0 %v5288_v38  ;;  %588 = vmatpush.bf16.msrb.mxu1 %v5292_v39  ;;  %v6167_v21 = vld [vmem:[#allocation6 + $0x580] sm:$0xf] }
  0x54   :  { %601 = vmatpush.bf16.msrb.mxu2 %v5296_v40  ;;  %v8009_v22 = vld [vmem:[#allocation6 + $0x59c] sm:$0xf0] }
  0x55   :  { %614 = vmatpush.bf16.msrb.mxu3 %v5300_v44  ;;  %v7873_v24 = vld [vmem:[#allocation6 + $0x15c] sm:$0xf0]  ;;  %v6168_v29 = vor.u32 %v8009_v22, %v6167_v21 }
  0x56   :  { %v6423_v25 = vld [vmem:[#allocation6 + $0x780] sm:$0xf]  ;;  %v5624_v30 = vor.u32 %v7873_v24, %v5623_v20 }
  0x57   :  { %576 = vmatpush.bf16.msrb.mxu0 %v5256_v51  ;;  %589 = vmatpush.bf16.msrb.mxu1 %v5260_v53  ;;  %v8073_v26 = vld [vmem:[#allocation6 + $0x79c] sm:$0xf0] }
  0x58   :  { %602 = vmatpush.bf16.msrb.mxu2 %v5264_v54  ;;  %v5879_v27 = vld [vmem:[#allocation6 + $0x340] sm:$0xf]  ;;  %v6424_v31 = vor.u32 %v8073_v26, %v6423_v25 }
  0x59   :  { %615 = vmatpush.bf16.msrb.mxu3 %v5268_v58  ;;  %v7937_v28 = vld [vmem:[#allocation6 + $0x35c] sm:$0xf0] }
  0x5a   :  { %v5591_v32 = vld [vmem:[#allocation6 + $0x100] sm:$0xf]  ;;  %v5880_v35 = vor.u32 %v7937_v28, %v5879_v27 }
  0x5b   :  { %577 = vmatpush.bf16.msrb.mxu0 %v5224_v1  ;;  %590 = vmatpush.bf16.msrb.mxu1 %v5228_v4  ;;  %v6135_v33 = vld [vmem:[#allocation6 + $0x540] sm:$0xf] }
  0x5c   :  { %603 = vmatpush.bf16.msrb.mxu2 %v5232_v5  ;;  %v8001_v34 = vld [vmem:[#allocation6 + $0x55c] sm:$0xf0] }
  0x5d   :  { %616 = vmatpush.bf16.msrb.mxu3 %v5236_v6  ;;  %v7865_v36 = vld [vmem:[#allocation6 + $0x11c] sm:$0xf0]  ;;  %v6136_v41 = vor.u32 %v8001_v34, %v6135_v33 }
  0x5e   :  { %578 = vmatmul.bf16.vlgmr.msrb.gmra.mxu0 %v8641_v48  ;;  %591 = vmatmul.bf16.vlgmr.msrb.gmra.mxu1 %v8641_v48  ;;  %v6391_v37 = vld [vmem:[#allocation6 + $0x740] sm:$0xf] }
  0x5f   :  { %3728 = vmatpush.bf16.msra.mxu0 %v5688_v7  ;;  %3741 = vmatpush.bf16.msra.mxu1 %v5944_v11  ;;  %v8065_v38 = vld [vmem:[#allocation6 + $0x75c] sm:$0xf0] }
  0x60   :  { %604 = vmatmul.bf16.vlgmr.msrb.gmra.mxu2 %v8641_v48  ;;  %617 = vmatmul.bf16.vlgmr.msrb.gmra.mxu3 %v8641_v48  ;;  %v5847_v39 = vld [vmem:[#allocation6 + $0x300] sm:$0xf]  ;;  %v5592_v48 = vor.u32 %v7865_v36, %v5591_v32  ;;  %v6392_v43 = vor.u32 %v8065_v38, %v6391_v37 }
  0x61   :  { %3754 = vmatpush.bf16.msra.mxu2 %v6200_v17  ;;  %3767 = vmatpush.bf16.msra.mxu3 %v6456_v19  ;;  %v7929_v40 = vld [vmem:[#allocation6 + $0x31c] sm:$0xf0] }
  0x62   :  { %v5559_v42 = vld [vmem:[#allocation6 + $0xc0] sm:$0xf]  ;;  %v5848_v46 = vor.u32 %v7929_v40, %v5847_v39 }
  0x63   :  { %3729 = vmatpush.bf16.msra.mxu0 %v5656_v18  ;;  %3742 = vmatpush.bf16.msra.mxu1 %v5912_v23  ;;  %v6103_v44 = vld [vmem:[#allocation6 + $0x500] sm:$0xf] }
  0x64   :  { %v7993_v45 = vld [vmem:[#allocation6 + $0x51c] sm:$0xf0] }
  0x65   :  { %3755 = vmatpush.bf16.msra.mxu2 %v6168_v29  ;;  %3768 = vmatpush.bf16.msra.mxu3 %v6424_v31  ;;  %v7857_v47 = vld [vmem:[#allocation6 + $0xdc] sm:$0xf0]  ;;  %v6104_v53 = vor.u32 %v7993_v45, %v6103_v44 }
  0x66   :  { %v6359_v49 = vld [vmem:[#allocation6 + $0x700] sm:$0xf]  ;;  %v5560_v54 = vor.u32 %v7857_v47, %v5559_v42 }
  0x67   :  { %3730 = vmatpush.bf16.msra.mxu0 %v5624_v30  ;;  %3743 = vmatpush.bf16.msra.mxu1 %v5880_v35  ;;  %v8057_v50 = vld [vmem:[#allocation6 + $0x71c] sm:$0xf0] }
  0x68   :  { %v5815_v51 = vld [vmem:[#allocation6 + $0x2c0] sm:$0xf]  ;;  %v6360_v55 = vor.u32 %v8057_v50, %v6359_v49 }
  0x69   :  { %v7921_v52 = vld [vmem:[#allocation6 + $0x2dc] sm:$0xf0]  ;;  %3756 = vmatpush.bf16.msra.mxu2 %v6136_v41  ;;  %3769 = vmatpush.bf16.msra.mxu3 %v6392_v43 }
  0x6a   :  { %v5527_v56 = vld [vmem:[#allocation6 + $0x80] sm:$0xf]  ;;  %v5816_v59 = vor.u32 %v7921_v52, %v5815_v51 }
  0x6b   :  { %3731 = vmatpush.bf16.msra.mxu0 %v5592_v48  ;;  %v6071_v57 = vld [vmem:[#allocation6 + $0x4c0] sm:$0xf]  ;;  %3744 = vmatpush.bf16.msra.mxu1 %v5848_v46 }
  0x6c   :  { %v7985_v58 = vld [vmem:[#allocation6 + $0x4dc] sm:$0xf0] }
  0x6d   :  { %v7849_v60 = vld [vmem:[#allocation6 + $0x9c] sm:$0xf0]  ;;  %3757 = vmatpush.bf16.msra.mxu2 %v6104_v53  ;;  %v6072_v1 = vor.u32 %v7985_v58, %v6071_v57  ;;  %3770 = vmatpush.bf16.msra.mxu3 %v6360_v55 }
  0x6e   :  { %v6327_v61 = vld [vmem:[#allocation6 + $0x6c0] sm:$0xf]  ;;  %v5528_v2 = vor.u32 %v7849_v60, %v5527_v56 }
  0x6f   :  { %v8049_v62 = vld [vmem:[#allocation6 + $0x6dc] sm:$0xf0]  ;;  %3732 = vmatpush.bf16.msra.mxu0 %v5560_v54  ;;  %3745 = vmatpush.bf16.msra.mxu1 %v5816_v59 }
  0x70   :  { %v5783_v63 = vld [vmem:[#allocation6 + $0x280] sm:$0xf]  ;;  %v6328_v3 = vor.u32 %v8049_v62, %v6327_v61 }
  0x71   :  { %v7913_v0 = vld [vmem:[#allocation6 + $0x29c] sm:$0xf0]  ;;  %3758 = vmatpush.bf16.msra.mxu2 %v6072_v1 }
  0x72   :  { %v5495_v4 = vld [vmem:[#allocation6 + $0x40] sm:$0xf]  ;;  %v5784_v7 = vor.u32 %v7913_v0, %v5783_v63  ;;  %3771 = vmatpush.bf16.msra.mxu3 %v6328_v3 }
  0x73   :  { %v6039_v5 = vld [vmem:[#allocation6 + $0x480] sm:$0xf]  ;;  %3733 = vmatpush.bf16.msra.mxu0 %v5528_v2 }
  0x74   :  { %v7977_v6 = vld [vmem:[#allocation6 + $0x49c] sm:$0xf0]  ;;  %3746 = vmatpush.bf16.msra.mxu1 %v5784_v7 }
  0x75   :  { %v7841_v8 = vld [vmem:[#allocation6 + $0x5c] sm:$0xf0]  ;;  %v6040_v13 = vor.u32 %v7977_v6, %v6039_v5 }
  0x76   :  { %v6295_v9 = vld [vmem:[#allocation6 + $0x680] sm:$0xf]  ;;  %v5496_v15 = vor.u32 %v7841_v8, %v5495_v4 }
  0x77   :  { %v8041_v10 = vld [vmem:[#allocation6 + $0x69c] sm:$0xf0]  ;;  %3759 = vmatpush.bf16.msra.mxu2 %v6040_v13 }
  0x78   :  { %v5751_v11 = vld [vmem:[#allocation6 + $0x240] sm:$0xf]  ;;  %v6296_v16 = vor.u32 %v8041_v10, %v6295_v9  ;;  %3734 = vmatpush.bf16.msra.mxu0 %v5496_v15 }
  0x79   :  { %v7905_v12 = vld [vmem:[#allocation6 + $0x25c] sm:$0xf0] }
  0x7a   :  { %v5463_v14 = vld [vmem:[#allocation6] sm:$0xf]  ;;  %v5752_v20 = vor.u32 %v7905_v12, %v5751_v11  ;;  %3772 = vmatpush.bf16.msra.mxu3 %v6296_v16 }
  0x7b   :  { %v7833_v17 = vld [vmem:[#allocation6 + $0x1c] sm:$0xf0] }
  0x7c   :  { %v6007_v18 = vld [vmem:[#allocation6 + $0x440] sm:$0xf]  ;;  %v5464_v30 = vor.u32 %v7833_v17, %v5463_v14  ;;  %3747 = vmatpush.bf16.msra.mxu1 %v5752_v20 }
  0x7d   :  { %v7969_v19 = vld [vmem:[#allocation6 + $0x45c] sm:$0xf0] }
  0x7e   :  { %v5719_v21 = vld [vmem:[#allocation6 + $0x200] sm:$0xf]  ;;  %v6008_v29 = vor.u32 %v7969_v19, %v6007_v18  ;;  %3735 = vmatpush.bf16.msra.mxu0 %v5464_v30 }
  0x7f   :  { %v6263_v22 = vld [vmem:[#allocation6 + $0x640] sm:$0xf] }
  0x80   :  { %v8033_v23 = vld [vmem:[#allocation6 + $0x65c] sm:$0xf0]  ;;  %3760 = vmatpush.bf16.msra.mxu2 %v6008_v29 }
  0x81   :  { %v7897_v24 = vld [vmem:[#allocation6 + $0x21c] sm:$0xf0]  ;;  %v6264_v31 = vor.u32 %v8033_v23, %v6263_v22 }
  0x82   :  { %v6711_v25 = vld [vmem:[#allocation6 + $0x9c0] sm:$0xf]  ;;  %v5720_v36 = vor.u32 %v7897_v24, %v5719_v21 }
  0x83   :  { %v8145_v26 = vld [vmem:[#allocation6 + $0x9dc] sm:$0xf0]  ;;  %3773 = vmatpush.bf16.msra.mxu3 %v6264_v31 }
  0x84   :  { %v6967_v27 = vld [vmem:[#allocation6 + $0xbc0] sm:$0xf]  ;;  %v6712_v37 = vor.u32 %v8145_v26, %v6711_v25  ;;  %3748 = vmatpush.bf16.msra.mxu1 %v5720_v36 }
  0x85   :  { %v8209_v28 = vld [vmem:[#allocation6 + $0xbdc] sm:$0xf0] }
  0x86   :  { %v6679_v32 = vld [vmem:[#allocation6 + $0x980] sm:$0xf]  ;;  %v6968_v41 = vor.u32 %v8209_v28, %v6967_v27  ;;  %3780 = vmatpush.bf16.msrb.mxu0 %v6712_v37 }
  0x87   :  { %v5975_v33 = vld [vmem:[#allocation6 + $0x400] sm:$0xf] }
  0x88   :  { %v7961_v34 = vld [vmem:[#allocation6 + $0x41c] sm:$0xf0]  ;;  %3793 = vmatpush.bf16.msrb.mxu1 %v6968_v41 }
  0x89   :  { %v6231_v35 = vld [vmem:[#allocation6 + $0x600] sm:$0xf]  ;;  %v5976_v46 = vor.u32 %v7961_v34, %v5975_v33 }
  0x8a   :  { %v8025_v38 = vld [vmem:[#allocation6 + $0x61c] sm:$0xf0] }
  0x8b   :  { %v7223_v39 = vld [vmem:[#allocation6 + $0xdc0] sm:$0xf]  ;;  %v6232_v47 = vor.u32 %v8025_v38, %v6231_v35  ;;  %3761 = vmatpush.bf16.msra.mxu2 %v5976_v46 }
  0x8c   :  { %v8273_v40 = vld [vmem:[#allocation6 + $0xddc] sm:$0xf0] }
  0x8d   :  { %v8137_v42 = vld [vmem:[#allocation6 + $0x99c] sm:$0xf0]  ;;  %v7224_v49 = vor.u32 %v8273_v40, %v7223_v39  ;;  %3774 = vmatpush.bf16.msra.mxu3 %v6232_v47 }
  0x8e   :  { %v7479_v48 = vld [vmem:[#allocation6 + $0xfc0] sm:$0xf]  ;;  %v6680_v50 = vor.u32 %v8137_v42, %v6679_v32 }
  0x8f   :  { %v8337_v43 = vld [vmem:[#allocation6 + $0xfdc] sm:$0xf0]  ;;  %3806 = vmatpush.bf16.msrb.mxu2 %v7224_v49 }
  0x90   :  { %v6935_v44 = vld [vmem:[#allocation6 + $0xb80] sm:$0xf]  ;;  %v7480_v51 = vor.u32 %v8337_v43, %v7479_v48  ;;  %3781 = vmatpush.bf16.msrb.mxu0 %v6680_v50 }
  0x91   :  { %v8201_v45 = vld [vmem:[#allocation6 + $0xb9c] sm:$0xf0] }
  0x92   :  { %v6647_v52 = vld [vmem:[#allocation6 + $0x940] sm:$0xf]  ;;  %v6936_v55 = vor.u32 %v8201_v45, %v6935_v44  ;;  %3819 = vmatpush.bf16.msrb.mxu3 %v7480_v51 }
  0x93   :  { %v7191_v53 = vld [vmem:[#allocation6 + $0xd80] sm:$0xf] }
  0x94   :  { %v8265_v54 = vld [vmem:[#allocation6 + $0xd9c] sm:$0xf0]  ;;  %3794 = vmatpush.bf16.msrb.mxu1 %v6936_v55 }
  0x95   :  { %v8129_v56 = vld [vmem:[#allocation6 + $0x95c] sm:$0xf0]  ;;  %v7192_v61 = vor.u32 %v8265_v54, %v7191_v53 }
  0x96   :  { %v7447_v57 = vld [vmem:[#allocation6 + $0xf80] sm:$0xf]  ;;  %v6648_v62 = vor.u32 %v8129_v56, %v6647_v52 }
  0x97   :  { %v8329_v58 = vld [vmem:[#allocation6 + $0xf9c] sm:$0xf0]  ;;  %3807 = vmatpush.bf16.msrb.mxu2 %v7192_v61 }
  0x98   :  { %v6903_v59 = vld [vmem:[#allocation6 + $0xb40] sm:$0xf]  ;;  %v7448_v63 = vor.u32 %v8329_v58, %v7447_v57  ;;  %3782 = vmatpush.bf16.msrb.mxu0 %v6648_v62 }
  0x99   :  { %v8193_v60 = vld [vmem:[#allocation6 + $0xb5c] sm:$0xf0] }
  0x9a   :  { %v6615_v0 = vld [vmem:[#allocation6 + $0x900] sm:$0xf]  ;;  %v6904_v3 = vor.u32 %v8193_v60, %v6903_v59  ;;  %3820 = vmatpush.bf16.msrb.mxu3 %v7448_v63 }
  0x9b   :  { %v7159_v1 = vld [vmem:[#allocation6 + $0xd40] sm:$0xf] }
  0x9c   :  { %v8257_v2 = vld [vmem:[#allocation6 + $0xd5c] sm:$0xf0]  ;;  %3795 = vmatpush.bf16.msrb.mxu1 %v6904_v3  ;;  %v8651_v3 = vld [vmem:[#allocation4] sm:$0xff] }
  0x9d   :  { %v8121_v4 = vld [vmem:[#allocation6 + $0x91c] sm:$0xf0]  ;;  %v7160_v9 = vor.u32 %v8257_v2, %v7159_v1 }
  0x9e   :  { %v7415_v5 = vld [vmem:[#allocation6 + $0xf40] sm:$0xf]  ;;  %v6616_v10 = vor.u32 %v8121_v4, %v6615_v0  ;;  %v182_v4 = vperm.slane %v8651_v3, 0 }
  0x9f   :  { %v8321_v6 = vld [vmem:[#allocation6 + $0xf5c] sm:$0xf0]  ;;  %3808 = vmatpush.bf16.msrb.mxu2 %v7160_v9  ;;  %v7885_v9 = vld [vmem:[#allocation6 + $0x1c4] sm:$0xf] }
  0xa0   :  { %v6871_v7 = vld [vmem:[#allocation6 + $0xb00] sm:$0xf]  ;;  %v7416_v11 = vor.u32 %v8321_v6, %v7415_v5  ;;  %3783 = vmatpush.bf16.msrb.mxu0 %v6616_v10  ;;  %v183_v5 = vperm.slane %v8651_v3, 1  ;;  %v5689_v10 = vld [vmem:[#allocation6 + $0x1e0] sm:$0xf0] }
  0xa1   :  { %v8185_v8 = vld [vmem:[#allocation6 + $0xb1c] sm:$0xf0] }
  0xa2   :  { %v6583_v12 = vld [vmem:[#allocation6 + $0x8c0] sm:$0xf]  ;;  %v6872_v15 = vor.u32 %v8185_v8, %v6871_v7  ;;  %3821 = vmatpush.bf16.msrb.mxu3 %v7416_v11 }
  0xa3   :  { %v7127_v13 = vld [vmem:[#allocation6 + $0xd00] sm:$0xf] }
  0xa4   :  { %v8249_v14 = vld [vmem:[#allocation6 + $0xd1c] sm:$0xf0]  ;;  %3796 = vmatpush.bf16.msrb.mxu1 %v6872_v15 }
  0xa5   :  { %v8113_v16 = vld [vmem:[#allocation6 + $0x8dc] sm:$0xf0]  ;;  %v7128_v21 = vor.u32 %v8249_v14, %v7127_v13  ;;  %v5945_v13 = vld [vmem:[#allocation6 + $0x3e0] sm:$0xf0] }
  0xa6   :  { %v7383_v17 = vld [vmem:[#allocation6 + $0xf00] sm:$0xf]  ;;  %v6584_v22 = vor.u32 %v8113_v16, %v6583_v12  ;;  %v7949_v12 = vld [vmem:[#allocation6 + $0x3c4] sm:$0xf]  ;;  %v184_v16 = vperm.slane %v8651_v3, 2 }
  0xa7   :  { %v8313_v18 = vld [vmem:[#allocation6 + $0xf1c] sm:$0xf0]  ;;  %3809 = vmatpush.bf16.msrb.mxu2 %v7128_v21  ;;  %v7877_v21 = vld [vmem:[#allocation6 + $0x184] sm:$0xf] }
  0xa8   :  { %v6839_v19 = vld [vmem:[#allocation6 + $0xac0] sm:$0xf]  ;;  %v7384_v23 = vor.u32 %v8313_v18, %v7383_v17  ;;  %3784 = vmatpush.bf16.msrb.mxu0 %v6584_v22  ;;  %v5692_v17 = vor.u32 %v7885_v9, %v5689_v10  ;;  %v5657_v22 = vld [vmem:[#allocation6 + $0x1a0] sm:$0xf0] }
  0xa9   :  { %v8177_v20 = vld [vmem:[#allocation6 + $0xadc] sm:$0xf0] }
  0xaa   :  { %v6840_v24 = vor.u32 %v8177_v20, %v6839_v19  ;;  %v6551_v25 = vld [vmem:[#allocation6 + $0x880] sm:$0xf]  ;;  %3822 = vmatpush.bf16.msrb.mxu3 %v7384_v23  ;;  %v185_v19 = vperm.slane %v8651_v3, 3  ;;  %v5948_v20 = vor.u32 %v7949_v12, %v5945_v13  ;;  %v7989_v12 = vld [vmem:[#allocation6 + $0x504] sm:$0xf] }
  0xab   :  { %v8105_v26 = vld [vmem:[#allocation6 + $0x89c] sm:$0xf0]  ;;  %v6105_v13 = vld [vmem:[#allocation6 + $0x520] sm:$0xf0] }
  0xac   :  { %v6807_v27 = vld [vmem:[#allocation6 + $0xa80] sm:$0xf]  ;;  %v6552_v29 = vor.u32 %v8105_v26, %v6551_v25  ;;  %3797 = vmatpush.bf16.msrb.mxu1 %v6840_v24  ;;  %v7941_v24 = vld [vmem:[#allocation6 + $0x384] sm:$0xf] }
  0xad   :  { %v8169_v28 = vld [vmem:[#allocation6 + $0xa9c] sm:$0xf0]  ;;  %v5913_v25 = vld [vmem:[#allocation6 + $0x3a0] sm:$0xf0] }
  0xae   :  { %v6808_v30 = vor.u32 %v8169_v28, %v6807_v27  ;;  %3785 = vmatpush.bf16.msrb.mxu0 %v6552_v29  ;;  %v7095_v31 = vld [vmem:[#allocation6 + $0xcc0] sm:$0xf] }
  0xaf   :  { %v8241_v32 = vld [vmem:[#allocation6 + $0xcdc] sm:$0xf0] }
  0xb0   :  { %3798 = vmatpush.bf16.msrb.mxu1 %v6808_v30  ;;  %v7351_v33 = vld [vmem:[#allocation6 + $0xec0] sm:$0xf]  ;;  %v7096_v34 = vor.u32 %v8241_v32, %v7095_v31  ;;  %v5660_v30 = vor.u32 %v7877_v21, %v5657_v22  ;;  %v8013_v31 = vld [vmem:[#allocation6 + $0x5c4] sm:$0xf]  ;;  %v6108_v22 = vor.u32 %v7989_v12, %v6105_v13 }
  0xb1   :  { %v8305_v35 = vld [vmem:[#allocation6 + $0xedc] sm:$0xf0]  ;;  %v6201_v32 = vld [vmem:[#allocation6 + $0x5e0] sm:$0xf0] }
  0xb2   :  { %v7352_v36 = vor.u32 %v8305_v35, %v7351_v33  ;;  %v6519_v37 = vld [vmem:[#allocation6 + $0x840] sm:$0xf]  ;;  %3810 = vmatpush.bf16.msrb.mxu2 %v7096_v34  ;;  %v8077_v33 = vld [vmem:[#allocation6 + $0x7c4] sm:$0xf] }
  0xb3   :  { %v8097_v38 = vld [vmem:[#allocation6 + $0x85c] sm:$0xf0]  ;;  %v5785_v21 = vld [vmem:[#allocation6 + $0x2a0] sm:$0xf0] }
  0xb4   :  { %v6520_v39 = vor.u32 %v8097_v38, %v6519_v37  ;;  %v6775_v40 = vld [vmem:[#allocation6 + $0xa40] sm:$0xf]  ;;  %3823 = vmatpush.bf16.msrb.mxu3 %v7352_v36  ;;  %v5916_v36 = vor.u32 %v7941_v24, %v5913_v25  ;;  %v6457_v37 = vld [vmem:[#allocation6 + $0x7e0] sm:$0xf0] }
  0xb5   :  { %v8161_v41 = vld [vmem:[#allocation6 + $0xa5c] sm:$0xf0]  ;;  %v7869_v38 = vld [vmem:[#allocation6 + $0x144] sm:$0xf] }
  0xb6   :  { %v6776_v42 = vor.u32 %v8161_v41, %v6775_v40  ;;  %v7063_v48 = vld [vmem:[#allocation6 + $0xc80] sm:$0xf]  ;;  %3786 = vmatpush.bf16.msrb.mxu0 %v6520_v39  ;;  %v5625_v39 = vld [vmem:[#allocation6 + $0x160] sm:$0xf0] }
  0xb7   :  { %v8233_v43 = vld [vmem:[#allocation6 + $0xc9c] sm:$0xf0]  ;;  %v7933_v41 = vld [vmem:[#allocation6 + $0x344] sm:$0xf] }
  0xb8   :  { %v7319_v44 = vld [vmem:[#allocation6 + $0xe80] sm:$0xf]  ;;  %v7064_v45 = vor.u32 %v8233_v43, %v7063_v48  ;;  %3799 = vmatpush.bf16.msrb.mxu1 %v6776_v42  ;;  %v5881_v42 = vld [vmem:[#allocation6 + $0x360] sm:$0xf0]  ;;  %v6204_v43 = vor.u32 %v8013_v31, %v6201_v32 }
  0xb9   :  { %v8297_v46 = vld [vmem:[#allocation6 + $0xe9c] sm:$0xf0]  ;;  %v7837_v31 = vld [vmem:[#allocation6 + $0x44] sm:$0xf] }
  0xba   :  { %v7320_v47 = vor.u32 %v8297_v46, %v7319_v44  ;;  %v6487_v49 = vld [vmem:[#allocation6 + $0x800] sm:$0xf]  ;;  %3811 = vmatpush.bf16.msrb.mxu2 %v7064_v45  ;;  %v6460_v45 = vor.u32 %v8077_v33, %v6457_v37  ;;  %v5628_v46 = vor.u32 %v7869_v38, %v5625_v39  ;;  %v5497_v32 = vld [vmem:[#allocation6 + $0x60] sm:$0xf0]  ;;  %v186_v33 = vperm.slane %v8651_v3, 4 }
  0xbb   :  { %v8089_v50 = vld [vmem:[#allocation6 + $0x81c] sm:$0xf0]  ;;  %v527_v6 = vpop.f32.mrf.mxu0  ;;  %v540_v8 = vpop.f32.mrf.mxu1  ;;  %v5500_v39 = vor.u32 %v7837_v31, %v5497_v32  ;;  %v8133_v13 = vld [vmem:[#allocation6 + $0x984] sm:$0xf] }
  0xbc   :  { %v6743_v51 = vld [vmem:[#allocation6 + $0xa00] sm:$0xf]  ;;  %v6488_v52 = vor.u32 %v8089_v50, %v6487_v49  ;;  %3824 = vmatpush.bf16.msrb.mxu3 %v7320_v47  ;;  %v528_v7 = vadd.f32 %v527_v6, %v182_v4  ;;  %v541_v11 = vadd.f32 %v540_v8, %v183_v5  ;;  %v8005_v47 = vld [vmem:[#allocation6 + $0x584] sm:$0xf] }
  0xbd   :  { %v8153_v53 = vld [vmem:[#allocation6 + $0xa1c] sm:$0xf0]  ;;  %v6169_v49 = vld [vmem:[#allocation6 + $0x5a0] sm:$0xf0] }
  0xbe   :  { %v6744_v54 = vor.u32 %v8153_v53, %v6743_v51  ;;  %3787 = vmatpush.bf16.msrb.mxu0 %v6488_v52  ;;  %v7031_v55 = vld [vmem:[#allocation6 + $0xc40] sm:$0xf]  ;;  %v622_v14 = vmax.f32 %v528_v7, 0.0  ;;  %v623_v15 = vmax.f32 %v541_v11, 0.0  ;;  %v8069_v50 = vld [vmem:[#allocation6 + $0x784] sm:$0xf]  ;;  %v5884_v52 = vor.u32 %v7933_v41, %v5881_v42 }
  0xbf   :  { %v8225_v56 = vld [vmem:[#allocation6 + $0xc5c] sm:$0xf0]  ;;  %v6425_v53 = vld [vmem:[#allocation6 + $0x7a0] sm:$0xf0] }
  0xc0   :  { %3800 = vmatpush.bf16.msrb.mxu1 %v6744_v54  ;;  %v7032_v57 = vor.u32 %v8225_v56, %v7031_v55  ;;  %v7287_v58 = vld [vmem:[#allocation6 + $0xe40] sm:$0xf]  ;;  %v8656_v18 = vpack.c.bf16 %v622_v14, %v622_v14  ;;  %v8659_v23 = vpack.c.bf16 %v623_v15, %v623_v15  ;;  %v7861_v54 = vld [vmem:[#allocation6 + $0x104] sm:$0xf] }
  0xc1   :  { %v8289_v59 = vld [vmem:[#allocation6 + $0xe5c] sm:$0xf0]  ;;  %v5593_v55 = vld [vmem:[#allocation6 + $0x120] sm:$0xf0] }
  0xc2   :  { %v7288_v60 = vor.u32 %v8289_v59, %v7287_v58  ;;  %3812 = vmatpush.bf16.msrb.mxu2 %v7032_v57  ;;  %v6999_v61 = vld [vmem:[#allocation6 + $0xc00] sm:$0xf]  ;;  %3736 = vmatmul.bf16.vlgmr.msra.gmra.mxu0 %v8656_v18  ;;  %v7925_v56 = vld [vmem:[#allocation6 + $0x304] sm:$0xf]  ;;  %v6172_v59 = vor.u32 %v8005_v47, %v6169_v49 }
  0xc3   :  { %v8217_v62 = vld [vmem:[#allocation6 + $0xc1c] sm:$0xf0]  ;;  %v566_v28 = vpop.f32.mrf.mxu3  ;;  %3749 = vmatmul.bf16.vlgmr.msra.gmra.mxu1 %v8659_v23  ;;  %3832 = vmatpush.bf16.msra.mxu0 %v5692_v17  ;;  %v529_v29 = vpop.f32.mrf.mxu0  ;;  %v5849_v57 = vld [vmem:[#allocation6 + $0x320] sm:$0xf0] }
  0xc4   :  { %3825 = vmatpush.bf16.msrb.mxu3 %v7288_v60  ;;  %v7000_v63 = vor.u32 %v8217_v62, %v6999_v61  ;;  %v7255_v0 = vld [vmem:[#allocation6 + $0xe00] sm:$0xf]  ;;  %v553_v26 = vpop.f32.mrf.mxu2  ;;  %v567_v34 = vadd.f32 %v566_v28, %v185_v19  ;;  %3845 = vmatpush.bf16.msra.mxu1 %v5948_v20  ;;  %v542_v35 = vpop.f32.mrf.mxu1  ;;  %v6428_v61 = vor.u32 %v8069_v50, %v6425_v53  ;;  %v6393_v4 = vld [vmem:[#allocation6 + $0x760] sm:$0xf0] }
  0xc5   :  { %v8281_v1 = vld [vmem:[#allocation6 + $0xe1c] sm:$0xf0]  ;;  %v554_v27 = vadd.f32 %v553_v26, %v184_v16  ;;  %v5596_v62 = vor.u32 %v7861_v54, %v5593_v55  ;;  %v7853_v5 = vld [vmem:[#allocation6 + $0xc4] sm:$0xf] }
  0xc6   :  { %v7256_v2 = vor.u32 %v8281_v1, %v7255_v0  ;;  %3813 = vmatpush.bf16.msrb.mxu2 %v7000_v63  ;;  %v625_v48 = vmax.f32 %v567_v34, 0.0  ;;  %v7997_v63 = vld [vmem:[#allocation6 + $0x544] sm:$0xf] }
  0xc7   :  { %v624_v40 = vmax.f32 %v554_v27, 0.0  ;;  %3833 = vmatpush.bf16.msra.mxu0 %v5660_v30  ;;  %v6137_v0 = vld [vmem:[#allocation6 + $0x560] sm:$0xf0] }
  0xc8   :  { %3826 = vmatpush.bf16.msrb.mxu3 %v7256_v2  ;;  %v8665_v51 = vpack.c.bf16 %v625_v48, %v625_v48  ;;  %3846 = vmatpush.bf16.msra.mxu1 %v5916_v36  ;;  %v8061_v1 = vld [vmem:[#allocation6 + $0x744] sm:$0xf]  ;;  %v5852_v2 = vor.u32 %v7925_v56, %v5849_v57  ;;  %v6140_v9 = vor.u32 %v7997_v63, %v6137_v0  ;;  %v187_v36 = vperm.slane %v8651_v3, 5 }
  0xc9   :  { %v8663_v44 = vpack.c.bf16 %v624_v40, %v624_v40  ;;  %v5561_v6 = vld [vmem:[#allocation6 + $0xe0] sm:$0xf0]  ;;  %v6396_v10 = vor.u32 %v8061_v1, %v6393_v4 }
  0xca   :  { %3775 = vmatmul.bf16.vlgmr.msra.gmra.mxu3 %v8665_v51  ;;  %v7917_v7 = vld [vmem:[#allocation6 + $0x2c4] sm:$0xf]  ;;  %v5564_v11 = vor.u32 %v7853_v5, %v5561_v6 }
  0xcb   :  { %3762 = vmatmul.bf16.vlgmr.msra.gmra.mxu2 %v8663_v44  ;;  %v568_v60 = vpop.f32.mrf.mxu3  ;;  %3834 = vmatpush.bf16.msra.mxu0 %v5628_v46  ;;  %v5817_v8 = vld [vmem:[#allocation6 + $0x2e0] sm:$0xf0] }
  0xcc   :  { %3858 = vmatpush.bf16.msra.mxu2 %v6204_v43  ;;  %v555_v58 = vpop.f32.mrf.mxu2  ;;  %3871 = vmatpush.bf16.msra.mxu3 %v6460_v45  ;;  %v8053_v14 = vld [vmem:[#allocation6 + $0x704] sm:$0xf]  ;;  %v5820_v15 = vor.u32 %v7917_v7, %v5817_v8  ;;  %v189_v8 = vperm.slane %v8651_v3, 7 }
  0xcd   :  { %3847 = vmatpush.bf16.msra.mxu1 %v5884_v52  ;;  %v6361_v16 = vld [vmem:[#allocation6 + $0x720] sm:$0xf0] }
  0xce   :  { %v7845_v17 = vld [vmem:[#allocation6 + $0x84] sm:$0xf]  ;;  %v6364_v24 = vor.u32 %v8053_v14, %v6361_v16 }
  0xcf   :  { %3835 = vmatpush.bf16.msra.mxu0 %v5596_v62  ;;  %v5529_v19 = vld [vmem:[#allocation6 + $0xa0] sm:$0xf0] }
  0xd0   :  { %3859 = vmatpush.bf16.msra.mxu2 %v6172_v59  ;;  %3872 = vmatpush.bf16.msra.mxu3 %v6428_v61  ;;  %v7909_v20 = vld [vmem:[#allocation6 + $0x284] sm:$0xf]  ;;  %v5532_v25 = vor.u32 %v7845_v17, %v5529_v19 }
  0xd1   :  { %3848 = vmatpush.bf16.msra.mxu1 %v5852_v2  ;;  %v7981_v26 = vld [vmem:[#allocation6 + $0x4c4] sm:$0xf]  ;;  %v5788_v29 = vor.u32 %v7909_v20, %v5785_v21  ;;  %v188_v2 = vperm.slane %v8651_v3, 6 }
  0xd2   :  { %v6073_v27 = vld [vmem:[#allocation6 + $0x4e0] sm:$0xf0] }
  0xd3   :  { %3836 = vmatpush.bf16.msra.mxu0 %v5564_v11  ;;  %v8045_v28 = vld [vmem:[#allocation6 + $0x6c4] sm:$0xf]  ;;  %v6076_v37 = vor.u32 %v7981_v26, %v6073_v27 }
  0xd4   :  { %3860 = vmatpush.bf16.msra.mxu2 %v6140_v9  ;;  %3873 = vmatpush.bf16.msra.mxu3 %v6396_v10  ;;  %v6329_v30 = vld [vmem:[#allocation6 + $0x6e0] sm:$0xf0] }
  0xd5   :  { %3849 = vmatpush.bf16.msra.mxu1 %v5820_v15  ;;  %v7901_v34 = vld [vmem:[#allocation6 + $0x244] sm:$0xf]  ;;  %v6332_v38 = vor.u32 %v8045_v28, %v6329_v30 }
  0xd6   :  { %v5753_v35 = vld [vmem:[#allocation6 + $0x260] sm:$0xf0] }
  0xd7   :  { %3837 = vmatpush.bf16.msra.mxu0 %v5532_v25  ;;  %v7973_v40 = vld [vmem:[#allocation6 + $0x484] sm:$0xf]  ;;  %v5756_v43 = vor.u32 %v7901_v34, %v5753_v35 }
  0xd8   :  { %3861 = vmatpush.bf16.msra.mxu2 %v6108_v22  ;;  %3874 = vmatpush.bf16.msra.mxu3 %v6364_v24  ;;  %v6041_v41 = vld [vmem:[#allocation6 + $0x4a0] sm:$0xf0] }
  0xd9   :  { %v8037_v42 = vld [vmem:[#allocation6 + $0x684] sm:$0xf]  ;;  %3850 = vmatpush.bf16.msra.mxu1 %v5788_v29  ;;  %v6044_v56 = vor.u32 %v7973_v40, %v6041_v41 }
  0xda   :  { %v6297_v45 = vld [vmem:[#allocation6 + $0x6a0] sm:$0xf0] }
  0xdb   :  { %v579_v48 = vpop.f32.mrf.mxu0  ;;  %v7829_v46 = vld [vmem:[#allocation6 + $0x4] sm:$0xf]  ;;  %v592_v50 = vpop.f32.mrf.mxu1  ;;  %3838 = vmatpush.bf16.msra.mxu0 %v5500_v39  ;;  %v6300_v61 = vor.u32 %v8037_v42, %v6297_v45 }
  0xdc   :  { %v5465_v47 = vld [vmem:[#allocation6 + $0x20] sm:$0xf0]  ;;  %v580_v49 = vadd.f32 %v579_v48, %v186_v33  ;;  %v593_v55 = vadd.f32 %v592_v50, %v187_v36  ;;  %3862 = vmatpush.bf16.msra.mxu2 %v6076_v37  ;;  %3875 = vmatpush.bf16.msra.mxu3 %v6332_v38 }
  0xdd   :  { %v7893_v52 = vld [vmem:[#allocation6 + $0x204] sm:$0xf]  ;;  %v5468_v62 = vor.u32 %v7829_v46, %v5465_v47  ;;  %3851 = vmatpush.bf16.msra.mxu1 %v5756_v43 }
  0xde   :  { %v5721_v53 = vld [vmem:[#allocation6 + $0x220] sm:$0xf0]  ;;  %v626_v60 = vmax.f32 %v580_v49, 0.0  ;;  %v627_v1 = vmax.f32 %v593_v55, 0.0 }
  0xdf   :  { %v8141_v54 = vld [vmem:[#allocation6 + $0x9c4] sm:$0xf]  ;;  %v5724_v4 = vor.u32 %v7893_v52, %v5721_v53  ;;  %3839 = vmatpush.bf16.msra.mxu0 %v5468_v62 }
  0xe0   :  { %v6713_v57 = vld [vmem:[#allocation6 + $0x9e0] sm:$0xf0]  ;;  %v8672_v7 = vpack.c.bf16 %v626_v60, %v626_v60  ;;  %v8675_v10 = vpack.c.bf16 %v627_v1, %v627_v1  ;;  %3863 = vmatpush.bf16.msra.mxu2 %v6044_v56  ;;  %3876 = vmatpush.bf16.msra.mxu3 %v6300_v61 }
  0xe1   :  { %v8205_v58 = vld [vmem:[#allocation6 + $0xbc4] sm:$0xf]  ;;  %v6716_v9 = vor.u32 %v8141_v54, %v6713_v57  ;;  %3852 = vmatpush.bf16.msra.mxu1 %v5724_v4 }
  0xe2   :  { %v6969_v59 = vld [vmem:[#allocation6 + $0xbe0] sm:$0xf0]  ;;  %3788 = vmatmul.bf16.vlgmr.msrb.gmra.mxu0 %v8672_v7  ;;  %3801 = vmatmul.bf16.vlgmr.msrb.gmra.mxu1 %v8675_v10 }
  0xe3   :  { %v7965_v63 = vld [vmem:[#allocation6 + $0x444] sm:$0xf]  ;;  %v6972_v11 = vor.u32 %v8205_v58, %v6969_v59  ;;  %v605_v16 = vpop.f32.mrf.mxu2  ;;  %v618_v24 = vpop.f32.mrf.mxu3  ;;  %3884 = vmatpush.bf16.msrb.mxu0 %v6716_v9 }
  0xe4   :  { %v6009_v0 = vld [vmem:[#allocation6 + $0x460] sm:$0xf0]  ;;  %v606_v22 = vadd.f32 %v605_v16, %v188_v2  ;;  %v581_v3 = vpop.f32.mrf.mxu0  ;;  %v619_v28 = vadd.f32 %v618_v24, %v189_v8  ;;  %v594_v29 = vpop.f32.mrf.mxu1 }
  0xe5   :  { %v8029_v5 = vld [vmem:[#allocation6 + $0x644] sm:$0xf]  ;;  %v6012_v12 = vor.u32 %v7965_v63, %v6009_v0  ;;  %3897 = vmatpush.bf16.msrb.mxu1 %v6972_v11 }
  0xe6   :  { %v6265_v6 = vld [vmem:[#allocation6 + $0x660] sm:$0xf0]  ;;  %v628_v34 = vmax.f32 %v606_v22, 0.0  ;;  %v629_v39 = vmax.f32 %v619_v28, 0.0 }
  0xe7   :  { %v6681_v14 = vld [vmem:[#allocation6 + $0x9a0] sm:$0xf0]  ;;  %v6268_v17 = vor.u32 %v8029_v5, %v6265_v6  ;;  %3864 = vmatpush.bf16.msra.mxu2 %v6012_v12 }
  0xe8   :  { %v8197_v15 = vld [vmem:[#allocation6 + $0xb84] sm:$0xf]  ;;  %v6684_v30 = vor.u32 %v8133_v13, %v6681_v14  ;;  %v8679_v48 = vpack.c.bf16 %v628_v34, %v628_v34  ;;  %v8681_v45 = vpack.c.bf16 %v629_v39, %v629_v39 }
  0xe9   :  { %v6937_v19 = vld [vmem:[#allocation6 + $0xba0] sm:$0xf0]  ;;  %3877 = vmatpush.bf16.msra.mxu3 %v6268_v17 }
  0xea   :  { %v7957_v20 = vld [vmem:[#allocation6 + $0x404] sm:$0xf]  ;;  %v6940_v35 = vor.u32 %v8197_v15, %v6937_v19  ;;  %3885 = vmatpush.bf16.msrb.mxu0 %v6684_v30  ;;  %3814 = vmatmul.bf16.vlgmr.msrb.gmra.mxu2 %v8679_v48 }
  0xeb   :  { %v5977_v21 = vld [vmem:[#allocation6 + $0x420] sm:$0xf0]  ;;  %v607_v57 = vpop.f32.mrf.mxu2  ;;  %3827 = vmatmul.bf16.vlgmr.msrb.gmra.mxu3 %v8681_v45  ;;  %v620_v60 = vpop.f32.mrf.mxu3 }
  0xec   :  { %v8021_v25 = vld [vmem:[#allocation6 + $0x604] sm:$0xf]  ;;  %v5980_v36 = vor.u32 %v7957_v20, %v5977_v21  ;;  %3898 = vmatpush.bf16.msrb.mxu1 %v6940_v35  ;;  %v7954_v57 = vld [vmem:[#allocation6 + $0x3e4] sm:$0xf0] }
  0xed   :  { %v6233_v26 = vld [vmem:[#allocation6 + $0x620] sm:$0xf0] }
  0xee   :  { %v8269_v27 = vld [vmem:[#allocation6 + $0xdc4] sm:$0xf]  ;;  %v6236_v40 = vor.u32 %v8021_v25, %v6233_v26  ;;  %3865 = vmatpush.bf16.msra.mxu2 %v5980_v36 }
  0xef   :  { %v7225_v31 = vld [vmem:[#allocation6 + $0xde0] sm:$0xf0] }
  0xf0   :  { %v8333_v32 = vld [vmem:[#allocation6 + $0xfc4] sm:$0xf]  ;;  %v7228_v43 = vor.u32 %v8269_v27, %v7225_v31  ;;  %3878 = vmatpush.bf16.msra.mxu3 %v6236_v40 }
  0xf1   :  { %v7481_v33 = vld [vmem:[#allocation6 + $0xfe0] sm:$0xf0] }
  0xf2   :  { %v8125_v37 = vld [vmem:[#allocation6 + $0x944] sm:$0xf]  ;;  %v7484_v46 = vor.u32 %v8333_v32, %v7481_v33  ;;  %3910 = vmatpush.bf16.msrb.mxu2 %v7228_v43  ;;  %3840 = vmatmul.bf16.vlgmr.msra.gmra.mxu0 %v8656_v18 }
  0xf3   :  { %v6649_v38 = vld [vmem:[#allocation6 + $0x960] sm:$0xf0]  ;;  %3853 = vmatmul.bf16.vlgmr.msra.gmra.mxu1 %v8659_v23 }
  0xf4   :  { %v8189_v41 = vld [vmem:[#allocation6 + $0xb44] sm:$0xf]  ;;  %v6652_v47 = vor.u32 %v8125_v37, %v6649_v38  ;;  %3923 = vmatpush.bf16.msrb.mxu3 %v7484_v46 }
  0xf5   :  { %v6905_v42 = vld [vmem:[#allocation6 + $0xb60] sm:$0xf0] }
  0xf6   :  { %v8261_v49 = vld [vmem:[#allocation6 + $0xd84] sm:$0xf]  ;;  %v6908_v53 = vor.u32 %v8189_v41, %v6905_v42  ;;  %3886 = vmatpush.bf16.msrb.mxu0 %v6652_v47 }
  0xf7   :  { %v7193_v50 = vld [vmem:[#allocation6 + $0xda0] sm:$0xf0] }
  0xf8   :  { %v8325_v52 = vld [vmem:[#allocation6 + $0xf84] sm:$0xf]  ;;  %v7196_v61 = vor.u32 %v8261_v49, %v7193_v50  ;;  %3899 = vmatpush.bf16.msrb.mxu1 %v6908_v53  ;;  %v5695_v53 = vld [vmem:[#allocation6 + $0x1c8] sm:$0xf] }
  0xf9   :  { %v7449_v54 = vld [vmem:[#allocation6 + $0xfa0] sm:$0xf0] }
  0xfa   :  { %v8117_v55 = vld [vmem:[#allocation6 + $0x904] sm:$0xf]  ;;  %v7452_v62 = vor.u32 %v8325_v52, %v7449_v54  ;;  %3911 = vmatpush.bf16.msrb.mxu2 %v7196_v61 }
  0xfb   :  { %v6617_v56 = vld [vmem:[#allocation6 + $0x920] sm:$0xf0]  ;;  %3866 = vmatmul.bf16.vlgmr.msra.gmra.mxu2 %v8663_v44  ;;  %3879 = vmatmul.bf16.vlgmr.msra.gmra.mxu3 %v8665_v51 }
  0xfc   :  { %v8181_v58 = vld [vmem:[#allocation6 + $0xb04] sm:$0xf]  ;;  %v6620_v63 = vor.u32 %v8117_v55, %v6617_v56  ;;  %3924 = vmatpush.bf16.msrb.mxu3 %v7452_v62  ;;  %v7890_v55 = vld [vmem:[#allocation6 + $0x1e4] sm:$0xf0] }
  0xfd   :  { %v6873_v59 = vld [vmem:[#allocation6 + $0xb20] sm:$0xf0]  ;;  %v5951_v56 = vld [vmem:[#allocation6 + $0x3c8] sm:$0xf] }
  0xfe   :  { %v8253_v0 = vld [vmem:[#allocation6 + $0xd44] sm:$0xf]  ;;  %v6876_v2 = vor.u32 %v8181_v58, %v6873_v59  ;;  %3887 = vmatpush.bf16.msrb.mxu0 %v6620_v63 }
  0xff   :  { %v7161_v1 = vld [vmem:[#allocation6 + $0xd60] sm:$0xf0] }
 0x100   :  { %v8317_v4 = vld [vmem:[#allocation6 + $0xf44] sm:$0xf]  ;;  %v7164_v12 = vor.u32 %v8253_v0, %v7161_v1  ;;  %3900 = vmatpush.bf16.msrb.mxu1 %v6876_v2  ;;  %v5696_v1 = vor.u32 %v7890_v55, %v5695_v53  ;;  %v5952_v2 = vor.u32 %v7954_v57, %v5951_v56  ;;  %v5567_v53 = vld [vmem:[#allocation6 + $0xc8] sm:$0xf] }
 0x101   :  { %v7417_v5 = vld [vmem:[#allocation6 + $0xf60] sm:$0xf0]  ;;  %v5823_v55 = vld [vmem:[#allocation6 + $0x2c8] sm:$0xf] }
 0x102   :  { %v8109_v6 = vld [vmem:[#allocation6 + $0x8c4] sm:$0xf]  ;;  %v7420_v13 = vor.u32 %v8317_v4, %v7417_v5  ;;  %3912 = vmatpush.bf16.msrb.mxu2 %v7164_v12  ;;  %v5663_v4 = vld [vmem:[#allocation6 + $0x188] sm:$0xf] }
 0x103   :  { %v6585_v8 = vld [vmem:[#allocation6 + $0x8e0] sm:$0xf0]  ;;  %v7922_v56 = vld [vmem:[#allocation6 + $0x2e4] sm:$0xf0] }
 0x104   :  { %v8173_v9 = vld [vmem:[#allocation6 + $0xac4] sm:$0xf]  ;;  %v6588_v16 = vor.u32 %v8109_v6, %v6585_v8  ;;  %3925 = vmatpush.bf16.msrb.mxu3 %v7420_v13  ;;  %v7882_v6 = vld [vmem:[#allocation6 + $0x1a4] sm:$0xf0] }
 0x105   :  { %v6841_v11 = vld [vmem:[#allocation6 + $0xae0] sm:$0xf0]  ;;  %v5919_v8 = vld [vmem:[#allocation6 + $0x388] sm:$0xf] }
 0x106   :  { %v8245_v14 = vld [vmem:[#allocation6 + $0xd04] sm:$0xf]  ;;  %v6844_v17 = vor.u32 %v8173_v9, %v6841_v11  ;;  %3888 = vmatpush.bf16.msrb.mxu0 %v6588_v16  ;;  %v7946_v9 = vld [vmem:[#allocation6 + $0x3a4] sm:$0xf0] }
 0x107   :  { %v7129_v15 = vld [vmem:[#allocation6 + $0xd20] sm:$0xf0]  ;;  %v6207_v16 = vld [vmem:[#allocation6 + $0x5c8] sm:$0xf] }
 0x108   :  { %v8309_v19 = vld [vmem:[#allocation6 + $0xf04] sm:$0xf]  ;;  %v7132_v25 = vor.u32 %v8245_v14, %v7129_v15  ;;  %3901 = vmatpush.bf16.msrb.mxu1 %v6844_v17  ;;  %v8018_v17 = vld [vmem:[#allocation6 + $0x5e4] sm:$0xf0] }
 0x109   :  { %v7385_v20 = vld [vmem:[#allocation6 + $0xf20] sm:$0xf0] }
 0x10a   :  { %v8101_v21 = vld [vmem:[#allocation6 + $0x884] sm:$0xf]  ;;  %v7388_v26 = vor.u32 %v8309_v19, %v7385_v20  ;;  %3913 = vmatpush.bf16.msrb.mxu2 %v7132_v25  ;;  %v5664_v19 = vor.u32 %v7882_v6, %v5663_v4  ;;  %v5920_v20 = vor.u32 %v7946_v9, %v5919_v8  ;;  %v7874_v25 = vld [vmem:[#allocation6 + $0x164] sm:$0xf0] }
 0x10b   :  { %v6553_v22 = vld [vmem:[#allocation6 + $0x8a0] sm:$0xf0]  ;;  %v5791_v4 = vld [vmem:[#allocation6 + $0x288] sm:$0xf] }
 0x10c   :  { %v8165_v24 = vld [vmem:[#allocation6 + $0xa84] sm:$0xf]  ;;  %v6556_v29 = vor.u32 %v8101_v21, %v6553_v22  ;;  %3926 = vmatpush.bf16.msrb.mxu3 %v7388_v26  ;;  %v6463_v21 = vld [vmem:[#allocation6 + $0x7c8] sm:$0xf] }
 0x10d   :  { %v6809_v3 = vld [vmem:[#allocation6 + $0xaa0] sm:$0xf0]  ;;  %v8082_v22 = vld [vmem:[#allocation6 + $0x7e4] sm:$0xf0] }
 0x10e   :  { %v8237_v27 = vld [vmem:[#allocation6 + $0xcc4] sm:$0xf]  ;;  %v6812_v30 = vor.u32 %v8165_v24, %v6809_v3  ;;  %3889 = vmatpush.bf16.msrb.mxu0 %v6556_v29  ;;  %v5631_v24 = vld [vmem:[#allocation6 + $0x148] sm:$0xf]  ;;  %v6208_v29 = vor.u32 %v8018_v17, %v6207_v16 }
 0x10f   :  { %v7097_v28 = vld [vmem:[#allocation6 + $0xce0] sm:$0xf0]  ;;  %v5887_v26 = vld [vmem:[#allocation6 + $0x348] sm:$0xf] }
 0x110   :  { %v8301_v31 = vld [vmem:[#allocation6 + $0xec4] sm:$0xf]  ;;  %v7100_v37 = vor.u32 %v8237_v27, %v7097_v28  ;;  %3902 = vmatpush.bf16.msrb.mxu1 %v6812_v30  ;;  %v7938_v27 = vld [vmem:[#allocation6 + $0x364] sm:$0xf0]  ;;  %v6464_v30 = vor.u32 %v8082_v22, %v6463_v21 }
 0x111   :  { %v7353_v32 = vld [vmem:[#allocation6 + $0xee0] sm:$0xf0]  ;;  %v6079_v9 = vld [vmem:[#allocation6 + $0x4c8] sm:$0xf] }
 0x112   :  { %v8093_v33 = vld [vmem:[#allocation6 + $0x844] sm:$0xf]  ;;  %v7356_v38 = vor.u32 %v8301_v31, %v7353_v32  ;;  %3914 = vmatpush.bf16.msrb.mxu2 %v7100_v37  ;;  %v6175_v31 = vld [vmem:[#allocation6 + $0x588] sm:$0xf] }
 0x113   :  { %v6521_v34 = vld [vmem:[#allocation6 + $0x860] sm:$0xf0]  ;;  %v8010_v32 = vld [vmem:[#allocation6 + $0x5a4] sm:$0xf0] }
 0x114   :  { %v8157_v35 = vld [vmem:[#allocation6 + $0xa44] sm:$0xf]  ;;  %v6524_v42 = vor.u32 %v8093_v33, %v6521_v34  ;;  %3927 = vmatpush.bf16.msrb.mxu3 %v7356_v38  ;;  %v5632_v33 = vor.u32 %v7874_v25, %v5631_v24  ;;  %v5888_v34 = vor.u32 %v7938_v27, %v5887_v26  ;;  %v5599_v37 = vld [vmem:[#allocation6 + $0x108] sm:$0xf] }
 0x115   :  { %v6777_v36 = vld [vmem:[#allocation6 + $0xa60] sm:$0xf0]  ;;  %v7866_v38 = vld [vmem:[#allocation6 + $0x124] sm:$0xf0] }
 0x116   :  { %v8229_v39 = vld [vmem:[#allocation6 + $0xc84] sm:$0xf]  ;;  %v6780_v43 = vor.u32 %v8157_v35, %v6777_v36  ;;  %3890 = vmatpush.bf16.msrb.mxu0 %v6524_v42  ;;  %v6431_v35 = vld [vmem:[#allocation6 + $0x788] sm:$0xf] }
 0x117   :  { %v7065_v40 = vld [vmem:[#allocation6 + $0xca0] sm:$0xf0]  ;;  %v8074_v36 = vld [vmem:[#allocation6 + $0x7a4] sm:$0xf0] }
 0x118   :  { %v8293_v41 = vld [vmem:[#allocation6 + $0xe84] sm:$0xf]  ;;  %v7068_v54 = vor.u32 %v8229_v39, %v7065_v40  ;;  %3903 = vmatpush.bf16.msrb.mxu1 %v6780_v43  ;;  %v5855_v39 = vld [vmem:[#allocation6 + $0x308] sm:$0xf]  ;;  %v6432_v42 = vor.u32 %v8074_v36, %v6431_v35 }
 0x119   :  { %v7321_v46 = vld [vmem:[#allocation6 + $0xea0] sm:$0xf0]  ;;  %v7930_v40 = vld [vmem:[#allocation6 + $0x324] sm:$0xf0] }
 0x11a   :  { %v8085_v47 = vld [vmem:[#allocation6 + $0x804] sm:$0xf]  ;;  %v7324_v58 = vor.u32 %v8293_v41, %v7321_v46  ;;  %3915 = vmatpush.bf16.msrb.mxu2 %v7068_v54  ;;  %v6176_v41 = vor.u32 %v8010_v32, %v6175_v31  ;;  %v6143_v43 = vld [vmem:[#allocation6 + $0x548] sm:$0xf] }
 0x11b   :  { %v6489_v49 = vld [vmem:[#allocation6 + $0x820] sm:$0xf0]  ;;  %v8002_v46 = vld [vmem:[#allocation6 + $0x564] sm:$0xf0] }
 0x11c   :  { %v8149_v50 = vld [vmem:[#allocation6 + $0xa04] sm:$0xf]  ;;  %v6492_v61 = vor.u32 %v8085_v47, %v6489_v49  ;;  %3928 = vmatpush.bf16.msrb.mxu3 %v7324_v58  ;;  %v5600_v47 = vor.u32 %v7866_v38, %v5599_v37  ;;  %v5856_v49 = vor.u32 %v7930_v40, %v5855_v39  ;;  %v7858_v54 = vld [vmem:[#allocation6 + $0xe4] sm:$0xf0]  ;;  %v6144_v57 = vor.u32 %v8002_v46, %v6143_v43 }
 0x11d   :  { %v6745_v52 = vld [vmem:[#allocation6 + $0xa20] sm:$0xf0]  ;;  %v5503_v16 = vld [vmem:[#allocation6 + $0x48] sm:$0xf] }
 0x11e   :  { %v8221_v59 = vld [vmem:[#allocation6 + $0xc44] sm:$0xf]  ;;  %v6748_v62 = vor.u32 %v8149_v50, %v6745_v52  ;;  %3891 = vmatpush.bf16.msrb.mxu0 %v6492_v61  ;;  %v6399_v50 = vld [vmem:[#allocation6 + $0x748] sm:$0xf]  ;;  %v5568_v61 = vor.u32 %v7858_v54, %v5567_v53 }
 0x11f   :  { %v7033_v60 = vld [vmem:[#allocation6 + $0xc60] sm:$0xf0]  ;;  %v8066_v52 = vld [vmem:[#allocation6 + $0x764] sm:$0xf0] }
 0x120   :  { %v8285_v63 = vld [vmem:[#allocation6 + $0xe44] sm:$0xf]  ;;  %v7036_v5 = vor.u32 %v8221_v59, %v7033_v60  ;;  %3904 = vmatpush.bf16.msrb.mxu1 %v6748_v62  ;;  %v6400_v58 = vor.u32 %v8066_v52, %v6399_v50  ;;  %v6111_v59 = vld [vmem:[#allocation6 + $0x508] sm:$0xf]  ;;  %v5824_v62 = vor.u32 %v7922_v56, %v5823_v55 }
 0x121   :  { %v7289_v0 = vld [vmem:[#allocation6 + $0xe60] sm:$0xf0]  ;;  %3892 = vmatmul.bf16.vlgmr.msrb.gmra.mxu0 %v8672_v7  ;;  %v7994_v60 = vld [vmem:[#allocation6 + $0x524] sm:$0xf0] }
 0x122   :  { %v7292_v11 = vor.u32 %v8285_v63, %v7289_v0  ;;  %v8213_v12 = vld [vmem:[#allocation6 + $0xc04] sm:$0xf]  ;;  %3936 = vmatpush.bf16.msra.mxu0 %v5696_v1  ;;  %3916 = vmatpush.bf16.msrb.mxu2 %v7036_v5  ;;  %v6367_v63 = vld [vmem:[#allocation6 + $0x708] sm:$0xf]  ;;  %v6112_v6 = vor.u32 %v7994_v60, %v6111_v59 }
 0x123   :  { %v7001_v13 = vld [vmem:[#allocation6 + $0xc20] sm:$0xf0]  ;;  %3905 = vmatmul.bf16.vlgmr.msrb.gmra.mxu1 %v8675_v10  ;;  %v8058_v0 = vld [vmem:[#allocation6 + $0x724] sm:$0xf0] }
 0x124   :  { %v8277_v14 = vld [vmem:[#allocation6 + $0xe04] sm:$0xf]  ;;  %3949 = vmatpush.bf16.msra.mxu1 %v5952_v2  ;;  %v7004_v3 = vor.u32 %v8213_v12, %v7001_v13  ;;  %3929 = vmatpush.bf16.msrb.mxu3 %v7292_v11  ;;  %v5535_v1 = vld [vmem:[#allocation6 + $0x88] sm:$0xf]  ;;  %v6368_v8 = vor.u32 %v8058_v0, %v6367_v63 }
 0x125   :  { %v7257_v15 = vld [vmem:[#allocation6 + $0xe20] sm:$0xf0]  ;;  %v7850_v2 = vld [vmem:[#allocation6 + $0xa4] sm:$0xf0] }
 0x126   :  { %v7260_v28 = vor.u32 %v8277_v14, %v7257_v15  ;;  %3937 = vmatpush.bf16.msra.mxu0 %v5664_v19  ;;  %3917 = vmatpush.bf16.msrb.mxu2 %v7004_v3  ;;  %v7914_v5 = vld [vmem:[#allocation6 + $0x2a4] sm:$0xf0]  ;;  %v5536_v12 = vor.u32 %v7850_v2, %v5535_v1 }
 0x127   :  { %v7986_v11 = vld [vmem:[#allocation6 + $0x4e4] sm:$0xf0]  ;;  %v5792_v13 = vor.u32 %v7914_v5, %v5791_v4 }
 0x128   :  { %3950 = vmatpush.bf16.msra.mxu1 %v5920_v20  ;;  %3930 = vmatpush.bf16.msrb.mxu3 %v7260_v28  ;;  %v6335_v14 = vld [vmem:[#allocation6 + $0x6c8] sm:$0xf]  ;;  %v6080_v21 = vor.u32 %v7986_v11, %v6079_v9 }
 0x129   :  { %3918 = vmatmul.bf16.vlgmr.msrb.gmra.mxu2 %v8679_v48  ;;  %v8050_v15 = vld [vmem:[#allocation6 + $0x6e4] sm:$0xf0] }
 0x12a   :  { %3962 = vmatpush.bf16.msra.mxu2 %v6208_v29  ;;  %3938 = vmatpush.bf16.msra.mxu0 %v5632_v33  ;;  %v7842_v17 = vld [vmem:[#allocation6 + $0x64] sm:$0xf0]  ;;  %v6336_v22 = vor.u32 %v8050_v15, %v6335_v14 }
 0x12b   :  { %3931 = vmatmul.bf16.vlgmr.msrb.gmra.mxu3 %v8681_v45  ;;  %v5759_v19 = vld [vmem:[#allocation6 + $0x248] sm:$0xf]  ;;  %v5504_v26 = vor.u32 %v7842_v17, %v5503_v16 }
 0x12c   :  { %3975 = vmatpush.bf16.msra.mxu3 %v6464_v30  ;;  %3951 = vmatpush.bf16.msra.mxu1 %v5888_v34  ;;  %v7906_v20 = vld [vmem:[#allocation6 + $0x264] sm:$0xf0] }
 0x12d   :  { %v6047_v24 = vld [vmem:[#allocation6 + $0x488] sm:$0xf]  ;;  %v5760_v27 = vor.u32 %v7906_v20, %v5759_v19 }
 0x12e   :  { %3963 = vmatpush.bf16.msra.mxu2 %v6176_v41  ;;  %3939 = vmatpush.bf16.msra.mxu0 %v5600_v47  ;;  %v7978_v3 = vld [vmem:[#allocation6 + $0x4a4] sm:$0xf0] }
 0x12f   :  { %v6303_v25 = vld [vmem:[#allocation6 + $0x688] sm:$0xf]  ;;  %v6048_v34 = vor.u32 %v7978_v3, %v6047_v24 }
 0x130   :  { %3976 = vmatpush.bf16.msra.mxu3 %v6432_v42  ;;  %3952 = vmatpush.bf16.msra.mxu1 %v5856_v49  ;;  %v8042_v28 = vld [vmem:[#allocation6 + $0x6a4] sm:$0xf0] }
 0x131   :  { %v5471_v29 = vld [vmem:[#allocation6 + $0x8] sm:$0xf]  ;;  %v6304_v38 = vor.u32 %v8042_v28, %v6303_v25 }
 0x132   :  { %3964 = vmatpush.bf16.msra.mxu2 %v6144_v57  ;;  %3940 = vmatpush.bf16.msra.mxu0 %v5568_v61  ;;  %v7834_v30 = vld [vmem:[#allocation6 + $0x24] sm:$0xf0] }
 0x133   :  { %v5727_v31 = vld [vmem:[#allocation6 + $0x208] sm:$0xf]  ;;  %v5472_v41 = vor.u32 %v7834_v30, %v5471_v29 }
 0x134   :  { %3977 = vmatpush.bf16.msra.mxu3 %v6400_v58  ;;  %3953 = vmatpush.bf16.msra.mxu1 %v5824_v62  ;;  %v7898_v32 = vld [vmem:[#allocation6 + $0x224] sm:$0xf0] }
 0x135   :  { %v6719_v33 = vld [vmem:[#allocation6 + $0x9c8] sm:$0xf]  ;;  %v5728_v42 = vor.u32 %v7898_v32, %v5727_v31 }
 0x136   :  { %3965 = vmatpush.bf16.msra.mxu2 %v6112_v6  ;;  %3941 = vmatpush.bf16.msra.mxu0 %v5536_v12  ;;  %v8146_v35 = vld [vmem:[#allocation6 + $0x9e4] sm:$0xf0] }
 0x137   :  { %v6975_v36 = vld [vmem:[#allocation6 + $0xbc8] sm:$0xf]  ;;  %v6720_v47 = vor.u32 %v8146_v35, %v6719_v33 }
 0x138   :  { %3978 = vmatpush.bf16.msra.mxu3 %v6368_v8  ;;  %3954 = vmatpush.bf16.msra.mxu1 %v5792_v13  ;;  %v8210_v37 = vld [vmem:[#allocation6 + $0xbe4] sm:$0xf0] }
 0x139   :  { %v6015_v39 = vld [vmem:[#allocation6 + $0x448] sm:$0xf]  ;;  %v6976_v49 = vor.u32 %v8210_v37, %v6975_v36 }
 0x13a   :  { %3966 = vmatpush.bf16.msra.mxu2 %v6080_v21  ;;  %v7970_v40 = vld [vmem:[#allocation6 + $0x464] sm:$0xf0]  ;;  %3942 = vmatpush.bf16.msra.mxu0 %v5504_v26 }
 0x13b   :  { %v6271_v43 = vld [vmem:[#allocation6 + $0x648] sm:$0xf]  ;;  %v6016_v52 = vor.u32 %v7970_v40, %v6015_v39 }
 0x13c   :  { %3979 = vmatpush.bf16.msra.mxu3 %v6336_v22  ;;  %3955 = vmatpush.bf16.msra.mxu1 %v5760_v27  ;;  %v8034_v46 = vld [vmem:[#allocation6 + $0x664] sm:$0xf0] }
 0x13d   :  { %v6687_v50 = vld [vmem:[#allocation6 + $0x988] sm:$0xf]  ;;  %v6272_v56 = vor.u32 %v8034_v46, %v6271_v43 }
 0x13e   :  { %3967 = vmatpush.bf16.msra.mxu2 %v6048_v34  ;;  %v8138_v53 = vld [vmem:[#allocation6 + $0x9a4] sm:$0xf0]  ;;  %3943 = vmatpush.bf16.msra.mxu0 %v5472_v41 }
 0x13f   :  { %v6943_v54 = vld [vmem:[#allocation6 + $0xb88] sm:$0xf]  ;;  %v6688_v63 = vor.u32 %v8138_v53, %v6687_v50 }
 0x140   :  { %v8202_v55 = vld [vmem:[#allocation6 + $0xba4] sm:$0xf0]  ;;  %3980 = vmatpush.bf16.msra.mxu3 %v6304_v38  ;;  %3956 = vmatpush.bf16.msra.mxu1 %v5728_v42 }
 0x141   :  { %v5983_v57 = vld [vmem:[#allocation6 + $0x408] sm:$0xf]  ;;  %v6944_v0 = vor.u32 %v8202_v55, %v6943_v54  ;;  %3944 = vmatmul.bf16.vlgmr.msra.gmra.mxu0 %v8656_v18 }
 0x142   :  { %v7962_v58 = vld [vmem:[#allocation6 + $0x424] sm:$0xf0]  ;;  %3988 = vmatpush.bf16.msrb.mxu0 %v6720_v47  ;;  %3968 = vmatpush.bf16.msra.mxu2 %v6016_v52 }
 0x143   :  { %v6239_v59 = vld [vmem:[#allocation6 + $0x608] sm:$0xf]  ;;  %v5984_v4 = vor.u32 %v7962_v58, %v5983_v57  ;;  %3957 = vmatmul.bf16.vlgmr.msra.gmra.mxu1 %v8659_v23 }
 0x144   :  { %v8026_v60 = vld [vmem:[#allocation6 + $0x624] sm:$0xf0]  ;;  %4001 = vmatpush.bf16.msrb.mxu1 %v6976_v49  ;;  %3981 = vmatpush.bf16.msra.mxu3 %v6272_v56 }
 0x145   :  { %v7231_v61 = vld [vmem:[#allocation6 + $0xdc8] sm:$0xf]  ;;  %v6240_v8 = vor.u32 %v8026_v60, %v6239_v59 }
 0x146   :  { %v8274_v62 = vld [vmem:[#allocation6 + $0xde4] sm:$0xf0]  ;;  %3989 = vmatpush.bf16.msrb.mxu0 %v6688_v63  ;;  %3969 = vmatpush.bf16.msra.mxu2 %v5984_v4 }
 0x147   :  { %v7487_v1 = vld [vmem:[#allocation6 + $0xfc8] sm:$0xf]  ;;  %v7232_v9 = vor.u32 %v8274_v62, %v7231_v61 }
 0x148   :  { %v8338_v2 = vld [vmem:[#allocation6 + $0xfe4] sm:$0xf0]  ;;  %4002 = vmatpush.bf16.msrb.mxu1 %v6944_v0  ;;  %3982 = vmatpush.bf16.msra.mxu3 %v6240_v8 }
 0x149   :  { %v6655_v5 = vld [vmem:[#allocation6 + $0x948] sm:$0xf]  ;;  %v7488_v13 = vor.u32 %v8338_v2, %v7487_v1  ;;  %3970 = vmatmul.bf16.vlgmr.msra.gmra.mxu2 %v8663_v44 }
 0x14a   :  { %v8130_v6 = vld [vmem:[#allocation6 + $0x964] sm:$0xf0]  ;;  %4014 = vmatpush.bf16.msrb.mxu2 %v7232_v9 }
 0x14b   :  { %v6911_v11 = vld [vmem:[#allocation6 + $0xb48] sm:$0xf]  ;;  %v6656_v16 = vor.u32 %v8130_v6, %v6655_v5  ;;  %3983 = vmatmul.bf16.vlgmr.msra.gmra.mxu3 %v8665_v51 }
 0x14c   :  { %v8194_v12 = vld [vmem:[#allocation6 + $0xb64] sm:$0xf0]  ;;  %4027 = vmatpush.bf16.msrb.mxu3 %v7488_v13 }
 0x14d   :  { %v7199_v14 = vld [vmem:[#allocation6 + $0xd88] sm:$0xf]  ;;  %v6912_v20 = vor.u32 %v8194_v12, %v6911_v11  ;;  %3990 = vmatpush.bf16.msrb.mxu0 %v6656_v16 }
 0x14e   :  { %v8266_v15 = vld [vmem:[#allocation6 + $0xda4] sm:$0xf0] }
 0x14f   :  { %v7455_v17 = vld [vmem:[#allocation6 + $0xf88] sm:$0xf]  ;;  %v7200_v24 = vor.u32 %v8266_v15, %v7199_v14  ;;  %4003 = vmatpush.bf16.msrb.mxu1 %v6912_v20  ;;  %v7950_v20 = vld [vmem:[#allocation6 + $0x3cc] sm:$0xf] }
 0x150   :  { %v8330_v19 = vld [vmem:[#allocation6 + $0xfa4] sm:$0xf0] }
 0x151   :  { %v6623_v21 = vld [vmem:[#allocation6 + $0x908] sm:$0xf]  ;;  %v7456_v26 = vor.u32 %v8330_v19, %v7455_v17  ;;  %4015 = vmatpush.bf16.msrb.mxu2 %v7200_v24  ;;  %v7886_v17 = vld [vmem:[#allocation6 + $0x1cc] sm:$0xf] }
 0x152   :  { %v8122_v22 = vld [vmem:[#allocation6 + $0x924] sm:$0xf0]  ;;  %v5697_v19 = vld [vmem:[#allocation6 + $0x1e8] sm:$0xf0] }
 0x153   :  { %v6879_v3 = vld [vmem:[#allocation6 + $0xb08] sm:$0xf]  ;;  %v6624_v29 = vor.u32 %v8122_v22, %v6623_v21  ;;  %4028 = vmatpush.bf16.msrb.mxu3 %v7456_v26  ;;  %v5953_v22 = vld [vmem:[#allocation6 + $0x3e8] sm:$0xf0] }
 0x154   :  { %v8186_v25 = vld [vmem:[#allocation6 + $0xb24] sm:$0xf0] }
 0x155   :  { %v7167_v27 = vld [vmem:[#allocation6 + $0xd48] sm:$0xf]  ;;  %v6880_v32 = vor.u32 %v8186_v25, %v6879_v3  ;;  %3991 = vmatpush.bf16.msrb.mxu0 %v6624_v29  ;;  %v5700_v29 = vor.u32 %v7886_v17, %v5697_v19  ;;  %v8062_v19 = vld [vmem:[#allocation6 + $0x74c] sm:$0xf] }
 0x156   :  { %v8258_v28 = vld [vmem:[#allocation6 + $0xd64] sm:$0xf0] }
 0x157   :  { %v7423_v30 = vld [vmem:[#allocation6 + $0xf48] sm:$0xf]  ;;  %v7168_v35 = vor.u32 %v8258_v28, %v7167_v27  ;;  %4004 = vmatpush.bf16.msrb.mxu1 %v6880_v32 }
 0x158   :  { %v8322_v31 = vld [vmem:[#allocation6 + $0xf64] sm:$0xf0] }
 0x159   :  { %v6591_v33 = vld [vmem:[#allocation6 + $0x8c8] sm:$0xf]  ;;  %v7424_v38 = vor.u32 %v8322_v31, %v7423_v30  ;;  %4016 = vmatpush.bf16.msrb.mxu2 %v7168_v35  ;;  %v7878_v30 = vld [vmem:[#allocation6 + $0x18c] sm:$0xf]  ;;  %v5956_v31 = vor.u32 %v7950_v20, %v5953_v22 }
 0x15a   :  { %v8114_v34 = vld [vmem:[#allocation6 + $0x8e4] sm:$0xf0]  ;;  %v5921_v35 = vld [vmem:[#allocation6 + $0x3a8] sm:$0xf0] }
 0x15b   :  { %v6847_v36 = vld [vmem:[#allocation6 + $0xac8] sm:$0xf]  ;;  %v6592_v41 = vor.u32 %v8114_v34, %v6591_v33  ;;  %4029 = vmatpush.bf16.msrb.mxu3 %v7424_v38  ;;  %v5665_v33 = vld [vmem:[#allocation6 + $0x1a8] sm:$0xf0] }
 0x15c   :  { %v8178_v37 = vld [vmem:[#allocation6 + $0xae4] sm:$0xf0]  ;;  %v7942_v34 = vld [vmem:[#allocation6 + $0x38c] sm:$0xf] }
 0x15d   :  { %v7135_v39 = vld [vmem:[#allocation6 + $0xd08] sm:$0xf]  ;;  %v6848_v46 = vor.u32 %v8178_v37, %v6847_v36  ;;  %3992 = vmatpush.bf16.msrb.mxu0 %v6592_v41  ;;  %v8014_v41 = vld [vmem:[#allocation6 + $0x5cc] sm:$0xf] }
 0x15e   :  { %v8250_v40 = vld [vmem:[#allocation6 + $0xd24] sm:$0xf0]  ;;  %v6401_v20 = vld [vmem:[#allocation6 + $0x768] sm:$0xf0] }
 0x15f   :  { %v7391_v42 = vld [vmem:[#allocation6 + $0xf08] sm:$0xf]  ;;  %v7136_v50 = vor.u32 %v8250_v40, %v7135_v39  ;;  %4005 = vmatpush.bf16.msrb.mxu1 %v6848_v46  ;;  %v8078_v46 = vld [vmem:[#allocation6 + $0x7cc] sm:$0xf] }
 0x160   :  { %v8314_v43 = vld [vmem:[#allocation6 + $0xf24] sm:$0xf0] }
 0x161   :  { %v6559_v47 = vld [vmem:[#allocation6 + $0x888] sm:$0xf]  ;;  %v7392_v54 = vor.u32 %v8314_v43, %v7391_v42  ;;  %4017 = vmatpush.bf16.msrb.mxu2 %v7136_v50  ;;  %v6209_v42 = vld [vmem:[#allocation6 + $0x5e8] sm:$0xf0]  ;;  %v5668_v43 = vor.u32 %v7878_v30, %v5665_v33  ;;  %v5924_v50 = vor.u32 %v7942_v34, %v5921_v35 }
 0x162   :  { %v8106_v49 = vld [vmem:[#allocation6 + $0x8a4] sm:$0xf0]  ;;  %v6113_v30 = vld [vmem:[#allocation6 + $0x528] sm:$0xf0] }
 0x163   :  { %v6815_v52 = vld [vmem:[#allocation6 + $0xa88] sm:$0xf]  ;;  %v6560_v57 = vor.u32 %v8106_v49, %v6559_v47  ;;  %4030 = vmatpush.bf16.msrb.mxu3 %v7392_v54  ;;  %v6465_v47 = vld [vmem:[#allocation6 + $0x7e8] sm:$0xf0]  ;;  %v8697_v49 = vld [vmem:[#allocation7] sm:$0xff] }
 0x164   :  { %v8170_v53 = vld [vmem:[#allocation6 + $0xaa4] sm:$0xf0]  ;;  %v5633_v54 = vld [vmem:[#allocation6 + $0x168] sm:$0xf0] }
 0x165   :  { %v7103_v55 = vld [vmem:[#allocation6 + $0xcc8] sm:$0xf]  ;;  %v6816_v60 = vor.u32 %v8170_v53, %v6815_v52  ;;  %3993 = vmatpush.bf16.msrb.mxu0 %v6560_v57  ;;  %v7870_v53 = vld [vmem:[#allocation6 + $0x14c] sm:$0xf] }
 0x166   :  { %v8242_v56 = vld [vmem:[#allocation6 + $0xce4] sm:$0xf0]  ;;  %v7934_v57 = vld [vmem:[#allocation6 + $0x34c] sm:$0xf] }
 0x167   :  { %v7359_v58 = vld [vmem:[#allocation6 + $0xec8] sm:$0xf]  ;;  %v7104_v63 = vor.u32 %v8242_v56, %v7103_v55  ;;  %4006 = vmatpush.bf16.msrb.mxu1 %v6816_v60  ;;  %v6212_v56 = vor.u32 %v8014_v41, %v6209_v42  ;;  %v1152_v60 = vperm.slane %v8697_v49, 0  ;;  %v6369_v33 = vld [vmem:[#allocation6 + $0x728] sm:$0xf0] }
 0x168   :  { %v8306_v59 = vld [vmem:[#allocation6 + $0xee4] sm:$0xf0]  ;;  %v7846_v35 = vld [vmem:[#allocation6 + $0x8c] sm:$0xf] }
 0x169   :  { %v6527_v61 = vld [vmem:[#allocation6 + $0x848] sm:$0xf]  ;;  %v7360_v2 = vor.u32 %v8306_v59, %v7359_v58  ;;  %4018 = vmatpush.bf16.msrb.mxu2 %v7104_v63  ;;  %v5889_v58 = vld [vmem:[#allocation6 + $0x368] sm:$0xf0]  ;;  %v6468_v59 = vor.u32 %v8078_v46, %v6465_v47  ;;  %v5636_v63 = vor.u32 %v7870_v53, %v5633_v54 }
 0x16a   :  { %v8098_v62 = vld [vmem:[#allocation6 + $0x864] sm:$0xf0]  ;;  %v6081_v46 = vld [vmem:[#allocation6 + $0x4e8] sm:$0xf0] }
 0x16b   :  { %v6783_v0 = vld [vmem:[#allocation6 + $0xa48] sm:$0xf]  ;;  %v6528_v6 = vor.u32 %v8098_v62, %v6527_v61  ;;  %4031 = vmatpush.bf16.msrb.mxu3 %v7360_v2  ;;  %v8006_v61 = vld [vmem:[#allocation6 + $0x58c] sm:$0xf]  ;;  %v5892_v2 = vor.u32 %v7934_v57, %v5889_v58 }
 0x16c   :  { %v8162_v1 = vld [vmem:[#allocation6 + $0xa64] sm:$0xf0]  ;;  %v6177_v62 = vld [vmem:[#allocation6 + $0x5a8] sm:$0xf0] }
 0x16d   :  { %v7071_v4 = vld [vmem:[#allocation6 + $0xc88] sm:$0xf]  ;;  %v6784_v12 = vor.u32 %v8162_v1, %v6783_v0  ;;  %3994 = vmatpush.bf16.msrb.mxu0 %v6528_v6  ;;  %v8070_v0 = vld [vmem:[#allocation6 + $0x78c] sm:$0xf]  ;;  %v3737_v6 = vpop.f32.mrf.mxu0 }
 0x16e   :  { %v8234_v5 = vld [vmem:[#allocation6 + $0xca4] sm:$0xf0]  ;;  %v6433_v1 = vld [vmem:[#allocation6 + $0x7a8] sm:$0xf0] }
 0x16f   :  { %v7327_v8 = vld [vmem:[#allocation6 + $0xe88] sm:$0xf]  ;;  %v7072_v16 = vor.u32 %v8234_v5, %v7071_v4  ;;  %4007 = vmatpush.bf16.msrb.mxu1 %v6784_v12  ;;  %v7862_v4 = vld [vmem:[#allocation6 + $0x10c] sm:$0xf]  ;;  %v3738_v12 = vadd.f32 %v3737_v6, %v1152_v60 }
 0x170   :  { %v8298_v9 = vld [vmem:[#allocation6 + $0xea4] sm:$0xf0]  ;;  %v5601_v5 = vld [vmem:[#allocation6 + $0x128] sm:$0xf0] }
 0x171   :  { %v6495_v11 = vld [vmem:[#allocation6 + $0x808] sm:$0xf]  ;;  %v7328_v21 = vor.u32 %v8298_v9, %v7327_v8  ;;  %4019 = vmatpush.bf16.msrb.mxu2 %v7072_v16  ;;  %v6180_v8 = vor.u32 %v8006_v61, %v6177_v62  ;;  %v7926_v9 = vld [vmem:[#allocation6 + $0x30c] sm:$0xf]  ;;  %v5604_v17 = vor.u32 %v7862_v4, %v5601_v5 }
 0x172   :  { %v8090_v13 = vld [vmem:[#allocation6 + $0x824] sm:$0xf0]  ;;  %v6145_v16 = vld [vmem:[#allocation6 + $0x568] sm:$0xf0] }
 0x173   :  { %v6751_v14 = vld [vmem:[#allocation6 + $0xa08] sm:$0xf]  ;;  %v6496_v25 = vor.u32 %v8090_v13, %v6495_v11  ;;  %4032 = vmatpush.bf16.msrb.mxu3 %v7328_v21  ;;  %v5857_v11 = vld [vmem:[#allocation6 + $0x328] sm:$0xf0]  ;;  %v6436_v13 = vor.u32 %v8070_v0, %v6433_v1  ;;  %v3776_v0 = vpop.f32.mrf.mxu3 }
 0x174   :  { %v8154_v15 = vld [vmem:[#allocation6 + $0xa24] sm:$0xf0]  ;;  %v5860_v22 = vor.u32 %v7926_v9, %v5857_v11  ;;  %v7838_v54 = vld [vmem:[#allocation6 + $0x4c] sm:$0xf] }
 0x175   :  { %v7039_v24 = vld [vmem:[#allocation6 + $0xc48] sm:$0xf]  ;;  %v6752_v28 = vor.u32 %v8154_v15, %v6751_v14  ;;  %3995 = vmatpush.bf16.msrb.mxu0 %v6496_v25  ;;  %v3750_v14 = vpop.f32.mrf.mxu1  ;;  %v7998_v15 = vld [vmem:[#allocation6 + $0x54c] sm:$0xf] }
 0x176   :  { %v8226_v3 = vld [vmem:[#allocation6 + $0xc64] sm:$0xf0]  ;;  %v3751_v21 = vadd.f32 %v3750_v14, %v3738_v12  ;;  %v6148_v25 = vor.u32 %v7998_v15, %v6145_v16  ;;  %v7902_v57 = vld [vmem:[#allocation6 + $0x24c] sm:$0xf] }
 0x177   :  { %v7295_v26 = vld [vmem:[#allocation6 + $0xe48] sm:$0xf]  ;;  %v7040_v32 = vor.u32 %v8226_v3, %v7039_v24  ;;  %4008 = vmatpush.bf16.msrb.mxu1 %v6752_v28  ;;  %v7854_v24 = vld [vmem:[#allocation6 + $0xcc] sm:$0xf]  ;;  %v6404_v28 = vor.u32 %v8062_v19, %v6401_v20 }
 0x178   :  { %v8290_v27 = vld [vmem:[#allocation6 + $0xe64] sm:$0xf0]  ;;  %3996 = vmatmul.bf16.vlgmr.msrb.gmra.mxu0 %v8672_v7  ;;  %v5569_v3 = vld [vmem:[#allocation6 + $0xe8] sm:$0xf0] }
 0x179   :  { %v7296_v36 = vor.u32 %v8290_v27, %v7295_v26  ;;  %v7007_v37 = vld [vmem:[#allocation6 + $0xc08] sm:$0xf]  ;;  %4040 = vmatpush.bf16.msra.mxu0 %v5700_v29  ;;  %4020 = vmatpush.bf16.msrb.mxu2 %v7040_v32  ;;  %v7918_v26 = vld [vmem:[#allocation6 + $0x2cc] sm:$0xf] }
 0x17a   :  { %v8218_v38 = vld [vmem:[#allocation6 + $0xc24] sm:$0xf0]  ;;  %4009 = vmatmul.bf16.vlgmr.msrb.gmra.mxu1 %v8675_v10  ;;  %v5825_v27 = vld [vmem:[#allocation6 + $0x2e8] sm:$0xf0] }
 0x17b   :  { %v7263_v39 = vld [vmem:[#allocation6 + $0xe08] sm:$0xf]  ;;  %4053 = vmatpush.bf16.msra.mxu1 %v5956_v31  ;;  %v7008_v52 = vor.u32 %v8218_v38, %v7007_v37  ;;  %4033 = vmatpush.bf16.msrb.mxu3 %v7296_v36  ;;  %v7990_v29 = vld [vmem:[#allocation6 + $0x50c] sm:$0xf]  ;;  %v5572_v31 = vor.u32 %v7854_v24, %v5569_v3  ;;  %v5828_v34 = vor.u32 %v7918_v26, %v5825_v27  ;;  %v3739_v37 = vpop.f32.mrf.mxu0 }
 0x17c   :  { %v8282_v40 = vld [vmem:[#allocation6 + $0xe24] sm:$0xf0]  ;;  %v8054_v32 = vld [vmem:[#allocation6 + $0x70c] sm:$0xf]  ;;  %v6116_v38 = vor.u32 %v7990_v29, %v6113_v30 }
 0x17d   :  { %v7264_v55 = vor.u32 %v8282_v40, %v7263_v39  ;;  %4041 = vmatpush.bf16.msra.mxu0 %v5668_v43  ;;  %4021 = vmatpush.bf16.msrb.mxu2 %v7008_v52  ;;  %v5537_v36 = vld [vmem:[#allocation6 + $0xa8] sm:$0xf0]  ;;  %v6372_v41 = vor.u32 %v8054_v32, %v6369_v33  ;;  %v3752_v42 = vpop.f32.mrf.mxu1 }
 0x17e   :  { %v7910_v39 = vld [vmem:[#allocation6 + $0x28c] sm:$0xf]  ;;  %v5540_v47 = vor.u32 %v7846_v35, %v5537_v36 }
 0x17f   :  { %4054 = vmatpush.bf16.msra.mxu1 %v5924_v50  ;;  %4034 = vmatpush.bf16.msrb.mxu3 %v7264_v55  ;;  %v5793_v40 = vld [vmem:[#allocation6 + $0x2a8] sm:$0xf0] }
 0x180   :  { %4022 = vmatmul.bf16.vlgmr.msrb.gmra.mxu2 %v8679_v48  ;;  %v7982_v43 = vld [vmem:[#allocation6 + $0x4cc] sm:$0xf]  ;;  %v5796_v53 = vor.u32 %v7910_v39, %v5793_v40 }
 0x181   :  { %4066 = vmatpush.bf16.msra.mxu2 %v6212_v56  ;;  %4042 = vmatpush.bf16.msra.mxu0 %v5636_v63  ;;  %v8046_v50 = vld [vmem:[#allocation6 + $0x6cc] sm:$0xf]  ;;  %v6084_v56 = vor.u32 %v7982_v43, %v6081_v46 }
 0x182   :  { %4035 = vmatmul.bf16.vlgmr.msrb.gmra.mxu3 %v8681_v45  ;;  %v6337_v52 = vld [vmem:[#allocation6 + $0x6e8] sm:$0xf0] }
 0x183   :  { %4079 = vmatpush.bf16.msra.mxu3 %v6468_v59  ;;  %4055 = vmatpush.bf16.msra.mxu1 %v5892_v2  ;;  %v5505_v55 = vld [vmem:[#allocation6 + $0x68] sm:$0xf0]  ;;  %v3763_v59 = vpop.f32.mrf.mxu2  ;;  %v6340_v60 = vor.u32 %v8046_v50, %v6337_v52 }
 0x184   :  { %v5761_v58 = vld [vmem:[#allocation6 + $0x268] sm:$0xf0]  ;;  %v3764_v63 = vadd.f32 %v3763_v59, %v3751_v21  ;;  %v5508_v1 = vor.u32 %v7838_v54, %v5505_v55 }
 0x185   :  { %4067 = vmatpush.bf16.msra.mxu2 %v6180_v8  ;;  %4043 = vmatpush.bf16.msra.mxu0 %v5604_v17  ;;  %v7974_v61 = vld [vmem:[#allocation6 + $0x48c] sm:$0xf]  ;;  %v5764_v6 = vor.u32 %v7902_v57, %v5761_v58 }
 0x186   :  { %v6049_v62 = vld [vmem:[#allocation6 + $0x4a8] sm:$0xf0]  ;;  %v8704_v12 = vadd.f32 %v3776_v0, %v3764_v63 }
 0x187   :  { %4080 = vmatpush.bf16.msra.mxu3 %v6436_v13  ;;  %4056 = vmatpush.bf16.msra.mxu1 %v5860_v22  ;;  %v8038_v2 = vld [vmem:[#allocation6 + $0x68c] sm:$0xf]  ;;  %v6052_v13 = vor.u32 %v7974_v61, %v6049_v62 }
 0x188   :  { %v6305_v4 = vld [vmem:[#allocation6 + $0x6a8] sm:$0xf0] }
 0x189   :  { %4068 = vmatpush.bf16.msra.mxu2 %v6148_v25  ;;  %4044 = vmatpush.bf16.msra.mxu0 %v5572_v31  ;;  %v7830_v5 = vld [vmem:[#allocation6 + $0xc] sm:$0xf]  ;;  %v6308_v17 = vor.u32 %v8038_v2, %v6305_v4 }
 0x18a   :  { %v5473_v8 = vld [vmem:[#allocation6 + $0x28] sm:$0xf0] }
 0x18b   :  { %4081 = vmatpush.bf16.msra.mxu3 %v6404_v28  ;;  %4057 = vmatpush.bf16.msra.mxu1 %v5828_v34  ;;  %v7894_v9 = vld [vmem:[#allocation6 + $0x20c] sm:$0xf]  ;;  %v5476_v22 = vor.u32 %v7830_v5, %v5473_v8  ;;  %v3765_v33 = vpop.f32.mrf.mxu2  ;;  %v3789_v8 = vpop.f32.mrf.mxu0 }
 0x18c   :  { %v5729_v11 = vld [vmem:[#allocation6 + $0x228] sm:$0xf0] }
 0x18d   :  { %4069 = vmatpush.bf16.msra.mxu2 %v6116_v38  ;;  %4045 = vmatpush.bf16.msra.mxu0 %v5540_v47  ;;  %v8142_v14 = vld [vmem:[#allocation6 + $0x9cc] sm:$0xf]  ;;  %v5732_v25 = vor.u32 %v7894_v9, %v5729_v11  ;;  %v3778_v38 = vpop.f32.mrf.mxu3 }
 0x18e   :  { %v6721_v15 = vld [vmem:[#allocation6 + $0x9e8] sm:$0xf0] }
 0x18f   :  { %4082 = vmatpush.bf16.msra.mxu3 %v6372_v41  ;;  %4058 = vmatpush.bf16.msra.mxu1 %v5796_v53  ;;  %v8206_v16 = vld [vmem:[#allocation6 + $0xbcc] sm:$0xf]  ;;  %v6724_v26 = vor.u32 %v8142_v14, %v6721_v15  ;;  %v3790_v14 = vadd.f32 %v3789_v8, %v8704_v12  ;;  %v3802_v15 = vpop.f32.mrf.mxu1 }
 0x190   :  { %v6977_v19 = vld [vmem:[#allocation6 + $0xbe8] sm:$0xf0] }
 0x191   :  { %4070 = vmatpush.bf16.msra.mxu2 %v6084_v56  ;;  %v7966_v20 = vld [vmem:[#allocation6 + $0x44c] sm:$0xf]  ;;  %4046 = vmatpush.bf16.msra.mxu0 %v5508_v1  ;;  %v6980_v28 = vor.u32 %v8206_v16, %v6977_v19 }
 0x192   :  { %v6017_v21 = vld [vmem:[#allocation6 + $0x468] sm:$0xf0] }
 0x193   :  { %4083 = vmatpush.bf16.msra.mxu3 %v6340_v60  ;;  %v8030_v24 = vld [vmem:[#allocation6 + $0x64c] sm:$0xf]  ;;  %4059 = vmatpush.bf16.msra.mxu1 %v5764_v6  ;;  %v6020_v29 = vor.u32 %v7966_v20, %v6017_v21  ;;  %v3791_v38 = vpop.f32.mrf.mxu0 }
 0x194   :  { %v6273_v3 = vld [vmem:[#allocation6 + $0x668] sm:$0xf0] }
 0x195   :  { %v8134_v27 = vld [vmem:[#allocation6 + $0x98c] sm:$0xf]  ;;  %4071 = vmatpush.bf16.msra.mxu2 %v6052_v13  ;;  %v6276_v34 = vor.u32 %v8030_v24, %v6273_v3  ;;  %4047 = vmatpush.bf16.msra.mxu0 %v5476_v22  ;;  %v3803_v24 = vadd.f32 %v3802_v15, %v3790_v14  ;;  %v7891_v14 = vld [vmem:[#allocation6 + $0x1ec] sm:$0xf0] }
 0x196   :  { %v6689_v30 = vld [vmem:[#allocation6 + $0x9a8] sm:$0xf0]  ;;  %v5959_v15 = vld [vmem:[#allocation6 + $0x3d0] sm:$0xf] }
 0x197   :  { %v8198_v31 = vld [vmem:[#allocation6 + $0xb8c] sm:$0xf]  ;;  %4084 = vmatpush.bf16.msra.mxu3 %v6308_v17  ;;  %4060 = vmatpush.bf16.msra.mxu1 %v5732_v25  ;;  %v6692_v42 = vor.u32 %v8134_v27, %v6689_v30 }
 0x198   :  { %v6945_v32 = vld [vmem:[#allocation6 + $0xba8] sm:$0xf0]  ;;  %4048 = vmatmul.bf16.vlgmr.msra.gmra.mxu0 %v8656_v18 }
 0x199   :  { %v7958_v35 = vld [vmem:[#allocation6 + $0x40c] sm:$0xf]  ;;  %4092 = vmatpush.bf16.msrb.mxu0 %v6724_v26  ;;  %4072 = vmatpush.bf16.msra.mxu2 %v6020_v29  ;;  %v6948_v47 = vor.u32 %v8198_v31, %v6945_v32 }
 0x19a   :  { %v5985_v36 = vld [vmem:[#allocation6 + $0x428] sm:$0xf0]  ;;  %4061 = vmatmul.bf16.vlgmr.msra.gmra.mxu1 %v8659_v23 }
 0x19b   :  { %v8022_v37 = vld [vmem:[#allocation6 + $0x60c] sm:$0xf]  ;;  %4105 = vmatpush.bf16.msrb.mxu1 %v6980_v28  ;;  %v5988_v50 = vor.u32 %v7958_v35, %v5985_v36  ;;  %4085 = vmatpush.bf16.msra.mxu3 %v6276_v34 }
 0x19c   :  { %v6241_v39 = vld [vmem:[#allocation6 + $0x628] sm:$0xf0] }
 0x19d   :  { %v8270_v40 = vld [vmem:[#allocation6 + $0xdcc] sm:$0xf]  ;;  %v6244_v54 = vor.u32 %v8022_v37, %v6241_v39  ;;  %4093 = vmatpush.bf16.msrb.mxu0 %v6692_v42  ;;  %4073 = vmatpush.bf16.msra.mxu2 %v5988_v50  ;;  %v3804_v42 = vpop.f32.mrf.mxu1 }
 0x19e   :  { %v7233_v41 = vld [vmem:[#allocation6 + $0xde8] sm:$0xf0]  ;;  %v6215_v42 = vld [vmem:[#allocation6 + $0x5d0] sm:$0xf] }
 0x19f   :  { %v8334_v43 = vld [vmem:[#allocation6 + $0xfcc] sm:$0xf]  ;;  %v7236_v55 = vor.u32 %v8270_v40, %v7233_v41  ;;  %4106 = vmatpush.bf16.msrb.mxu1 %v6948_v47  ;;  %4086 = vmatpush.bf16.msra.mxu3 %v6244_v54 }
 0x1a0   :  { %v7489_v46 = vld [vmem:[#allocation6 + $0xfe8] sm:$0xf0]  ;;  %4074 = vmatmul.bf16.vlgmr.msra.gmra.mxu2 %v8663_v44 }
 0x1a1   :  { %v8126_v52 = vld [vmem:[#allocation6 + $0x94c] sm:$0xf]  ;;  %v7492_v58 = vor.u32 %v8334_v43, %v7489_v46  ;;  %4118 = vmatpush.bf16.msrb.mxu2 %v7236_v55 }
 0x1a2   :  { %v6657_v53 = vld [vmem:[#allocation6 + $0x968] sm:$0xf0]  ;;  %4087 = vmatmul.bf16.vlgmr.msra.gmra.mxu3 %v8665_v51 }
 0x1a3   :  { %v8190_v56 = vld [vmem:[#allocation6 + $0xb4c] sm:$0xf]  ;;  %v6660_v61 = vor.u32 %v8126_v52, %v6657_v53  ;;  %4131 = vmatpush.bf16.msrb.mxu3 %v7492_v58 }
 0x1a4   :  { %v6913_v57 = vld [vmem:[#allocation6 + $0xb68] sm:$0xf0] }
 0x1a5   :  { %v8262_v59 = vld [vmem:[#allocation6 + $0xd8c] sm:$0xf]  ;;  %v6916_v0 = vor.u32 %v8190_v56, %v6913_v57  ;;  %4094 = vmatpush.bf16.msrb.mxu0 %v6660_v61  ;;  %v3815_v61 = vpop.f32.mrf.mxu2 }
 0x1a6   :  { %v7201_v60 = vld [vmem:[#allocation6 + $0xda8] sm:$0xf0] }
 0x1a7   :  { %v8326_v62 = vld [vmem:[#allocation6 + $0xf8c] sm:$0xf]  ;;  %v7204_v4 = vor.u32 %v8262_v59, %v7201_v60  ;;  %4107 = vmatpush.bf16.msrb.mxu1 %v6916_v0 }
 0x1a8   :  { %v7457_v63 = vld [vmem:[#allocation6 + $0xfa8] sm:$0xf0] }
 0x1a9   :  { %v8118_v1 = vld [vmem:[#allocation6 + $0x90c] sm:$0xf]  ;;  %v7460_v9 = vor.u32 %v8326_v62, %v7457_v63  ;;  %4119 = vmatpush.bf16.msrb.mxu2 %v7204_v4  ;;  %v1153_v63 = vperm.slane %v8697_v49, 1  ;;  %v3828_v4 = vpop.f32.mrf.mxu3 }
 0x1aa   :  { %v6625_v2 = vld [vmem:[#allocation6 + $0x928] sm:$0xf0] }
 0x1ab   :  { %v8182_v5 = vld [vmem:[#allocation6 + $0xb0c] sm:$0xf]  ;;  %v6628_v16 = vor.u32 %v8118_v1, %v6625_v2  ;;  %4132 = vmatpush.bf16.msrb.mxu3 %v7460_v9  ;;  %v3816_v2 = vadd.f32 %v3815_v61, %v3803_v24  ;;  %v7939_v61 = vld [vmem:[#allocation6 + $0x36c] sm:$0xf0] }
 0x1ac   :  { %v6881_v6 = vld [vmem:[#allocation6 + $0xb28] sm:$0xf0] }
 0x1ad   :  { %v8254_v11 = vld [vmem:[#allocation6 + $0xd4c] sm:$0xf]  ;;  %v6884_v20 = vor.u32 %v8182_v5, %v6881_v6  ;;  %4095 = vmatpush.bf16.msrb.mxu0 %v6628_v16  ;;  %v8712_v16 = vadd.f32 %v3828_v4, %v3816_v2  ;;  %v6439_v4 = vld [vmem:[#allocation6 + $0x790] sm:$0xf] }
 0x1ae   :  { %v7169_v13 = vld [vmem:[#allocation6 + $0xd68] sm:$0xf0] }
 0x1af   :  { %v8318_v17 = vld [vmem:[#allocation6 + $0xf4c] sm:$0xf]  ;;  %v7172_v3 = vor.u32 %v8254_v11, %v7169_v13  ;;  %4108 = vmatpush.bf16.msrb.mxu1 %v6884_v20  ;;  %v5703_v13 = vld [vmem:[#allocation6 + $0x1d0] sm:$0xf] }
 0x1b0   :  { %v7425_v19 = vld [vmem:[#allocation6 + $0xf68] sm:$0xf0]  ;;  %v7955_v20 = vld [vmem:[#allocation6 + $0x3ec] sm:$0xf0] }
 0x1b1   :  { %v8110_v21 = vld [vmem:[#allocation6 + $0x8cc] sm:$0xf]  ;;  %v7428_v27 = vor.u32 %v8318_v17, %v7425_v19  ;;  %4120 = vmatpush.bf16.msrb.mxu2 %v7172_v3  ;;  %v3841_v17 = vpop.f32.mrf.mxu0  ;;  %v3854_v3 = vpop.f32.mrf.mxu1 }
 0x1b2   :  { %v6593_v22 = vld [vmem:[#allocation6 + $0x8e8] sm:$0xf0]  ;;  %v3842_v24 = vadd.f32 %v3841_v17, %v1153_v63 }
 0x1b3   :  { %v8174_v25 = vld [vmem:[#allocation6 + $0xacc] sm:$0xf]  ;;  %v6596_v12 = vor.u32 %v8110_v21, %v6593_v22  ;;  %4133 = vmatpush.bf16.msrb.mxu3 %v7428_v27 }
 0x1b4   :  { %v6849_v26 = vld [vmem:[#allocation6 + $0xae8] sm:$0xf0] }
 0x1b5   :  { %v8246_v28 = vld [vmem:[#allocation6 + $0xd0c] sm:$0xf]  ;;  %v6852_v32 = vor.u32 %v8174_v25, %v6849_v26  ;;  %4096 = vmatpush.bf16.msrb.mxu0 %v6596_v12  ;;  %v5671_v12 = vld [vmem:[#allocation6 + $0x190] sm:$0xf] }
 0x1b6   :  { %v7137_v29 = vld [vmem:[#allocation6 + $0xd28] sm:$0xf0] }
 0x1b7   :  { %v8310_v30 = vld [vmem:[#allocation6 + $0xf0c] sm:$0xf]  ;;  %v7140_v35 = vor.u32 %v8246_v28, %v7137_v29  ;;  %4109 = vmatpush.bf16.msrb.mxu1 %v6852_v32  ;;  %v5704_v29 = vor.u32 %v7891_v14, %v5703_v13  ;;  %v5863_v13 = vld [vmem:[#allocation6 + $0x310] sm:$0xf] }
 0x1b8   :  { %v7393_v31 = vld [vmem:[#allocation6 + $0xf28] sm:$0xf0]  ;;  %v7931_v14 = vld [vmem:[#allocation6 + $0x32c] sm:$0xf0] }
 0x1b9   :  { %v8102_v33 = vld [vmem:[#allocation6 + $0x88c] sm:$0xf]  ;;  %v7396_v39 = vor.u32 %v8310_v30, %v7393_v31  ;;  %4121 = vmatpush.bf16.msrb.mxu2 %v7140_v35  ;;  %v3855_v30 = vadd.f32 %v3854_v3, %v3842_v24  ;;  %v5960_v31 = vor.u32 %v7955_v20, %v5959_v15  ;;  %v7947_v35 = vld [vmem:[#allocation6 + $0x3ac] sm:$0xf0] }
 0x1ba   :  { %v6561_v34 = vld [vmem:[#allocation6 + $0x8a8] sm:$0xf0]  ;;  %v8003_v20 = vld [vmem:[#allocation6 + $0x56c] sm:$0xf0] }
 0x1bb   :  { %v8166_v36 = vld [vmem:[#allocation6 + $0xa8c] sm:$0xf]  ;;  %v6564_v43 = vor.u32 %v8102_v33, %v6561_v34  ;;  %4134 = vmatpush.bf16.msrb.mxu3 %v7396_v39  ;;  %v7883_v33 = vld [vmem:[#allocation6 + $0x1ac] sm:$0xf0] }
 0x1bc   :  { %v6817_v37 = vld [vmem:[#allocation6 + $0xaa8] sm:$0xf0]  ;;  %v5927_v34 = vld [vmem:[#allocation6 + $0x390] sm:$0xf] }
 0x1bd   :  { %v8238_v40 = vld [vmem:[#allocation6 + $0xccc] sm:$0xf]  ;;  %v6820_v50 = vor.u32 %v8166_v36, %v6817_v37  ;;  %4097 = vmatpush.bf16.msrb.mxu0 %v6564_v43  ;;  %v8019_v43 = vld [vmem:[#allocation6 + $0x5ec] sm:$0xf0] }
 0x1be   :  { %v7105_v41 = vld [vmem:[#allocation6 + $0xce8] sm:$0xf0]  ;;  %v6407_v3 = vld [vmem:[#allocation6 + $0x750] sm:$0xf] }
 0x1bf   :  { %v8302_v46 = vld [vmem:[#allocation6 + $0xecc] sm:$0xf]  ;;  %v7108_v54 = vor.u32 %v8238_v40, %v7105_v41  ;;  %4110 = vmatpush.bf16.msrb.mxu1 %v6820_v50  ;;  %v3817_v40 = vpop.f32.mrf.mxu2  ;;  %v6471_v50 = vld [vmem:[#allocation6 + $0x7d0] sm:$0xf] }
 0x1c0   :  { %v7361_v47 = vld [vmem:[#allocation6 + $0xee8] sm:$0xf0]  ;;  %v8059_v40 = vld [vmem:[#allocation6 + $0x72c] sm:$0xf0] }
 0x1c1   :  { %v8094_v52 = vld [vmem:[#allocation6 + $0x84c] sm:$0xf]  ;;  %v7364_v57 = vor.u32 %v8302_v46, %v7361_v47  ;;  %4122 = vmatpush.bf16.msrb.mxu2 %v7108_v54  ;;  %v3830_v46 = vpop.f32.mrf.mxu3  ;;  %v5672_v47 = vor.u32 %v7883_v33, %v5671_v12 }
 0x1c2   :  { %v6529_v53 = vld [vmem:[#allocation6 + $0x868] sm:$0xf0] }
 0x1c3   :  { %v8158_v55 = vld [vmem:[#allocation6 + $0xa4c] sm:$0xf]  ;;  %v6532_v62 = vor.u32 %v8094_v52, %v6529_v53  ;;  %4135 = vmatpush.bf16.msrb.mxu3 %v7364_v57  ;;  %v8083_v52 = vld [vmem:[#allocation6 + $0x7ec] sm:$0xf0]  ;;  %v5928_v53 = vor.u32 %v7947_v35, %v5927_v34  ;;  %v3843_v57 = vpop.f32.mrf.mxu0 }
 0x1c4   :  { %v6785_v56 = vld [vmem:[#allocation6 + $0xa68] sm:$0xf0]  ;;  %v6472_v63 = vor.u32 %v8083_v52, %v6471_v50  ;;  %v6119_v34 = vld [vmem:[#allocation6 + $0x510] sm:$0xf] }
 0x1c5   :  { %v8230_v58 = vld [vmem:[#allocation6 + $0xc8c] sm:$0xf]  ;;  %v6788_v5 = vor.u32 %v8158_v55, %v6785_v56  ;;  %4098 = vmatpush.bf16.msrb.mxu0 %v6532_v62  ;;  %v5639_v55 = vld [vmem:[#allocation6 + $0x150] sm:$0xf]  ;;  %v3856_v62 = vpop.f32.mrf.mxu1 }
 0x1c6   :  { %v7073_v59 = vld [vmem:[#allocation6 + $0xca8] sm:$0xf0]  ;;  %v7875_v56 = vld [vmem:[#allocation6 + $0x16c] sm:$0xf0] }
 0x1c7   :  { %v8294_v60 = vld [vmem:[#allocation6 + $0xe8c] sm:$0xf]  ;;  %v7076_v11 = vor.u32 %v8230_v58, %v7073_v59  ;;  %4111 = vmatpush.bf16.msrb.mxu1 %v6788_v5  ;;  %v6216_v59 = vor.u32 %v8019_v43, %v6215_v42  ;;  %v5640_v2 = vor.u32 %v7875_v56, %v5639_v55  ;;  %v8075_v5 = vld [vmem:[#allocation6 + $0x7ac] sm:$0xf0]  ;;  %v3867_v15 = vpop.f32.mrf.mxu2 }
 0x1c8   :  { %v7329_v0 = vld [vmem:[#allocation6 + $0xea8] sm:$0xf0]  ;;  %v6440_v17 = vor.u32 %v8075_v5, %v6439_v4  ;;  %v7995_v35 = vld [vmem:[#allocation6 + $0x52c] sm:$0xf0] }
 0x1c9   :  { %v8086_v1 = vld [vmem:[#allocation6 + $0x80c] sm:$0xf]  ;;  %v7332_v19 = vor.u32 %v8294_v60, %v7329_v0  ;;  %4123 = vmatpush.bf16.msrb.mxu2 %v7076_v11  ;;  %v5895_v60 = vld [vmem:[#allocation6 + $0x350] sm:$0xf] }
 0x1ca   :  { %v6497_v6 = vld [vmem:[#allocation6 + $0x828] sm:$0xf0]  ;;  %v6183_v0 = vld [vmem:[#allocation6 + $0x590] sm:$0xf] }
 0x1cb   :  { %v8150_v8 = vld [vmem:[#allocation6 + $0xa0c] sm:$0xf]  ;;  %v6500_v25 = vor.u32 %v8086_v1, %v6497_v6  ;;  %4136 = vmatpush.bf16.msrb.mxu3 %v7332_v19  ;;  %v8011_v1 = vld [vmem:[#allocation6 + $0x5ac] sm:$0xf0]  ;;  %v5896_v6 = vor.u32 %v7939_v61, %v5895_v60 }
 0x1cc   :  { %v6753_v9 = vld [vmem:[#allocation6 + $0xa28] sm:$0xf0]  ;;  %v6184_v11 = vor.u32 %v8011_v1, %v6183_v0  ;;  %v6151_v19 = vld [vmem:[#allocation6 + $0x550] sm:$0xf] }
 0x1cd   :  { %v8222_v21 = vld [vmem:[#allocation6 + $0xc4c] sm:$0xf]  ;;  %v6756_v28 = vor.u32 %v8150_v8, %v6753_v9  ;;  %4099 = vmatpush.bf16.msrb.mxu0 %v6500_v25  ;;  %v5607_v8 = vld [vmem:[#allocation6 + $0x110] sm:$0xf]  ;;  %v6152_v12 = vor.u32 %v8003_v20, %v6151_v19 }
 0x1ce   :  { %v7041_v22 = vld [vmem:[#allocation6 + $0xc68] sm:$0xf0]  ;;  %v7867_v9 = vld [vmem:[#allocation6 + $0x12c] sm:$0xf0] }
 0x1cf   :  { %v8286_v26 = vld [vmem:[#allocation6 + $0xe4c] sm:$0xf]  ;;  %v7044_v32 = vor.u32 %v8222_v21, %v7041_v22  ;;  %4112 = vmatpush.bf16.msrb.mxu1 %v6756_v28  ;;  %v3868_v21 = vadd.f32 %v3867_v15, %v3855_v30  ;;  %v3880_v22 = vpop.f32.mrf.mxu3  ;;  %v5608_v24 = vor.u32 %v7867_v9, %v5607_v8  ;;  %v8067_v25 = vld [vmem:[#allocation6 + $0x76c] sm:$0xf0]  ;;  %v3893_v30 = vpop.f32.mrf.mxu0 }
 0x1d0   :  { %v7297_v27 = vld [vmem:[#allocation6 + $0xe68] sm:$0xf0]  ;;  %4100 = vmatmul.bf16.vlgmr.msrb.gmra.mxu0 %v8672_v7  ;;  %v7859_v28 = vld [vmem:[#allocation6 + $0xec] sm:$0xf0]  ;;  %v6408_v33 = vor.u32 %v8067_v25, %v6407_v3 }
 0x1d1   :  { %v7300_v36 = vor.u32 %v8286_v26, %v7297_v27  ;;  %v8214_v37 = vld [vmem:[#allocation6 + $0xc0c] sm:$0xf]  ;;  %4144 = vmatpush.bf16.msra.mxu0 %v5704_v29  ;;  %4124 = vmatpush.bf16.msrb.mxu2 %v7044_v32  ;;  %v5864_v26 = vor.u32 %v7931_v14, %v5863_v13  ;;  %v5575_v27 = vld [vmem:[#allocation6 + $0xd0] sm:$0xf]  ;;  %v3881_v29 = vadd.f32 %v3880_v22, %v3868_v21 }
 0x1d2   :  { %v7009_v38 = vld [vmem:[#allocation6 + $0xc28] sm:$0xf0]  ;;  %4113 = vmatmul.bf16.vlgmr.msrb.gmra.mxu1 %v8675_v10  ;;  %v7923_v32 = vld [vmem:[#allocation6 + $0x2ec] sm:$0xf0] }
 0x1d3   :  { %v8278_v39 = vld [vmem:[#allocation6 + $0xe0c] sm:$0xf]  ;;  %4157 = vmatpush.bf16.msra.mxu1 %v5960_v31  ;;  %v7012_v54 = vor.u32 %v8214_v37, %v7009_v38  ;;  %4137 = vmatpush.bf16.msrb.mxu3 %v7300_v36  ;;  %v5831_v31 = vld [vmem:[#allocation6 + $0x2d0] sm:$0xf]  ;;  %v3894_v36 = vadd.f32 %v3893_v30, %v3881_v29  ;;  %v3906_v37 = vpop.f32.mrf.mxu1  ;;  %v5576_v38 = vor.u32 %v7859_v28, %v5575_v27 }
 0x1d4   :  { %v7265_v41 = vld [vmem:[#allocation6 + $0xe28] sm:$0xf0]  ;;  %v5543_v42 = vld [vmem:[#allocation6 + $0x90] sm:$0xf] }
 0x1d5   :  { %v7268_v58 = vor.u32 %v8278_v39, %v7265_v41  ;;  %4145 = vmatpush.bf16.msra.mxu0 %v5672_v47  ;;  %4125 = vmatpush.bf16.msrb.mxu2 %v7012_v54  ;;  %v6375_v39 = vld [vmem:[#allocation6 + $0x710] sm:$0xf]  ;;  %v5832_v41 = vor.u32 %v7923_v32, %v5831_v31  ;;  %v3907_v46 = vadd.f32 %v3906_v37, %v3894_v36 }
 0x1d6   :  { %v7851_v43 = vld [vmem:[#allocation6 + $0xac] sm:$0xf0]  ;;  %v6120_v47 = vor.u32 %v7995_v35, %v6119_v34  ;;  %v6376_v54 = vor.u32 %v8059_v40, %v6375_v39 }
 0x1d7   :  { %4158 = vmatpush.bf16.msra.mxu1 %v5928_v53  ;;  %4138 = vmatpush.bf16.msrb.mxu3 %v7268_v58  ;;  %v5799_v50 = vld [vmem:[#allocation6 + $0x290] sm:$0xf]  ;;  %v3869_v53 = vpop.f32.mrf.mxu2  ;;  %v3882_v57 = vpop.f32.mrf.mxu3  ;;  %v5544_v58 = vor.u32 %v7851_v43, %v5543_v42 }
 0x1d8   :  { %4126 = vmatmul.bf16.vlgmr.msrb.gmra.mxu2 %v8679_v48  ;;  %v7915_v52 = vld [vmem:[#allocation6 + $0x2ac] sm:$0xf0]  ;;  %v3895_v4 = vpop.f32.mrf.mxu0 }
 0x1d9   :  { %4170 = vmatpush.bf16.msra.mxu2 %v6216_v59  ;;  %4146 = vmatpush.bf16.msra.mxu0 %v5640_v2  ;;  %v6087_v55 = vld [vmem:[#allocation6 + $0x4d0] sm:$0xf]  ;;  %v5800_v61 = vor.u32 %v7915_v52, %v5799_v50 }
 0x1da   :  { %4139 = vmatmul.bf16.vlgmr.msrb.gmra.mxu3 %v8681_v45  ;;  %v7987_v56 = vld [vmem:[#allocation6 + $0x4ec] sm:$0xf0] }
 0x1db   :  { %4183 = vmatpush.bf16.msra.mxu3 %v6472_v63  ;;  %4159 = vmatpush.bf16.msra.mxu1 %v5896_v6  ;;  %v6343_v59 = vld [vmem:[#allocation6 + $0x6d0] sm:$0xf]  ;;  %v6088_v0 = vor.u32 %v7987_v56, %v6087_v55  ;;  %v3908_v9 = vpop.f32.mrf.mxu1 }
 0x1dc   :  { %v8051_v60 = vld [vmem:[#allocation6 + $0x6ec] sm:$0xf0] }
 0x1dd   :  { %4171 = vmatpush.bf16.msra.mxu2 %v6184_v11  ;;  %4147 = vmatpush.bf16.msra.mxu0 %v5608_v24  ;;  %v5511_v62 = vld [vmem:[#allocation6 + $0x50] sm:$0xf]  ;;  %v6344_v5 = vor.u32 %v8051_v60, %v6343_v59 }
 0x1de   :  { %v7843_v63 = vld [vmem:[#allocation6 + $0x6c] sm:$0xf0] }
 0x1df   :  { %4184 = vmatpush.bf16.msra.mxu3 %v6440_v17  ;;  %4160 = vmatpush.bf16.msra.mxu1 %v5864_v26  ;;  %v5767_v1 = vld [vmem:[#allocation6 + $0x250] sm:$0xf]  ;;  %v5512_v11 = vor.u32 %v7843_v63, %v5511_v62  ;;  %v3932_v31 = vpop.f32.mrf.mxu3 }
 0x1e0   :  { %v7907_v2 = vld [vmem:[#allocation6 + $0x26c] sm:$0xf0] }
 0x1e1   :  { %4172 = vmatpush.bf16.msra.mxu2 %v6152_v12  ;;  %4148 = vmatpush.bf16.msra.mxu0 %v5576_v38  ;;  %v6055_v6 = vld [vmem:[#allocation6 + $0x490] sm:$0xf]  ;;  %v5768_v17 = vor.u32 %v7907_v2, %v5767_v1  ;;  %v3919_v12 = vpop.f32.mrf.mxu2 }
 0x1e2   :  { %v7979_v8 = vld [vmem:[#allocation6 + $0x4ac] sm:$0xf0]  ;;  %v3920_v34 = vadd.f32 %v3919_v12, %v3907_v46 }
 0x1e3   :  { %4185 = vmatpush.bf16.msra.mxu3 %v6408_v33  ;;  %4161 = vmatpush.bf16.msra.mxu1 %v5832_v41  ;;  %v6311_v13 = vld [vmem:[#allocation6 + $0x690] sm:$0xf]  ;;  %v6056_v22 = vor.u32 %v7979_v8, %v6055_v6 }
 0x1e4   :  { %v8043_v14 = vld [vmem:[#allocation6 + $0x6ac] sm:$0xf0]  ;;  %v8718_v43 = vadd.f32 %v3932_v31, %v3920_v34 }
 0x1e5   :  { %4173 = vmatpush.bf16.msra.mxu2 %v6120_v47  ;;  %4149 = vmatpush.bf16.msra.mxu0 %v5544_v58  ;;  %v5479_v15 = vld [vmem:[#allocation6 + $0x10] sm:$0xf]  ;;  %v6312_v26 = vor.u32 %v8043_v14, %v6311_v13 }
 0x1e6   :  { %v7835_v19 = vld [vmem:[#allocation6 + $0x2c] sm:$0xf0] }
 0x1e7   :  { %4186 = vmatpush.bf16.msra.mxu3 %v6376_v54  ;;  %4162 = vmatpush.bf16.msra.mxu1 %v5800_v61  ;;  %v5735_v20 = vld [vmem:[#allocation6 + $0x210] sm:$0xf]  ;;  %v5480_v32 = vor.u32 %v7835_v19, %v5479_v15 }
 0x1e8   :  { %v7899_v21 = vld [vmem:[#allocation6 + $0x22c] sm:$0xf0] }
 0x1e9   :  { %4174 = vmatpush.bf16.msra.mxu2 %v6088_v0  ;;  %v6727_v24 = vld [vmem:[#allocation6 + $0x9d0] sm:$0xf]  ;;  %4150 = vmatpush.bf16.msra.mxu0 %v5512_v11  ;;  %v5736_v35 = vor.u32 %v7899_v21, %v5735_v20  ;;  %v3921_v4 = vpop.f32.mrf.mxu2 }
 0x1ea   :  { %v8147_v3 = vld [vmem:[#allocation6 + $0x9ec] sm:$0xf0] }
 0x1eb   :  { %v6983_v25 = vld [vmem:[#allocation6 + $0xbd0] sm:$0xf]  ;;  %4187 = vmatpush.bf16.msra.mxu3 %v6344_v5  ;;  %4163 = vmatpush.bf16.msra.mxu1 %v5768_v17  ;;  %v6728_v36 = vor.u32 %v8147_v3, %v6727_v24  ;;  %v3934_v5 = vpop.f32.mrf.mxu3 }
 0x1ec   :  { %v8211_v27 = vld [vmem:[#allocation6 + $0xbec] sm:$0xf0] }
 0x1ed   :  { %v6023_v28 = vld [vmem:[#allocation6 + $0x450] sm:$0xf]  ;;  %4175 = vmatpush.bf16.msra.mxu2 %v6056_v22  ;;  %v6984_v38 = vor.u32 %v8211_v27, %v6983_v25  ;;  %4151 = vmatpush.bf16.msra.mxu0 %v5480_v32 }
 0x1ee   :  { %v7971_v29 = vld [vmem:[#allocation6 + $0x46c] sm:$0xf0] }
 0x1ef   :  { %v6279_v30 = vld [vmem:[#allocation6 + $0x650] sm:$0xf]  ;;  %v6024_v39 = vor.u32 %v7971_v29, %v6023_v28  ;;  %4188 = vmatpush.bf16.msra.mxu3 %v6312_v26  ;;  %4164 = vmatpush.bf16.msra.mxu1 %v5736_v35  ;;  %v1154_v26 = vperm.slane %v8697_v49, 2  ;;  %v3945_v35 = vpop.f32.mrf.mxu0  ;;  %v3958_v49 = vpop.f32.mrf.mxu1 }
 0x1f0   :  { %v8035_v33 = vld [vmem:[#allocation6 + $0x66c] sm:$0xf0]  ;;  %4152 = vmatmul.bf16.vlgmr.msra.gmra.mxu0 %v8656_v18 }
 0x1f1   :  { %v6695_v37 = vld [vmem:[#allocation6 + $0x990] sm:$0xf]  ;;  %v6280_v47 = vor.u32 %v8035_v33, %v6279_v30  ;;  %4196 = vmatpush.bf16.msrb.mxu0 %v6728_v36  ;;  %4176 = vmatpush.bf16.msra.mxu2 %v6024_v39  ;;  %v3946_v39 = vadd.f32 %v3945_v35, %v1154_v26  ;;  %v7951_v26 = vld [vmem:[#allocation6 + $0x3d4] sm:$0xf] }
 0x1f2   :  { %v8139_v40 = vld [vmem:[#allocation6 + $0x9ac] sm:$0xf0]  ;;  %4165 = vmatmul.bf16.vlgmr.msra.gmra.mxu1 %v8659_v23 }
 0x1f3   :  { %v6951_v41 = vld [vmem:[#allocation6 + $0xb90] sm:$0xf]  ;;  %v6696_v56 = vor.u32 %v8139_v40, %v6695_v37  ;;  %4209 = vmatpush.bf16.msrb.mxu1 %v6984_v38  ;;  %4189 = vmatpush.bf16.msra.mxu3 %v6280_v47 }
 0x1f4   :  { %v8203_v42 = vld [vmem:[#allocation6 + $0xbac] sm:$0xf0] }
 0x1f5   :  { %v5991_v50 = vld [vmem:[#allocation6 + $0x410] sm:$0xf]  ;;  %v6952_v59 = vor.u32 %v8203_v42, %v6951_v41  ;;  %4197 = vmatpush.bf16.msrb.mxu0 %v6696_v56 }
 0x1f6   :  { %v7963_v52 = vld [vmem:[#allocation6 + $0x42c] sm:$0xf0] }
 0x1f7   :  { %v6247_v53 = vld [vmem:[#allocation6 + $0x610] sm:$0xf]  ;;  %v5992_v60 = vor.u32 %v7963_v52, %v5991_v50  ;;  %4210 = vmatpush.bf16.msrb.mxu1 %v6952_v59  ;;  %v3947_v5 = vpop.f32.mrf.mxu0 }
 0x1f8   :  { %v8027_v54 = vld [vmem:[#allocation6 + $0x62c] sm:$0xf0]  ;;  %v5897_v5 = vld [vmem:[#allocation6 + $0x370] sm:$0xf0] }
 0x1f9   :  { %v7239_v46 = vld [vmem:[#allocation6 + $0xdd0] sm:$0xf]  ;;  %v6248_v63 = vor.u32 %v8027_v54, %v6247_v53  ;;  %4177 = vmatpush.bf16.msra.mxu2 %v5992_v60  ;;  %v3959_v53 = vadd.f32 %v3958_v49, %v3946_v39 }
 0x1fa   :  { %v8275_v55 = vld [vmem:[#allocation6 + $0xdec] sm:$0xf0] }
 0x1fb   :  { %v7495_v57 = vld [vmem:[#allocation6 + $0xfd0] sm:$0xf]  ;;  %v7240_v0 = vor.u32 %v8275_v55, %v7239_v46  ;;  %4190 = vmatpush.bf16.msra.mxu3 %v6248_v63 }
 0x1fc   :  { %v8339_v58 = vld [vmem:[#allocation6 + $0xfec] sm:$0xf0]  ;;  %4178 = vmatmul.bf16.vlgmr.msra.gmra.mxu2 %v8663_v44 }
 0x1fd   :  { %v6663_v61 = vld [vmem:[#allocation6 + $0x950] sm:$0xf]  ;;  %v7496_v6 = vor.u32 %v8339_v58, %v7495_v57  ;;  %4222 = vmatpush.bf16.msrb.mxu2 %v7240_v0 }
 0x1fe   :  { %v8131_v62 = vld [vmem:[#allocation6 + $0x96c] sm:$0xf0]  ;;  %4191 = vmatmul.bf16.vlgmr.msra.gmra.mxu3 %v8665_v51 }
 0x1ff   :  { %v6919_v1 = vld [vmem:[#allocation6 + $0xb50] sm:$0xf]  ;;  %v6664_v11 = vor.u32 %v8131_v62, %v6663_v61  ;;  %4235 = vmatpush.bf16.msrb.mxu3 %v7496_v6 }
 0x200   :  { %v8195_v2 = vld [vmem:[#allocation6 + $0xb6c] sm:$0xf0] }
 0x201   :  { %v7207_v8 = vld [vmem:[#allocation6 + $0xd90] sm:$0xf]  ;;  %v6920_v15 = vor.u32 %v8195_v2, %v6919_v1  ;;  %4198 = vmatpush.bf16.msrb.mxu0 %v6664_v11  ;;  %v3960_v11 = vpop.f32.mrf.mxu1 }
 0x202   :  { %v8267_v9 = vld [vmem:[#allocation6 + $0xdac] sm:$0xf0]  ;;  %v6185_v11 = vld [vmem:[#allocation6 + $0x5b0] sm:$0xf0] }
 0x203   :  { %v7463_v13 = vld [vmem:[#allocation6 + $0xf90] sm:$0xf]  ;;  %v7208_v20 = vor.u32 %v8267_v9, %v7207_v8  ;;  %4211 = vmatpush.bf16.msrb.mxu1 %v6920_v15 }
 0x204   :  { %v8331_v14 = vld [vmem:[#allocation6 + $0xfac] sm:$0xf0] }
 0x205   :  { %v6631_v17 = vld [vmem:[#allocation6 + $0x910] sm:$0xf]  ;;  %v7464_v24 = vor.u32 %v8331_v14, %v7463_v13  ;;  %4223 = vmatpush.bf16.msrb.mxu2 %v7208_v20 }
 0x206   :  { %v8123_v19 = vld [vmem:[#allocation6 + $0x92c] sm:$0xf0] }
 0x207   :  { %v6887_v21 = vld [vmem:[#allocation6 + $0xb10] sm:$0xf]  ;;  %v6632_v27 = vor.u32 %v8123_v19, %v6631_v17  ;;  %4236 = vmatpush.bf16.msrb.mxu3 %v7464_v24 }
 0x208   :  { %v8187_v22 = vld [vmem:[#allocation6 + $0xb2c] sm:$0xf0] }
 0x209   :  { %v7175_v3 = vld [vmem:[#allocation6 + $0xd50] sm:$0xf]  ;;  %v6888_v12 = vor.u32 %v8187_v22, %v6887_v21  ;;  %4199 = vmatpush.bf16.msrb.mxu0 %v6632_v27  ;;  %v3971_v27 = vpop.f32.mrf.mxu2 }
 0x20a   :  { %v8259_v25 = vld [vmem:[#allocation6 + $0xd6c] sm:$0xf0] }
 0x20b   :  { %v7431_v28 = vld [vmem:[#allocation6 + $0xf50] sm:$0xf]  ;;  %v7176_v30 = vor.u32 %v8259_v25, %v7175_v3  ;;  %4212 = vmatpush.bf16.msrb.mxu1 %v6888_v12  ;;  %v7887_v3 = vld [vmem:[#allocation6 + $0x1d4] sm:$0xf] }
 0x20c   :  { %v8323_v29 = vld [vmem:[#allocation6 + $0xf6c] sm:$0xf0]  ;;  %v5705_v25 = vld [vmem:[#allocation6 + $0x1f0] sm:$0xf0] }
 0x20d   :  { %v6599_v31 = vld [vmem:[#allocation6 + $0x8d0] sm:$0xf]  ;;  %v7432_v36 = vor.u32 %v8323_v29, %v7431_v28  ;;  %4224 = vmatpush.bf16.msrb.mxu2 %v7176_v30  ;;  %v5961_v29 = vld [vmem:[#allocation6 + $0x3f0] sm:$0xf0]  ;;  %v3984_v30 = vpop.f32.mrf.mxu3 }
 0x20e   :  { %v8115_v32 = vld [vmem:[#allocation6 + $0x8ec] sm:$0xf0]  ;;  %v5964_v49 = vor.u32 %v7951_v26, %v5961_v29  ;;  %v6153_v26 = vld [vmem:[#allocation6 + $0x570] sm:$0xf0] }
 0x20f   :  { %v6855_v33 = vld [vmem:[#allocation6 + $0xad0] sm:$0xf]  ;;  %v6600_v40 = vor.u32 %v8115_v32, %v6599_v31  ;;  %4237 = vmatpush.bf16.msrb.mxu3 %v7432_v36  ;;  %v3972_v32 = vadd.f32 %v3971_v27, %v3959_v53  ;;  %v6409_v29 = vld [vmem:[#allocation6 + $0x770] sm:$0xf0] }
 0x210   :  { %v8179_v34 = vld [vmem:[#allocation6 + $0xaec] sm:$0xf0] }
 0x211   :  { %v7143_v37 = vld [vmem:[#allocation6 + $0xd10] sm:$0xf]  ;;  %v6856_v47 = vor.u32 %v8179_v34, %v6855_v33  ;;  %4200 = vmatpush.bf16.msrb.mxu0 %v6600_v40  ;;  %v8725_v39 = vadd.f32 %v3984_v30, %v3972_v32  ;;  %v5577_v32 = vld [vmem:[#allocation6 + $0xf0] sm:$0xf0] }
 0x212   :  { %v8251_v38 = vld [vmem:[#allocation6 + $0xd2c] sm:$0xf0] }
 0x213   :  { %v7399_v41 = vld [vmem:[#allocation6 + $0xf10] sm:$0xf]  ;;  %v7144_v54 = vor.u32 %v8251_v38, %v7143_v37  ;;  %4213 = vmatpush.bf16.msrb.mxu1 %v6856_v47  ;;  %v5708_v37 = vor.u32 %v7887_v3, %v5705_v25  ;;  %v7879_v38 = vld [vmem:[#allocation6 + $0x194] sm:$0xf] }
 0x214   :  { %v8315_v42 = vld [vmem:[#allocation6 + $0xf2c] sm:$0xf0]  ;;  %v5929_v47 = vld [vmem:[#allocation6 + $0x3b0] sm:$0xf0] }
 0x215   :  { %v6567_v50 = vld [vmem:[#allocation6 + $0x890] sm:$0xf]  ;;  %v7400_v56 = vor.u32 %v8315_v42, %v7399_v41  ;;  %4225 = vmatpush.bf16.msrb.mxu2 %v7144_v54  ;;  %v5673_v41 = vld [vmem:[#allocation6 + $0x1b0] sm:$0xf0] }
 0x216   :  { %v8107_v52 = vld [vmem:[#allocation6 + $0x8ac] sm:$0xf0]  ;;  %v7943_v42 = vld [vmem:[#allocation6 + $0x394] sm:$0xf] }
 0x217   :  { %v6823_v46 = vld [vmem:[#allocation6 + $0xa90] sm:$0xf]  ;;  %v6568_v59 = vor.u32 %v8107_v52, %v6567_v50  ;;  %4238 = vmatpush.bf16.msrb.mxu3 %v7400_v56  ;;  %v6217_v56 = vld [vmem:[#allocation6 + $0x5f0] sm:$0xf0] }
 0x218   :  { %v8171_v55 = vld [vmem:[#allocation6 + $0xaac] sm:$0xf0]  ;;  %v7999_v25 = vld [vmem:[#allocation6 + $0x554] sm:$0xf] }
 0x219   :  { %v7111_v57 = vld [vmem:[#allocation6 + $0xcd0] sm:$0xf]  ;;  %v6824_v62 = vor.u32 %v8171_v55, %v6823_v46  ;;  %4201 = vmatpush.bf16.msrb.mxu0 %v6568_v59  ;;  %v8015_v55 = vld [vmem:[#allocation6 + $0x5d4] sm:$0xf]  ;;  %v6156_v30 = vor.u32 %v7999_v25, %v6153_v26 }
 0x21a   :  { %v8243_v58 = vld [vmem:[#allocation6 + $0xcec] sm:$0xf0]  ;;  %v6473_v59 = vld [vmem:[#allocation6 + $0x7f0] sm:$0xf0] }
 0x21b   :  { %v7367_v60 = vld [vmem:[#allocation6 + $0xed0] sm:$0xf]  ;;  %v7112_v1 = vor.u32 %v8243_v58, %v7111_v57  ;;  %4214 = vmatpush.bf16.msrb.mxu1 %v6824_v62  ;;  %v5676_v57 = vor.u32 %v7879_v38, %v5673_v41  ;;  %v8079_v58 = vld [vmem:[#allocation6 + $0x7d4] sm:$0xf] }
 0x21c   :  { %v8307_v61 = vld [vmem:[#allocation6 + $0xeec] sm:$0xf0]  ;;  %v7871_v62 = vld [vmem:[#allocation6 + $0x154] sm:$0xf] }
 0x21d   :  { %v6535_v63 = vld [vmem:[#allocation6 + $0x850] sm:$0xf]  ;;  %v7368_v6 = vor.u32 %v8307_v61, %v7367_v60  ;;  %4226 = vmatpush.bf16.msrb.mxu2 %v7112_v1  ;;  %v5932_v60 = vor.u32 %v7943_v42, %v5929_v47  ;;  %v6121_v38 = vld [vmem:[#allocation6 + $0x530] sm:$0xf0] }
 0x21e   :  { %v8099_v0 = vld [vmem:[#allocation6 + $0x86c] sm:$0xf0]  ;;  %v8055_v42 = vld [vmem:[#allocation6 + $0x714] sm:$0xf] }
 0x21f   :  { %v6791_v2 = vld [vmem:[#allocation6 + $0xa50] sm:$0xf]  ;;  %v6536_v13 = vor.u32 %v8099_v0, %v6535_v63  ;;  %4239 = vmatpush.bf16.msrb.mxu3 %v7368_v6  ;;  %v5641_v63 = vld [vmem:[#allocation6 + $0x170] sm:$0xf0]  ;;  %v3973_v0 = vpop.f32.mrf.mxu2  ;;  %v3986_v6 = vpop.f32.mrf.mxu3 }
 0x220   :  { %v8163_v4 = vld [vmem:[#allocation6 + $0xa6c] sm:$0xf0]  ;;  %v6377_v47 = vld [vmem:[#allocation6 + $0x730] sm:$0xf0] }
 0x221   :  { %v7079_v8 = vld [vmem:[#allocation6 + $0xc90] sm:$0xf]  ;;  %v6792_v19 = vor.u32 %v8163_v4, %v6791_v2  ;;  %4202 = vmatpush.bf16.msrb.mxu0 %v6536_v13  ;;  %v6220_v2 = vor.u32 %v8015_v55, %v6217_v56  ;;  %v7935_v4 = vld [vmem:[#allocation6 + $0x354] sm:$0xf]  ;;  %v5644_v13 = vor.u32 %v7871_v62, %v5641_v63 }
 0x222   :  { %v8235_v9 = vld [vmem:[#allocation6 + $0xcac] sm:$0xf0]  ;;  %v7911_v55 = vld [vmem:[#allocation6 + $0x294] sm:$0xf] }
 0x223   :  { %v7335_v14 = vld [vmem:[#allocation6 + $0xe90] sm:$0xf]  ;;  %v7080_v24 = vor.u32 %v8235_v9, %v7079_v8  ;;  %4215 = vmatpush.bf16.msrb.mxu1 %v6792_v19  ;;  %v6476_v8 = vor.u32 %v8079_v58, %v6473_v59  ;;  %v8007_v9 = vld [vmem:[#allocation6 + $0x594] sm:$0xf] }
 0x224   :  { %v8299_v15 = vld [vmem:[#allocation6 + $0xeac] sm:$0xf0]  ;;  %v7863_v19 = vld [vmem:[#allocation6 + $0x114] sm:$0xf] }
 0x225   :  { %v6503_v17 = vld [vmem:[#allocation6 + $0x810] sm:$0xf]  ;;  %v7336_v28 = vor.u32 %v8299_v15, %v7335_v14  ;;  %4227 = vmatpush.bf16.msrb.mxu2 %v7080_v24  ;;  %v8071_v14 = vld [vmem:[#allocation6 + $0x794] sm:$0xf] }
 0x226   :  { %v8091_v20 = vld [vmem:[#allocation6 + $0x82c] sm:$0xf0]  ;;  %v6441_v15 = vld [vmem:[#allocation6 + $0x7b0] sm:$0xf0] }
 0x227   :  { %v6759_v21 = vld [vmem:[#allocation6 + $0xa10] sm:$0xf]  ;;  %v6504_v33 = vor.u32 %v8091_v20, %v6503_v17  ;;  %4240 = vmatpush.bf16.msrb.mxu3 %v7336_v28  ;;  %v5900_v17 = vor.u32 %v7935_v4, %v5897_v5  ;;  %v5609_v20 = vld [vmem:[#allocation6 + $0x130] sm:$0xf0]  ;;  %v6444_v3 = vor.u32 %v8071_v14, %v6441_v15 }
 0x228   :  { %v8155_v22 = vld [vmem:[#allocation6 + $0xa2c] sm:$0xf0]  ;;  %v5865_v24 = vld [vmem:[#allocation6 + $0x330] sm:$0xf0]  ;;  %v5612_v27 = vor.u32 %v7863_v19, %v5609_v20 }
 0x229   :  { %v7047_v12 = vld [vmem:[#allocation6 + $0xc50] sm:$0xf]  ;;  %v6760_v36 = vor.u32 %v8155_v22, %v6759_v21  ;;  %4203 = vmatpush.bf16.msrb.mxu0 %v6504_v33  ;;  %v6188_v21 = vor.u32 %v8007_v9, %v6185_v11  ;;  %v7927_v22 = vld [vmem:[#allocation6 + $0x314] sm:$0xf] }
 0x22a   :  { %v8227_v31 = vld [vmem:[#allocation6 + $0xc6c] sm:$0xf0]  ;;  %v8063_v28 = vld [vmem:[#allocation6 + $0x754] sm:$0xf] }
 0x22b   :  { %v7303_v34 = vld [vmem:[#allocation6 + $0xe50] sm:$0xf]  ;;  %v7048_v40 = vor.u32 %v8227_v31, %v7047_v12  ;;  %4216 = vmatpush.bf16.msrb.mxu1 %v6760_v36  ;;  %v5868_v12 = vor.u32 %v7927_v22, %v5865_v24  ;;  %v7855_v31 = vld [vmem:[#allocation6 + $0xd4] sm:$0xf]  ;;  %v6412_v36 = vor.u32 %v8063_v28, %v6409_v29 }
 0x22c   :  { %v8291_v35 = vld [vmem:[#allocation6 + $0xe6c] sm:$0xf0]  ;;  %4204 = vmatmul.bf16.vlgmr.msrb.gmra.mxu0 %v8672_v7  ;;  %v7919_v33 = vld [vmem:[#allocation6 + $0x2d4] sm:$0xf]  ;;  %v5580_v41 = vor.u32 %v7855_v31, %v5577_v32 }
 0x22d   :  { %v7304_v50 = vor.u32 %v8291_v35, %v7303_v34  ;;  %v7015_v52 = vld [vmem:[#allocation6 + $0xc10] sm:$0xf]  ;;  %4248 = vmatpush.bf16.msra.mxu0 %v5708_v37  ;;  %4228 = vmatpush.bf16.msrb.mxu2 %v7048_v40  ;;  %v5833_v34 = vld [vmem:[#allocation6 + $0x2f0] sm:$0xf0]  ;;  %v3997_v35 = vpop.f32.mrf.mxu0  ;;  %v4010_v40 = vpop.f32.mrf.mxu1 }
 0x22e   :  { %v8219_v53 = vld [vmem:[#allocation6 + $0xc2c] sm:$0xf0]  ;;  %4217 = vmatmul.bf16.vlgmr.msrb.gmra.mxu1 %v8675_v10  ;;  %v7991_v37 = vld [vmem:[#allocation6 + $0x514] sm:$0xf] }
 0x22f   :  { %v7271_v54 = vld [vmem:[#allocation6 + $0xe10] sm:$0xf]  ;;  %4261 = vmatpush.bf16.msra.mxu1 %v5964_v49  ;;  %v7016_v61 = vor.u32 %v8219_v53, %v7015_v52  ;;  %4241 = vmatpush.bf16.msrb.mxu3 %v7304_v50  ;;  %v3998_v49 = vadd.f32 %v3997_v35, %v8725_v39  ;;  %v5836_v50 = vor.u32 %v7919_v33, %v5833_v34  ;;  %v7847_v52 = vld [vmem:[#allocation6 + $0x94] sm:$0xf] }
 0x230   :  { %v8283_v46 = vld [vmem:[#allocation6 + $0xe2c] sm:$0xf0]  ;;  %v5545_v53 = vld [vmem:[#allocation6 + $0xb0] sm:$0xf0] }
 0x231   :  { %v7272_v1 = vor.u32 %v8283_v46, %v7271_v54  ;;  %4249 = vmatpush.bf16.msra.mxu0 %v5676_v57  ;;  %4229 = vmatpush.bf16.msrb.mxu2 %v7016_v61  ;;  %v4011_v54 = vadd.f32 %v4010_v40, %v3998_v49  ;;  %v6124_v46 = vor.u32 %v7991_v37, %v6121_v38  ;;  %v5801_v56 = vld [vmem:[#allocation6 + $0x2b0] sm:$0xf0] }
 0x232   :  { %v6380_v57 = vor.u32 %v8055_v42, %v6377_v47  ;;  %v7983_v58 = vld [vmem:[#allocation6 + $0x4d4] sm:$0xf]  ;;  %v5548_v39 = vor.u32 %v7847_v52, %v5545_v53  ;;  %v5804_v62 = vor.u32 %v7911_v55, %v5801_v56 }
 0x233   :  { %4262 = vmatpush.bf16.msra.mxu1 %v5932_v60  ;;  %4242 = vmatpush.bf16.msrb.mxu3 %v7272_v1  ;;  %v6089_v59 = vld [vmem:[#allocation6 + $0x4f0] sm:$0xf0] }
 0x234   :  { %4230 = vmatmul.bf16.vlgmr.msrb.gmra.mxu2 %v8679_v48  ;;  %v8047_v60 = vld [vmem:[#allocation6 + $0x6d4] sm:$0xf]  ;;  %v6092_v1 = vor.u32 %v7983_v58, %v6089_v59 }
 0x235   :  { %4274 = vmatpush.bf16.msra.mxu2 %v6220_v2  ;;  %4250 = vmatpush.bf16.msra.mxu0 %v5644_v13  ;;  %v6345_v61 = vld [vmem:[#allocation6 + $0x6f0] sm:$0xf0]  ;;  %v3999_v5 = vpop.f32.mrf.mxu0  ;;  %v4012_v11 = vpop.f32.mrf.mxu1 }
 0x236   :  { %4243 = vmatmul.bf16.vlgmr.msrb.gmra.mxu3 %v8681_v45  ;;  %v7839_v63 = vld [vmem:[#allocation6 + $0x54] sm:$0xf]  ;;  %v6348_v6 = vor.u32 %v8047_v60, %v6345_v61 }
 0x237   :  { %4287 = vmatpush.bf16.msra.mxu3 %v6476_v8  ;;  %4263 = vmatpush.bf16.msra.mxu1 %v5900_v17  ;;  %v5513_v0 = vld [vmem:[#allocation6 + $0x70] sm:$0xf0] }
 0x238   :  { %v7903_v2 = vld [vmem:[#allocation6 + $0x254] sm:$0xf]  ;;  %v5516_v13 = vor.u32 %v7839_v63, %v5513_v0 }
 0x239   :  { %4275 = vmatpush.bf16.msra.mxu2 %v6188_v21  ;;  %4251 = vmatpush.bf16.msra.mxu0 %v5612_v27  ;;  %v5769_v4 = vld [vmem:[#allocation6 + $0x270] sm:$0xf0]  ;;  %v4023_v27 = vpop.f32.mrf.mxu2 }
 0x23a   :  { %v7975_v8 = vld [vmem:[#allocation6 + $0x494] sm:$0xf]  ;;  %v5772_v19 = vor.u32 %v7903_v2, %v5769_v4  ;;  %v4024_v32 = vadd.f32 %v4023_v27, %v4011_v54  ;;  %v8737_v27 = vld [vmem:[#allocation7] sm:$0xff] }
 0x23b   :  { %4288 = vmatpush.bf16.msra.mxu3 %v6444_v3  ;;  %4264 = vmatpush.bf16.msra.mxu1 %v5868_v12  ;;  %v6057_v9 = vld [vmem:[#allocation6 + $0x4b0] sm:$0xf0] }
 0x23c   :  { %v8039_v14 = vld [vmem:[#allocation6 + $0x694] sm:$0xf]  ;;  %v6060_v24 = vor.u32 %v7975_v8, %v6057_v9 }
 0x23d   :  { %4276 = vmatpush.bf16.msra.mxu2 %v6156_v30  ;;  %4252 = vmatpush.bf16.msra.mxu0 %v5580_v41  ;;  %v6313_v15 = vld [vmem:[#allocation6 + $0x6b0] sm:$0xf0]  ;;  %v4036_v30 = vpop.f32.mrf.mxu3 }
 0x23e   :  { %v7831_v17 = vld [vmem:[#allocation6 + $0x14] sm:$0xf]  ;;  %v6316_v28 = vor.u32 %v8039_v14, %v6313_v15  ;;  %v8732_v49 = vadd.f32 %v4036_v30, %v4024_v32 }
 0x23f   :  { %4289 = vmatpush.bf16.msra.mxu3 %v6412_v36  ;;  %4265 = vmatpush.bf16.msra.mxu1 %v5836_v50  ;;  %v5481_v20 = vld [vmem:[#allocation6 + $0x30] sm:$0xf0] }
 0x240   :  { %v7895_v21 = vld [vmem:[#allocation6 + $0x214] sm:$0xf]  ;;  %v5484_v33 = vor.u32 %v7831_v17, %v5481_v20 }
 0x241   :  { %4277 = vmatpush.bf16.msra.mxu2 %v6124_v46  ;;  %4253 = vmatpush.bf16.msra.mxu0 %v5548_v39  ;;  %v5737_v22 = vld [vmem:[#allocation6 + $0x230] sm:$0xf0]  ;;  %v4025_v0 = vpop.f32.mrf.mxu2 }
 0x242   :  { %v8143_v3 = vld [vmem:[#allocation6 + $0x9d4] sm:$0xf]  ;;  %v5740_v36 = vor.u32 %v7895_v21, %v5737_v22 }
 0x243   :  { %4290 = vmatpush.bf16.msra.mxu3 %v6380_v57  ;;  %4266 = vmatpush.bf16.msra.mxu1 %v5804_v62  ;;  %v6729_v25 = vld [vmem:[#allocation6 + $0x9f0] sm:$0xf0] }
 0x244   :  { %v8207_v26 = vld [vmem:[#allocation6 + $0xbd4] sm:$0xf]  ;;  %v6732_v37 = vor.u32 %v8143_v3, %v6729_v25 }
 0x245   :  { %4278 = vmatpush.bf16.msra.mxu2 %v6092_v1  ;;  %v6985_v29 = vld [vmem:[#allocation6 + $0xbf0] sm:$0xf0]  ;;  %4254 = vmatpush.bf16.msra.mxu0 %v5516_v13 }
 0x246   :  { %v7967_v12 = vld [vmem:[#allocation6 + $0x454] sm:$0xf]  ;;  %v6988_v40 = vor.u32 %v8207_v26, %v6985_v29 }
 0x247   :  { %4291 = vmatpush.bf16.msra.mxu3 %v6348_v6  ;;  %v6025_v31 = vld [vmem:[#allocation6 + $0x470] sm:$0xf0]  ;;  %4267 = vmatpush.bf16.msra.mxu1 %v5772_v19  ;;  %v4038_v6 = vpop.f32.mrf.mxu3 }
 0x248   :  { %v8031_v34 = vld [vmem:[#allocation6 + $0x654] sm:$0xf]  ;;  %v6028_v41 = vor.u32 %v7967_v12, %v6025_v31 }
 0x249   :  { %v6281_v35 = vld [vmem:[#allocation6 + $0x670] sm:$0xf0]  ;;  %4279 = vmatpush.bf16.msra.mxu2 %v6060_v24  ;;  %4255 = vmatpush.bf16.msra.mxu0 %v5484_v33 }
 0x24a   :  { %v8135_v38 = vld [vmem:[#allocation6 + $0x994] sm:$0xf]  ;;  %v6284_v52 = vor.u32 %v8031_v34, %v6281_v35 }
 0x24b   :  { %v6697_v42 = vld [vmem:[#allocation6 + $0x9b0] sm:$0xf0]  ;;  %4292 = vmatpush.bf16.msra.mxu3 %v6316_v28  ;;  %4268 = vmatpush.bf16.msra.mxu1 %v5740_v36  ;;  %v1155_v28 = vperm.slane %v8737_v27, 3 }
 0x24c   :  { %v8199_v47 = vld [vmem:[#allocation6 + $0xb94] sm:$0xf]  ;;  %v6700_v58 = vor.u32 %v8135_v38, %v6697_v42  ;;  %4256 = vmatmul.bf16.vlgmr.msra.gmra.mxu0 %v8656_v18 }
 0x24d   :  { %v6953_v50 = vld [vmem:[#allocation6 + $0xbb0] sm:$0xf0]  ;;  %4300 = vmatpush.bf16.msrb.mxu0 %v6732_v37  ;;  %4280 = vmatpush.bf16.msra.mxu2 %v6028_v41  ;;  %v4049_v37 = vpop.f32.mrf.mxu0 }
 0x24e   :  { %v7959_v53 = vld [vmem:[#allocation6 + $0x414] sm:$0xf]  ;;  %v6956_v60 = vor.u32 %v8199_v47, %v6953_v50  ;;  %4269 = vmatmul.bf16.vlgmr.msra.gmra.mxu1 %v8659_v23  ;;  %v4050_v42 = vadd.f32 %v4049_v37, %v1155_v28  ;;  %v4062_v47 = vpop.f32.mrf.mxu1  ;;  %v5711_v28 = vld [vmem:[#allocation6 + $0x1d8] sm:$0xf] }
 0x24f   :  { %v5993_v54 = vld [vmem:[#allocation6 + $0x430] sm:$0xf0]  ;;  %4313 = vmatpush.bf16.msrb.mxu1 %v6988_v40  ;;  %4293 = vmatpush.bf16.msra.mxu3 %v6284_v52 }
 0x250   :  { %v8023_v46 = vld [vmem:[#allocation6 + $0x614] sm:$0xf]  ;;  %v5996_v61 = vor.u32 %v7959_v53, %v5993_v54 }
 0x251   :  { %v6249_v55 = vld [vmem:[#allocation6 + $0x630] sm:$0xf0]  ;;  %4301 = vmatpush.bf16.msrb.mxu0 %v6700_v58 }
 0x252   :  { %v8271_v56 = vld [vmem:[#allocation6 + $0xdd4] sm:$0xf]  ;;  %v6252_v1 = vor.u32 %v8023_v46, %v6249_v55  ;;  %4281 = vmatpush.bf16.msra.mxu2 %v5996_v61 }
 0x253   :  { %v7241_v57 = vld [vmem:[#allocation6 + $0xdf0] sm:$0xf0]  ;;  %4314 = vmatpush.bf16.msrb.mxu1 %v6956_v60 }
 0x254   :  { %v8335_v59 = vld [vmem:[#allocation6 + $0xfd4] sm:$0xf]  ;;  %v7244_v2 = vor.u32 %v8271_v56, %v7241_v57  ;;  %4294 = vmatpush.bf16.msra.mxu3 %v6252_v1  ;;  %v4063_v56 = vadd.f32 %v4062_v47, %v4050_v42  ;;  %v5679_v47 = vld [vmem:[#allocation6 + $0x198] sm:$0xf] }
 0x255   :  { %v7497_v39 = vld [vmem:[#allocation6 + $0xff0] sm:$0xf0]  ;;  %4282 = vmatmul.bf16.vlgmr.msra.gmra.mxu2 %v8663_v44 }
 0x256   :  { %v8127_v62 = vld [vmem:[#allocation6 + $0x954] sm:$0xf]  ;;  %v7500_v8 = vor.u32 %v8335_v59, %v7497_v39  ;;  %4326 = vmatpush.bf16.msrb.mxu2 %v7244_v2 }
 0x257   :  { %v6665_v63 = vld [vmem:[#allocation6 + $0x970] sm:$0xf0]  ;;  %4295 = vmatmul.bf16.vlgmr.msra.gmra.mxu3 %v8665_v51 }
 0x258   :  { %v8191_v4 = vld [vmem:[#allocation6 + $0xb54] sm:$0xf]  ;;  %v6668_v13 = vor.u32 %v8127_v62, %v6665_v63  ;;  %4339 = vmatpush.bf16.msrb.mxu3 %v7500_v8 }
 0x259   :  { %v6921_v5 = vld [vmem:[#allocation6 + $0xb70] sm:$0xf0] }
 0x25a   :  { %v8263_v9 = vld [vmem:[#allocation6 + $0xd94] sm:$0xf]  ;;  %v6924_v17 = vor.u32 %v8191_v4, %v6921_v5  ;;  %4302 = vmatpush.bf16.msrb.mxu0 %v6668_v13 }
 0x25b   :  { %v7209_v11 = vld [vmem:[#allocation6 + $0xdb0] sm:$0xf0] }
 0x25c   :  { %v8327_v14 = vld [vmem:[#allocation6 + $0xf94] sm:$0xf]  ;;  %v7212_v21 = vor.u32 %v8263_v9, %v7209_v11  ;;  %4315 = vmatpush.bf16.msrb.mxu1 %v6924_v17  ;;  %v4051_v9 = vpop.f32.mrf.mxu0 }
 0x25d   :  { %v7465_v15 = vld [vmem:[#allocation6 + $0xfb0] sm:$0xf0] }
 0x25e   :  { %v8119_v19 = vld [vmem:[#allocation6 + $0x914] sm:$0xf]  ;;  %v7468_v3 = vor.u32 %v8327_v14, %v7465_v15  ;;  %4327 = vmatpush.bf16.msrb.mxu2 %v7212_v21  ;;  %v4064_v15 = vpop.f32.mrf.mxu1 }
 0x25f   :  { %v6633_v20 = vld [vmem:[#allocation6 + $0x930] sm:$0xf0] }
 0x260   :  { %v8183_v22 = vld [vmem:[#allocation6 + $0xb14] sm:$0xf]  ;;  %v6636_v29 = vor.u32 %v8119_v19, %v6633_v20  ;;  %4340 = vmatpush.bf16.msrb.mxu3 %v7468_v3 }
 0x261   :  { %v6889_v24 = vld [vmem:[#allocation6 + $0xb30] sm:$0xf0] }
 0x262   :  { %v8255_v25 = vld [vmem:[#allocation6 + $0xd54] sm:$0xf]  ;;  %v6892_v32 = vor.u32 %v8183_v22, %v6889_v24  ;;  %4303 = vmatpush.bf16.msrb.mxu0 %v6636_v29  ;;  %v7892_v29 = vld [vmem:[#allocation6 + $0x1f4] sm:$0xf0] }
 0x263   :  { %v7177_v26 = vld [vmem:[#allocation6 + $0xd70] sm:$0xf0]  ;;  %v5712_v42 = vor.u32 %v7892_v29, %v5711_v28  ;;  %v5871_v28 = vld [vmem:[#allocation6 + $0x318] sm:$0xf] }
 0x264   :  { %v8319_v12 = vld [vmem:[#allocation6 + $0xf54] sm:$0xf]  ;;  %v7180_v34 = vor.u32 %v8255_v25, %v7177_v26  ;;  %4316 = vmatpush.bf16.msrb.mxu1 %v6892_v32  ;;  %v7932_v29 = vld [vmem:[#allocation6 + $0x334] sm:$0xf0] }
 0x265   :  { %v7433_v31 = vld [vmem:[#allocation6 + $0xf70] sm:$0xf0] }
 0x266   :  { %v8111_v30 = vld [vmem:[#allocation6 + $0x8d4] sm:$0xf]  ;;  %v7436_v38 = vor.u32 %v8319_v12, %v7433_v31  ;;  %4328 = vmatpush.bf16.msrb.mxu2 %v7180_v34  ;;  %v5967_v12 = vld [vmem:[#allocation6 + $0x3d8] sm:$0xf]  ;;  %v4075_v31 = vpop.f32.mrf.mxu2 }
 0x267   :  { %v6601_v33 = vld [vmem:[#allocation6 + $0x8f0] sm:$0xf0] }
 0x268   :  { %v8175_v35 = vld [vmem:[#allocation6 + $0xad4] sm:$0xf]  ;;  %v6604_v50 = vor.u32 %v8111_v30, %v6601_v33  ;;  %4341 = vmatpush.bf16.msrb.mxu3 %v7436_v38  ;;  %v7956_v30 = vld [vmem:[#allocation6 + $0x3f4] sm:$0xf0] }
 0x269   :  { %v6857_v36 = vld [vmem:[#allocation6 + $0xaf0] sm:$0xf0] }
 0x26a   :  { %v8247_v40 = vld [vmem:[#allocation6 + $0xd14] sm:$0xf]  ;;  %v6860_v54 = vor.u32 %v8175_v35, %v6857_v36  ;;  %4304 = vmatpush.bf16.msrb.mxu0 %v6604_v50  ;;  %v4076_v35 = vadd.f32 %v4075_v31, %v4063_v56  ;;  %v4088_v36 = vpop.f32.mrf.mxu3  ;;  %v6159_v31 = vld [vmem:[#allocation6 + $0x558] sm:$0xf] }
 0x26b   :  { %v7145_v41 = vld [vmem:[#allocation6 + $0xd30] sm:$0xf0] }
 0x26c   :  { %v8311_v52 = vld [vmem:[#allocation6 + $0xf14] sm:$0xf]  ;;  %v7148_v57 = vor.u32 %v8247_v40, %v7145_v41  ;;  %4317 = vmatpush.bf16.msrb.mxu1 %v6860_v54  ;;  %v8741_v50 = vadd.f32 %v4088_v36, %v4076_v35  ;;  %v7884_v54 = vld [vmem:[#allocation6 + $0x1b4] sm:$0xf0]  ;;  %v5872_v35 = vor.u32 %v7932_v29, %v5871_v28 }
 0x26d   :  { %v7401_v53 = vld [vmem:[#allocation6 + $0xf30] sm:$0xf0]  ;;  %v5583_v36 = vld [vmem:[#allocation6 + $0xd8] sm:$0xf] }
 0x26e   :  { %v8103_v46 = vld [vmem:[#allocation6 + $0x894] sm:$0xf]  ;;  %v7404_v39 = vor.u32 %v8311_v52, %v7401_v53  ;;  %4329 = vmatpush.bf16.msrb.mxu2 %v7148_v57  ;;  %v5968_v52 = vor.u32 %v7956_v30, %v5967_v12  ;;  %v7836_v28 = vld [vmem:[#allocation6 + $0x34] sm:$0xf0] }
 0x26f   :  { %v6569_v55 = vld [vmem:[#allocation6 + $0x8b0] sm:$0xf0]  ;;  %v5743_v29 = vld [vmem:[#allocation6 + $0x218] sm:$0xf] }
 0x270   :  { %v8167_v58 = vld [vmem:[#allocation6 + $0xa94] sm:$0xf]  ;;  %v6572_v62 = vor.u32 %v8103_v46, %v6569_v55  ;;  %4342 = vmatpush.bf16.msrb.mxu3 %v7404_v39  ;;  %v5935_v46 = vld [vmem:[#allocation6 + $0x398] sm:$0xf] }
 0x271   :  { %v6825_v59 = vld [vmem:[#allocation6 + $0xab0] sm:$0xf0]  ;;  %v7948_v55 = vld [vmem:[#allocation6 + $0x3b4] sm:$0xf0] }
 0x272   :  { %v8239_v60 = vld [vmem:[#allocation6 + $0xcd4] sm:$0xf]  ;;  %v6828_v1 = vor.u32 %v8167_v58, %v6825_v59  ;;  %4305 = vmatpush.bf16.msrb.mxu0 %v6572_v62  ;;  %v5680_v62 = vor.u32 %v7884_v54, %v5679_v47 }
 0x273   :  { %v7113_v61 = vld [vmem:[#allocation6 + $0xcf0] sm:$0xf0] }
 0x274   :  { %v8303_v63 = vld [vmem:[#allocation6 + $0xed4] sm:$0xf]  ;;  %v7116_v5 = vor.u32 %v8239_v60, %v7113_v61  ;;  %4318 = vmatpush.bf16.msrb.mxu1 %v6828_v1  ;;  %v6223_v60 = vld [vmem:[#allocation6 + $0x5d8] sm:$0xf]  ;;  %v5936_v1 = vor.u32 %v7948_v55, %v5935_v46  ;;  %v4114_v46 = vpop.f32.mrf.mxu1 }
 0x275   :  { %v7369_v0 = vld [vmem:[#allocation6 + $0xef0] sm:$0xf0]  ;;  %v8020_v61 = vld [vmem:[#allocation6 + $0x5f4] sm:$0xf0] }
 0x276   :  { %v8095_v2 = vld [vmem:[#allocation6 + $0x854] sm:$0xf]  ;;  %v7372_v11 = vor.u32 %v8303_v63, %v7369_v0  ;;  %4330 = vmatpush.bf16.msrb.mxu2 %v7116_v5  ;;  %v6479_v63 = vld [vmem:[#allocation6 + $0x7d8] sm:$0xf]  ;;  %v6224_v9 = vor.u32 %v8020_v61, %v6223_v60 }
 0x277   :  { %v6537_v4 = vld [vmem:[#allocation6 + $0x870] sm:$0xf0]  ;;  %v8084_v0 = vld [vmem:[#allocation6 + $0x7f4] sm:$0xf0] }
 0x278   :  { %v8159_v6 = vld [vmem:[#allocation6 + $0xa54] sm:$0xf]  ;;  %v6540_v17 = vor.u32 %v8095_v2, %v6537_v4  ;;  %4343 = vmatpush.bf16.msrb.mxu3 %v7372_v11  ;;  %v5647_v4 = vld [vmem:[#allocation6 + $0x158] sm:$0xf]  ;;  %v6480_v15 = vor.u32 %v8084_v0, %v6479_v63 }
 0x279   :  { %v6793_v8 = vld [vmem:[#allocation6 + $0xa70] sm:$0xf0]  ;;  %v7876_v5 = vld [vmem:[#allocation6 + $0x174] sm:$0xf0] }
 0x27a   :  { %v8231_v13 = vld [vmem:[#allocation6 + $0xc94] sm:$0xf]  ;;  %v6796_v22 = vor.u32 %v8159_v6, %v6793_v8  ;;  %4306 = vmatpush.bf16.msrb.mxu0 %v6540_v17  ;;  %v4077_v6 = vpop.f32.mrf.mxu2  ;;  %v5903_v11 = vld [vmem:[#allocation6 + $0x358] sm:$0xf] }
 0x27b   :  { %v7081_v14 = vld [vmem:[#allocation6 + $0xcb0] sm:$0xf0]  ;;  %v6191_v17 = vld [vmem:[#allocation6 + $0x598] sm:$0xf] }
 0x27c   :  { %v8295_v19 = vld [vmem:[#allocation6 + $0xe94] sm:$0xf]  ;;  %v7084_v26 = vor.u32 %v8231_v13, %v7081_v14  ;;  %4319 = vmatpush.bf16.msrb.mxu1 %v6796_v22  ;;  %v7940_v13 = vld [vmem:[#allocation6 + $0x374] sm:$0xf0]  ;;  %v4090_v14 = vpop.f32.mrf.mxu3 }
 0x27d   :  { %v7337_v20 = vld [vmem:[#allocation6 + $0xeb0] sm:$0xf0]  ;;  %v8076_v22 = vld [vmem:[#allocation6 + $0x7b4] sm:$0xf0] }
 0x27e   :  { %v8087_v21 = vld [vmem:[#allocation6 + $0x814] sm:$0xf]  ;;  %v7340_v32 = vor.u32 %v8295_v19, %v7337_v20  ;;  %4331 = vmatpush.bf16.msrb.mxu2 %v7084_v26  ;;  %v8012_v19 = vld [vmem:[#allocation6 + $0x5b4] sm:$0xf0]  ;;  %v5648_v20 = vor.u32 %v7876_v5, %v5647_v4 }
 0x27f   :  { %v6505_v24 = vld [vmem:[#allocation6 + $0x830] sm:$0xf0]  ;;  %v6192_v26 = vor.u32 %v8012_v19, %v6191_v17  ;;  %v7916_v63 = vld [vmem:[#allocation6 + $0x2b4] sm:$0xf0] }
 0x280   :  { %v8151_v3 = vld [vmem:[#allocation6 + $0xa14] sm:$0xf]  ;;  %v6508_v37 = vor.u32 %v8087_v21, %v6505_v24  ;;  %4344 = vmatpush.bf16.msrb.mxu3 %v7340_v32  ;;  %v6447_v21 = vld [vmem:[#allocation6 + $0x798] sm:$0xf]  ;;  %v5904_v24 = vor.u32 %v7940_v13, %v5903_v11 }
 0x281   :  { %v6761_v25 = vld [vmem:[#allocation6 + $0xa30] sm:$0xf0]  ;;  %v6448_v12 = vor.u32 %v8076_v22, %v6447_v21  ;;  %v8004_v32 = vld [vmem:[#allocation6 + $0x574] sm:$0xf0]  ;;  %v4116_v21 = vpop.f32.mrf.mxu1 }
 0x282   :  { %v8223_v33 = vld [vmem:[#allocation6 + $0xc54] sm:$0xf]  ;;  %v6764_v41 = vor.u32 %v8151_v3, %v6761_v25  ;;  %4307 = vmatpush.bf16.msrb.mxu0 %v6508_v37  ;;  %v5615_v3 = vld [vmem:[#allocation6 + $0x118] sm:$0xf] }
 0x283   :  { %v7049_v34 = vld [vmem:[#allocation6 + $0xc70] sm:$0xf0]  ;;  %v7868_v25 = vld [vmem:[#allocation6 + $0x134] sm:$0xf0] }
 0x284   :  { %v8287_v38 = vld [vmem:[#allocation6 + $0xe54] sm:$0xf]  ;;  %v7052_v53 = vor.u32 %v8223_v33, %v7049_v34  ;;  %4320 = vmatpush.bf16.msrb.mxu1 %v6764_v41  ;;  %v5616_v30 = vor.u32 %v7868_v25, %v5615_v3  ;;  %v6415_v33 = vld [vmem:[#allocation6 + $0x758] sm:$0xf] }
 0x285   :  { %v7305_v40 = vld [vmem:[#allocation6 + $0xe70] sm:$0xf0]  ;;  %4308 = vmatmul.bf16.vlgmr.msrb.gmra.mxu0 %v8672_v7  ;;  %v8068_v34 = vld [vmem:[#allocation6 + $0x774] sm:$0xf0] }
 0x286   :  { %v7308_v57 = vor.u32 %v8287_v38, %v7305_v40  ;;  %v8215_v56 = vld [vmem:[#allocation6 + $0xc14] sm:$0xf]  ;;  %4352 = vmatpush.bf16.msra.mxu0 %v5712_v42  ;;  %4332 = vmatpush.bf16.msrb.mxu2 %v7052_v53  ;;  %v7860_v37 = vld [vmem:[#allocation6 + $0xf4] sm:$0xf0]  ;;  %v6160_v38 = vor.u32 %v8004_v32, %v6159_v31  ;;  %v4101_v42 = vpop.f32.mrf.mxu0  ;;  %v6416_v47 = vor.u32 %v8068_v34, %v6415_v33  ;;  %v4127_v34 = vpop.f32.mrf.mxu2 }
 0x287   :  { %v7017_v58 = vld [vmem:[#allocation6 + $0xc30] sm:$0xf0]  ;;  %4321 = vmatmul.bf16.vlgmr.msrb.gmra.mxu1 %v8675_v10  ;;  %v5839_v40 = vld [vmem:[#allocation6 + $0x2d8] sm:$0xf]  ;;  %v4102_v54 = vadd.f32 %v4101_v42, %v8741_v50  ;;  %v5584_v55 = vor.u32 %v7860_v37, %v5583_v36 }
 0x288   :  { %v8279_v59 = vld [vmem:[#allocation6 + $0xe14] sm:$0xf]  ;;  %4365 = vmatpush.bf16.msra.mxu1 %v5968_v52  ;;  %v7020_v2 = vor.u32 %v8215_v56, %v7017_v58  ;;  %4345 = vmatpush.bf16.msrb.mxu3 %v7308_v57  ;;  %v7924_v41 = vld [vmem:[#allocation6 + $0x2f4] sm:$0xf0] }
 0x289   :  { %v7273_v39 = vld [vmem:[#allocation6 + $0xe30] sm:$0xf0]  ;;  %v6127_v52 = vld [vmem:[#allocation6 + $0x518] sm:$0xf]  ;;  %v5840_v58 = vor.u32 %v7924_v41, %v5839_v40  ;;  %v4115_v60 = vadd.f32 %v4114_v46, %v4102_v54  ;;  %v4140_v41 = vpop.f32.mrf.mxu3 }
 0x28a   :  { %v7276_v8 = vor.u32 %v8279_v59, %v7273_v39  ;;  %4353 = vmatpush.bf16.msra.mxu0 %v5680_v62  ;;  %4333 = vmatpush.bf16.msrb.mxu2 %v7020_v2  ;;  %v7996_v53 = vld [vmem:[#allocation6 + $0x534] sm:$0xf0] }
 0x28b   :  { %v6383_v57 = vld [vmem:[#allocation6 + $0x718] sm:$0xf]  ;;  %v6128_v61 = vor.u32 %v7996_v53, %v6127_v52  ;;  %v4128_v40 = vadd.f32 %v4127_v34, %v4115_v60 }
 0x28c   :  { %4366 = vmatpush.bf16.msra.mxu1 %v5936_v1  ;;  %4346 = vmatpush.bf16.msrb.mxu3 %v7276_v8  ;;  %v8060_v56 = vld [vmem:[#allocation6 + $0x734] sm:$0xf0] }
 0x28d   :  { %4334 = vmatmul.bf16.vlgmr.msrb.gmra.mxu2 %v8679_v48  ;;  %v5551_v59 = vld [vmem:[#allocation6 + $0x98] sm:$0xf]  ;;  %v6384_v0 = vor.u32 %v8060_v56, %v6383_v57 }
 0x28e   :  { %4378 = vmatpush.bf16.msra.mxu2 %v6224_v9  ;;  %4354 = vmatpush.bf16.msra.mxu0 %v5648_v20  ;;  %v7852_v39 = vld [vmem:[#allocation6 + $0xb4] sm:$0xf0] }
 0x28f   :  { %4347 = vmatmul.bf16.vlgmr.msrb.gmra.mxu3 %v8681_v45  ;;  %v5807_v62 = vld [vmem:[#allocation6 + $0x298] sm:$0xf]  ;;  %v5552_v50 = vor.u32 %v7852_v39, %v5551_v59 }
 0x290   :  { %4391 = vmatpush.bf16.msra.mxu3 %v6480_v15  ;;  %4367 = vmatpush.bf16.msra.mxu1 %v5904_v24  ;;  %v6095_v1 = vld [vmem:[#allocation6 + $0x4d8] sm:$0xf]  ;;  %v5808_v6 = vor.u32 %v7916_v63, %v5807_v62  ;;  %v4103_v15 = vpop.f32.mrf.mxu0 }
 0x291   :  { %v7988_v2 = vld [vmem:[#allocation6 + $0x4f4] sm:$0xf0] }
 0x292   :  { %4379 = vmatpush.bf16.msra.mxu2 %v6192_v26  ;;  %4355 = vmatpush.bf16.msra.mxu0 %v5616_v30  ;;  %v6351_v4 = vld [vmem:[#allocation6 + $0x6d8] sm:$0xf]  ;;  %v6096_v11 = vor.u32 %v7988_v2, %v6095_v1 }
 0x293   :  { %v8052_v5 = vld [vmem:[#allocation6 + $0x6f4] sm:$0xf0] }
 0x294   :  { %4392 = vmatpush.bf16.msra.mxu3 %v6448_v12  ;;  %4368 = vmatpush.bf16.msra.mxu1 %v5872_v35  ;;  %v5519_v8 = vld [vmem:[#allocation6 + $0x58] sm:$0xf]  ;;  %v6352_v17 = vor.u32 %v8052_v5, %v6351_v4 }
 0x295   :  { %v7844_v9 = vld [vmem:[#allocation6 + $0x74] sm:$0xf0] }
 0x296   :  { %4380 = vmatpush.bf16.msra.mxu2 %v6160_v38  ;;  %4356 = vmatpush.bf16.msra.mxu0 %v5584_v55  ;;  %v5775_v13 = vld [vmem:[#allocation6 + $0x258] sm:$0xf]  ;;  %v5520_v22 = vor.u32 %v7844_v9, %v5519_v8  ;;  %v8748_v55 = vadd.f32 %v4140_v41, %v4128_v40 }
 0x297   :  { %v7908_v14 = vld [vmem:[#allocation6 + $0x274] sm:$0xf0] }
 0x298   :  { %4393 = vmatpush.bf16.msra.mxu3 %v6416_v47  ;;  %4369 = vmatpush.bf16.msra.mxu1 %v5840_v58  ;;  %v6063_v19 = vld [vmem:[#allocation6 + $0x498] sm:$0xf]  ;;  %v5776_v26 = vor.u32 %v7908_v14, %v5775_v13  ;;  %v4129_v13 = vpop.f32.mrf.mxu2 }
 0x299   :  { %v7980_v20 = vld [vmem:[#allocation6 + $0x4b4] sm:$0xf0] }
 0x29a   :  { %4381 = vmatpush.bf16.msra.mxu2 %v6128_v61  ;;  %4357 = vmatpush.bf16.msra.mxu0 %v5552_v50  ;;  %v6319_v24 = vld [vmem:[#allocation6 + $0x698] sm:$0xf]  ;;  %v6064_v31 = vor.u32 %v7980_v20, %v6063_v19  ;;  %v4142_v20 = vpop.f32.mrf.mxu3 }
 0x29b   :  { %v8044_v3 = vld [vmem:[#allocation6 + $0x6b4] sm:$0xf0] }
 0x29c   :  { %4394 = vmatpush.bf16.msra.mxu3 %v6384_v0  ;;  %v5487_v25 = vld [vmem:[#allocation6 + $0x18] sm:$0xf]  ;;  %4370 = vmatpush.bf16.msra.mxu1 %v5808_v6  ;;  %v6320_v35 = vor.u32 %v8044_v3, %v6319_v24 }
 0x29d   :  { %v7900_v12 = vld [vmem:[#allocation6 + $0x234] sm:$0xf0]  ;;  %v5488_v42 = vor.u32 %v7836_v28, %v5487_v25 }
 0x29e   :  { %4382 = vmatpush.bf16.msra.mxu2 %v6096_v11  ;;  %v6735_v32 = vld [vmem:[#allocation6 + $0x9d8] sm:$0xf]  ;;  %4358 = vmatpush.bf16.msra.mxu0 %v5520_v22  ;;  %v5744_v53 = vor.u32 %v7900_v12, %v5743_v29 }
 0x29f   :  { %v8148_v30 = vld [vmem:[#allocation6 + $0x9f4] sm:$0xf0] }
 0x2a0   :  { %v6991_v33 = vld [vmem:[#allocation6 + $0xbd8] sm:$0xf]  ;;  %4395 = vmatpush.bf16.msra.mxu3 %v6352_v17  ;;  %4371 = vmatpush.bf16.msra.mxu1 %v5776_v26  ;;  %v6736_v54 = vor.u32 %v8148_v30, %v6735_v32 }
 0x2a1   :  { %v8212_v36 = vld [vmem:[#allocation6 + $0xbf4] sm:$0xf0] }
 0x2a2   :  { %v6031_v37 = vld [vmem:[#allocation6 + $0x458] sm:$0xf]  ;;  %4383 = vmatpush.bf16.msra.mxu2 %v6064_v31  ;;  %v6992_v57 = vor.u32 %v8212_v36, %v6991_v33  ;;  %4359 = vmatpush.bf16.msra.mxu0 %v5488_v42  ;;  %v1156_v36 = vperm.slane %v8737_v27, 4  ;;  %v4166_v27 = vpop.f32.mrf.mxu1 }
 0x2a3   :  { %v7972_v38 = vld [vmem:[#allocation6 + $0x474] sm:$0xf0] }
 0x2a4   :  { %v6287_v47 = vld [vmem:[#allocation6 + $0x658] sm:$0xf]  ;;  %v6032_v56 = vor.u32 %v7972_v38, %v6031_v37  ;;  %4396 = vmatpush.bf16.msra.mxu3 %v6320_v35  ;;  %4372 = vmatpush.bf16.msra.mxu1 %v5744_v53 }
 0x2a5   :  { %v8036_v52 = vld [vmem:[#allocation6 + $0x674] sm:$0xf0]  ;;  %4360 = vmatmul.bf16.vlgmr.msra.gmra.mxu0 %v8656_v18 }
 0x2a6   :  { %v6703_v46 = vld [vmem:[#allocation6 + $0x998] sm:$0xf]  ;;  %v6288_v61 = vor.u32 %v8036_v52, %v6287_v47  ;;  %4404 = vmatpush.bf16.msrb.mxu0 %v6736_v54  ;;  %4384 = vmatpush.bf16.msra.mxu2 %v6032_v56 }
 0x2a7   :  { %v8140_v58 = vld [vmem:[#allocation6 + $0x9b4] sm:$0xf0]  ;;  %4373 = vmatmul.bf16.vlgmr.msra.gmra.mxu1 %v8659_v23 }
 0x2a8   :  { %v6959_v59 = vld [vmem:[#allocation6 + $0xb98] sm:$0xf]  ;;  %v6704_v50 = vor.u32 %v8140_v58, %v6703_v46  ;;  %4417 = vmatpush.bf16.msrb.mxu1 %v6992_v57  ;;  %4397 = vmatpush.bf16.msra.mxu3 %v6288_v61  ;;  %v4153_v46 = vpop.f32.mrf.mxu0 }
 0x2a9   :  { %v8204_v39 = vld [vmem:[#allocation6 + $0xbb4] sm:$0xf0] }
 0x2aa   :  { %v5999_v60 = vld [vmem:[#allocation6 + $0x418] sm:$0xf]  ;;  %v6960_v6 = vor.u32 %v8204_v39, %v6959_v59  ;;  %4405 = vmatpush.bf16.msrb.mxu0 %v6704_v50  ;;  %v4154_v59 = vadd.f32 %v4153_v46, %v1156_v36  ;;  %v7888_v36 = vld [vmem:[#allocation6 + $0x1dc] sm:$0xf] }
 0x2ab   :  { %v7964_v62 = vld [vmem:[#allocation6 + $0x434] sm:$0xf0] }
 0x2ac   :  { %v6255_v63 = vld [vmem:[#allocation6 + $0x618] sm:$0xf]  ;;  %v6000_v8 = vor.u32 %v7964_v62, %v5999_v60  ;;  %4418 = vmatpush.bf16.msrb.mxu1 %v6960_v6 }
 0x2ad   :  { %v8028_v0 = vld [vmem:[#allocation6 + $0x634] sm:$0xf0] }
 0x2ae   :  { %v7247_v1 = vld [vmem:[#allocation6 + $0xdd8] sm:$0xf]  ;;  %v6256_v14 = vor.u32 %v8028_v0, %v6255_v63  ;;  %4385 = vmatpush.bf16.msra.mxu2 %v6000_v8 }
 0x2af   :  { %v8276_v2 = vld [vmem:[#allocation6 + $0xdf4] sm:$0xf0] }
 0x2b0   :  { %v7503_v4 = vld [vmem:[#allocation6 + $0xfd8] sm:$0xf]  ;;  %v7248_v15 = vor.u32 %v8276_v2, %v7247_v1  ;;  %4398 = vmatpush.bf16.msra.mxu3 %v6256_v14  ;;  %v4167_v1 = vadd.f32 %v4166_v27, %v4154_v59  ;;  %v7880_v27 = vld [vmem:[#allocation6 + $0x19c] sm:$0xf] }
 0x2b1   :  { %v8340_v5 = vld [vmem:[#allocation6 + $0xff4] sm:$0xf0]  ;;  %4386 = vmatmul.bf16.vlgmr.msra.gmra.mxu2 %v8663_v44 }
 0x2b2   :  { %v6671_v9 = vld [vmem:[#allocation6 + $0x958] sm:$0xf]  ;;  %v7504_v21 = vor.u32 %v8340_v5, %v7503_v4  ;;  %4430 = vmatpush.bf16.msrb.mxu2 %v7248_v15 }
 0x2b3   :  { %v8132_v11 = vld [vmem:[#allocation6 + $0x974] sm:$0xf0]  ;;  %4399 = vmatmul.bf16.vlgmr.msra.gmra.mxu3 %v8665_v51 }
 0x2b4   :  { %v6927_v17 = vld [vmem:[#allocation6 + $0xb58] sm:$0xf]  ;;  %v6672_v3 = vor.u32 %v8132_v11, %v6671_v9  ;;  %4443 = vmatpush.bf16.msrb.mxu3 %v7504_v21 }
 0x2b5   :  { %v8196_v19 = vld [vmem:[#allocation6 + $0xb74] sm:$0xf0] }
 0x2b6   :  { %v7215_v22 = vld [vmem:[#allocation6 + $0xd98] sm:$0xf]  ;;  %v6928_v28 = vor.u32 %v8196_v19, %v6927_v17  ;;  %4406 = vmatpush.bf16.msrb.mxu0 %v6672_v3 }
 0x2b7   :  { %v8268_v24 = vld [vmem:[#allocation6 + $0xdb4] sm:$0xf0] }
 0x2b8   :  { %v7471_v25 = vld [vmem:[#allocation6 + $0xf98] sm:$0xf]  ;;  %v7216_v31 = vor.u32 %v8268_v24, %v7215_v22  ;;  %4419 = vmatpush.bf16.msrb.mxu1 %v6928_v28  ;;  %v4155_v22 = vpop.f32.mrf.mxu0 }
 0x2b9   :  { %v8332_v26 = vld [vmem:[#allocation6 + $0xfb4] sm:$0xf0] }
 0x2ba   :  { %v6639_v29 = vld [vmem:[#allocation6 + $0x918] sm:$0xf]  ;;  %v7472_v33 = vor.u32 %v8332_v26, %v7471_v25  ;;  %4431 = vmatpush.bf16.msrb.mxu2 %v7216_v31  ;;  %v4168_v26 = vpop.f32.mrf.mxu1 }
 0x2bb   :  { %v8124_v12 = vld [vmem:[#allocation6 + $0x934] sm:$0xf0] }
 0x2bc   :  { %v6895_v32 = vld [vmem:[#allocation6 + $0xb18] sm:$0xf]  ;;  %v6640_v37 = vor.u32 %v8124_v12, %v6639_v29  ;;  %4444 = vmatpush.bf16.msrb.mxu3 %v7472_v33 }
 0x2bd   :  { %v8188_v30 = vld [vmem:[#allocation6 + $0xb34] sm:$0xf0] }
 0x2be   :  { %v7183_v34 = vld [vmem:[#allocation6 + $0xd58] sm:$0xf]  ;;  %v6896_v41 = vor.u32 %v8188_v30, %v6895_v32  ;;  %4407 = vmatpush.bf16.msrb.mxu0 %v6640_v37  ;;  %v5713_v37 = vld [vmem:[#allocation6 + $0x1f8] sm:$0xf0] }
 0x2bf   :  { %v8260_v35 = vld [vmem:[#allocation6 + $0xd74] sm:$0xf0]  ;;  %v5716_v59 = vor.u32 %v7888_v36, %v5713_v37  ;;  %v7928_v36 = vld [vmem:[#allocation6 + $0x31c] sm:$0xf] }
 0x2c0   :  { %v7439_v38 = vld [vmem:[#allocation6 + $0xf58] sm:$0xf]  ;;  %v7184_v52 = vor.u32 %v8260_v35, %v7183_v34  ;;  %4420 = vmatpush.bf16.msrb.mxu1 %v6896_v41  ;;  %v5873_v37 = vld [vmem:[#allocation6 + $0x338] sm:$0xf0] }
 0x2c1   :  { %v8324_v40 = vld [vmem:[#allocation6 + $0xf74] sm:$0xf0] }
 0x2c2   :  { %v6607_v42 = vld [vmem:[#allocation6 + $0x8d8] sm:$0xf]  ;;  %v7440_v57 = vor.u32 %v8324_v40, %v7439_v38  ;;  %4432 = vmatpush.bf16.msrb.mxu2 %v7184_v52  ;;  %v7952_v38 = vld [vmem:[#allocation6 + $0x3dc] sm:$0xf]  ;;  %v4179_v40 = vpop.f32.mrf.mxu2 }
 0x2c3   :  { %v8116_v47 = vld [vmem:[#allocation6 + $0x8f4] sm:$0xf0] }
 0x2c4   :  { %v6863_v53 = vld [vmem:[#allocation6 + $0xad8] sm:$0xf]  ;;  %v6608_v39 = vor.u32 %v8116_v47, %v6607_v42  ;;  %4445 = vmatpush.bf16.msrb.mxu3 %v7440_v57  ;;  %v5969_v42 = vld [vmem:[#allocation6 + $0x3f8] sm:$0xf0] }
 0x2c5   :  { %v8180_v54 = vld [vmem:[#allocation6 + $0xaf4] sm:$0xf0] }
 0x2c6   :  { %v7151_v56 = vld [vmem:[#allocation6 + $0xd18] sm:$0xf]  ;;  %v6864_v62 = vor.u32 %v8180_v54, %v6863_v53  ;;  %4408 = vmatpush.bf16.msrb.mxu0 %v6608_v39  ;;  %v4180_v53 = vadd.f32 %v4179_v40, %v4167_v1  ;;  %v4192_v54 = vpop.f32.mrf.mxu3  ;;  %v8000_v40 = vld [vmem:[#allocation6 + $0x55c] sm:$0xf] }
 0x2c7   :  { %v8252_v58 = vld [vmem:[#allocation6 + $0xd34] sm:$0xf0] }
 0x2c8   :  { %v7407_v61 = vld [vmem:[#allocation6 + $0xf18] sm:$0xf]  ;;  %v7152_v2 = vor.u32 %v8252_v58, %v7151_v56  ;;  %4421 = vmatpush.bf16.msrb.mxu1 %v6864_v62  ;;  %v8755_v39 = vadd.f32 %v4192_v54, %v4180_v53  ;;  %v5681_v62 = vld [vmem:[#allocation6 + $0x1b8] sm:$0xf0]  ;;  %v5876_v53 = vor.u32 %v7928_v36, %v5873_v37 }
 0x2c9   :  { %v8316_v60 = vld [vmem:[#allocation6 + $0xf34] sm:$0xf0]  ;;  %v7856_v54 = vld [vmem:[#allocation6 + $0xdc] sm:$0xf] }
 0x2ca   :  { %v6575_v63 = vld [vmem:[#allocation6 + $0x898] sm:$0xf]  ;;  %v7408_v5 = vor.u32 %v8316_v60, %v7407_v61  ;;  %4433 = vmatpush.bf16.msrb.mxu2 %v7152_v2  ;;  %v5972_v61 = vor.u32 %v7952_v38, %v5969_v42  ;;  %v5489_v36 = vld [vmem:[#allocation6 + $0x38] sm:$0xf0] }
 0x2cb   :  { %v8108_v0 = vld [vmem:[#allocation6 + $0x8b4] sm:$0xf0]  ;;  %v7896_v37 = vld [vmem:[#allocation6 + $0x21c] sm:$0xf] }
 0x2cc   :  { %v6831_v50 = vld [vmem:[#allocation6 + $0xa98] sm:$0xf]  ;;  %v6576_v9 = vor.u32 %v8108_v0, %v6575_v63  ;;  %4446 = vmatpush.bf16.msrb.mxu3 %v7408_v5  ;;  %v7944_v63 = vld [vmem:[#allocation6 + $0x39c] sm:$0xf] }
 0x2cd   :  { %v8172_v4 = vld [vmem:[#allocation6 + $0xab4] sm:$0xf0]  ;;  %v5937_v0 = vld [vmem:[#allocation6 + $0x3b8] sm:$0xf0] }
 0x2ce   :  { %v7119_v6 = vld [vmem:[#allocation6 + $0xcd8] sm:$0xf]  ;;  %v6832_v14 = vor.u32 %v8172_v4, %v6831_v50  ;;  %4409 = vmatpush.bf16.msrb.mxu0 %v6576_v9  ;;  %v5684_v9 = vor.u32 %v7880_v27, %v5681_v62 }
 0x2cf   :  { %v8244_v8 = vld [vmem:[#allocation6 + $0xcf4] sm:$0xf0] }
 0x2d0   :  { %v7375_v11 = vld [vmem:[#allocation6 + $0xed8] sm:$0xf]  ;;  %v7120_v19 = vor.u32 %v8244_v8, %v7119_v6  ;;  %4422 = vmatpush.bf16.msrb.mxu1 %v6832_v14  ;;  %v8016_v6 = vld [vmem:[#allocation6 + $0x5dc] sm:$0xf]  ;;  %v5940_v14 = vor.u32 %v7944_v63, %v5937_v0  ;;  %v4218_v63 = vpop.f32.mrf.mxu1 }
 0x2d1   :  { %v8308_v13 = vld [vmem:[#allocation6 + $0xef4] sm:$0xf0]  ;;  %v6225_v8 = vld [vmem:[#allocation6 + $0x5f8] sm:$0xf0] }
 0x2d2   :  { %v6543_v15 = vld [vmem:[#allocation6 + $0x858] sm:$0xf]  ;;  %v7376_v24 = vor.u32 %v8308_v13, %v7375_v11  ;;  %4434 = vmatpush.bf16.msrb.mxu2 %v7120_v19  ;;  %v8080_v11 = vld [vmem:[#allocation6 + $0x7dc] sm:$0xf]  ;;  %v6228_v22 = vor.u32 %v8016_v6, %v6225_v8 }
 0x2d3   :  { %v8100_v17 = vld [vmem:[#allocation6 + $0x874] sm:$0xf0]  ;;  %v6481_v13 = vld [vmem:[#allocation6 + $0x7f8] sm:$0xf0] }
 0x2d4   :  { %v6799_v20 = vld [vmem:[#allocation6 + $0xa58] sm:$0xf]  ;;  %v6544_v28 = vor.u32 %v8100_v17, %v6543_v15  ;;  %4447 = vmatpush.bf16.msrb.mxu3 %v7376_v24  ;;  %v7872_v17 = vld [vmem:[#allocation6 + $0x15c] sm:$0xf]  ;;  %v6484_v26 = vor.u32 %v8080_v11, %v6481_v13 }
 0x2d5   :  { %v8164_v21 = vld [vmem:[#allocation6 + $0xa74] sm:$0xf0]  ;;  %v5649_v19 = vld [vmem:[#allocation6 + $0x178] sm:$0xf0] }
 0x2d6   :  { %v7087_v3 = vld [vmem:[#allocation6 + $0xc98] sm:$0xf]  ;;  %v6800_v32 = vor.u32 %v8164_v21, %v6799_v20  ;;  %4410 = vmatpush.bf16.msrb.mxu0 %v6544_v28  ;;  %v4181_v20 = vpop.f32.mrf.mxu2  ;;  %v7936_v24 = vld [vmem:[#allocation6 + $0x35c] sm:$0xf] }
 0x2d7   :  { %v8236_v25 = vld [vmem:[#allocation6 + $0xcb4] sm:$0xf0]  ;;  %v8008_v28 = vld [vmem:[#allocation6 + $0x59c] sm:$0xf] }
 0x2d8   :  { %v7343_v29 = vld [vmem:[#allocation6 + $0xe98] sm:$0xf]  ;;  %v7088_v35 = vor.u32 %v8236_v25, %v7087_v3  ;;  %4423 = vmatpush.bf16.msrb.mxu1 %v6800_v32  ;;  %v5905_v3 = vld [vmem:[#allocation6 + $0x378] sm:$0xf0]  ;;  %v4194_v25 = vpop.f32.mrf.mxu3 }
 0x2d9   :  { %v8300_v12 = vld [vmem:[#allocation6 + $0xeb4] sm:$0xf0]  ;;  %v6449_v32 = vld [vmem:[#allocation6 + $0x7b8] sm:$0xf0] }
 0x2da   :  { %v6511_v31 = vld [vmem:[#allocation6 + $0x818] sm:$0xf]  ;;  %v7344_v41 = vor.u32 %v8300_v12, %v7343_v29  ;;  %4435 = vmatpush.bf16.msrb.mxu2 %v7088_v35  ;;  %v6193_v29 = vld [vmem:[#allocation6 + $0x5b8] sm:$0xf0]  ;;  %v5652_v12 = vor.u32 %v7872_v17, %v5649_v19 }
 0x2db   :  { %v8092_v30 = vld [vmem:[#allocation6 + $0x834] sm:$0xf0]  ;;  %v6196_v35 = vor.u32 %v8008_v28, %v6193_v29  ;;  %v5809_v11 = vld [vmem:[#allocation6 + $0x2b8] sm:$0xf0] }
 0x2dc   :  { %v6767_v33 = vld [vmem:[#allocation6 + $0xa18] sm:$0xf]  ;;  %v6512_v46 = vor.u32 %v8092_v30, %v6511_v31  ;;  %4448 = vmatpush.bf16.msrb.mxu3 %v7344_v41  ;;  %v8072_v31 = vld [vmem:[#allocation6 + $0x79c] sm:$0xf]  ;;  %v5908_v30 = vor.u32 %v7936_v24, %v5905_v3 }
 0x2dd   :  { %v8156_v34 = vld [vmem:[#allocation6 + $0xa34] sm:$0xf0]  ;;  %v6452_v38 = vor.u32 %v8072_v31, %v6449_v32  ;;  %v6161_v41 = vld [vmem:[#allocation6 + $0x578] sm:$0xf0]  ;;  %v4220_v31 = vpop.f32.mrf.mxu1 }
 0x2de   :  { %v7055_v47 = vld [vmem:[#allocation6 + $0xc58] sm:$0xf]  ;;  %v6768_v58 = vor.u32 %v8156_v34, %v6767_v33  ;;  %4411 = vmatpush.bf16.msrb.mxu0 %v6512_v46  ;;  %v7864_v33 = vld [vmem:[#allocation6 + $0x11c] sm:$0xf] }
 0x2df   :  { %v8228_v52 = vld [vmem:[#allocation6 + $0xc74] sm:$0xf0]  ;;  %v5617_v34 = vld [vmem:[#allocation6 + $0x138] sm:$0xf0] }
 0x2e0   :  { %v7311_v57 = vld [vmem:[#allocation6 + $0xe58] sm:$0xf]  ;;  %v7056_v60 = vor.u32 %v8228_v52, %v7055_v47  ;;  %4424 = vmatpush.bf16.msrb.mxu1 %v6768_v58  ;;  %v5620_v42 = vor.u32 %v7864_v33, %v5617_v34  ;;  %v8064_v47 = vld [vmem:[#allocation6 + $0x75c] sm:$0xf] }
 0x2e1   :  { %v8292_v56 = vld [vmem:[#allocation6 + $0xe74] sm:$0xf0]  ;;  %4412 = vmatmul.bf16.vlgmr.msrb.gmra.mxu0 %v8672_v7  ;;  %v6417_v52 = vld [vmem:[#allocation6 + $0x778] sm:$0xf0] }
 0x2e2   :  { %v7312_v2 = vor.u32 %v8292_v56, %v7311_v57  ;;  %v7023_v1 = vld [vmem:[#allocation6 + $0xc18] sm:$0xf]  ;;  %4456 = vmatpush.bf16.msra.mxu0 %v5716_v59  ;;  %4436 = vmatpush.bf16.msrb.mxu2 %v7056_v60  ;;  %v5585_v46 = vld [vmem:[#allocation6 + $0xf8] sm:$0xf0]  ;;  %v6164_v57 = vor.u32 %v8000_v40, %v6161_v41  ;;  %v4205_v59 = vpop.f32.mrf.mxu0  ;;  %v6420_v27 = vor.u32 %v8064_v47, %v6417_v52  ;;  %v4231_v52 = vpop.f32.mrf.mxu2 }
 0x2e3   :  { %v8220_v50 = vld [vmem:[#allocation6 + $0xc34] sm:$0xf0]  ;;  %4425 = vmatmul.bf16.vlgmr.msrb.gmra.mxu1 %v8675_v10  ;;  %v7920_v56 = vld [vmem:[#allocation6 + $0x2dc] sm:$0xf]  ;;  %v4206_v62 = vadd.f32 %v4205_v59, %v8755_v39  ;;  %v5588_v0 = vor.u32 %v7856_v54, %v5585_v46 }
 0x2e4   :  { %v7279_v4 = vld [vmem:[#allocation6 + $0xe18] sm:$0xf]  ;;  %4469 = vmatpush.bf16.msra.mxu1 %v5972_v61  ;;  %v7024_v15 = vor.u32 %v8220_v50, %v7023_v1  ;;  %4449 = vmatpush.bf16.msrb.mxu3 %v7312_v2  ;;  %v5841_v58 = vld [vmem:[#allocation6 + $0x2f8] sm:$0xf0] }
 0x2e5   :  { %v8284_v5 = vld [vmem:[#allocation6 + $0xe34] sm:$0xf0]  ;;  %v7992_v61 = vld [vmem:[#allocation6 + $0x51c] sm:$0xf]  ;;  %v5844_v50 = vor.u32 %v7920_v56, %v5841_v58  ;;  %v4219_v6 = vadd.f32 %v4218_v63, %v4206_v62  ;;  %v4244_v58 = vpop.f32.mrf.mxu3 }
 0x2e6   :  { %v7280_v21 = vor.u32 %v8284_v5, %v7279_v4  ;;  %4457 = vmatpush.bf16.msra.mxu0 %v5684_v9  ;;  %4437 = vmatpush.bf16.msrb.mxu2 %v7024_v15  ;;  %v6129_v60 = vld [vmem:[#allocation6 + $0x538] sm:$0xf0] }
 0x2e7   :  { %v8056_v2 = vld [vmem:[#allocation6 + $0x71c] sm:$0xf]  ;;  %v6132_v8 = vor.u32 %v7992_v61, %v6129_v60  ;;  %v4232_v56 = vadd.f32 %v4231_v52, %v4219_v6 }
 0x2e8   :  { %4470 = vmatpush.bf16.msra.mxu1 %v5940_v14  ;;  %4450 = vmatpush.bf16.msrb.mxu3 %v7280_v21  ;;  %v6385_v1 = vld [vmem:[#allocation6 + $0x738] sm:$0xf0] }
 0x2e9   :  { %4438 = vmatmul.bf16.vlgmr.msrb.gmra.mxu2 %v8679_v48  ;;  %v7848_v4 = vld [vmem:[#allocation6 + $0x9c] sm:$0xf]  ;;  %v6388_v13 = vor.u32 %v8056_v2, %v6385_v1 }
 0x2ea   :  { %4482 = vmatpush.bf16.msra.mxu2 %v6228_v22  ;;  %4458 = vmatpush.bf16.msra.mxu0 %v5652_v12  ;;  %v5553_v5 = vld [vmem:[#allocation6 + $0xb8] sm:$0xf0] }
 0x2eb   :  { %4451 = vmatmul.bf16.vlgmr.msrb.gmra.mxu3 %v8681_v45  ;;  %v7912_v9 = vld [vmem:[#allocation6 + $0x29c] sm:$0xf]  ;;  %v5556_v39 = vor.u32 %v7848_v4, %v5553_v5 }
 0x2ec   :  { %4495 = vmatpush.bf16.msra.mxu3 %v6484_v26  ;;  %4471 = vmatpush.bf16.msra.mxu1 %v5908_v30  ;;  %v7984_v14 = vld [vmem:[#allocation6 + $0x4dc] sm:$0xf]  ;;  %v5812_v20 = vor.u32 %v7912_v9, %v5809_v11  ;;  %v4207_v26 = vpop.f32.mrf.mxu0 }
 0x2ed   :  { %v6097_v15 = vld [vmem:[#allocation6 + $0x4f8] sm:$0xf0] }
 0x2ee   :  { %4483 = vmatpush.bf16.msra.mxu2 %v6196_v35  ;;  %4459 = vmatpush.bf16.msra.mxu0 %v5620_v42  ;;  %v8048_v17 = vld [vmem:[#allocation6 + $0x6dc] sm:$0xf]  ;;  %v6100_v24 = vor.u32 %v7984_v14, %v6097_v15 }
 0x2ef   :  { %v6353_v19 = vld [vmem:[#allocation6 + $0x6f8] sm:$0xf0] }
 0x2f0   :  { %4496 = vmatpush.bf16.msra.mxu3 %v6452_v38  ;;  %4472 = vmatpush.bf16.msra.mxu1 %v5876_v53  ;;  %v7840_v21 = vld [vmem:[#allocation6 + $0x5c] sm:$0xf]  ;;  %v6356_v28 = vor.u32 %v8048_v17, %v6353_v19 }
 0x2f1   :  { %v5521_v22 = vld [vmem:[#allocation6 + $0x78] sm:$0xf0] }
 0x2f2   :  { %4484 = vmatpush.bf16.msra.mxu2 %v6164_v57  ;;  %4460 = vmatpush.bf16.msra.mxu0 %v5588_v0  ;;  %v7904_v3 = vld [vmem:[#allocation6 + $0x25c] sm:$0xf]  ;;  %v5524_v32 = vor.u32 %v7840_v21, %v5521_v22  ;;  %v8762_v0 = vadd.f32 %v4244_v58, %v4232_v56 }
 0x2f3   :  { %v5777_v25 = vld [vmem:[#allocation6 + $0x278] sm:$0xf0] }
 0x2f4   :  { %4497 = vmatpush.bf16.msra.mxu3 %v6420_v27  ;;  %4473 = vmatpush.bf16.msra.mxu1 %v5844_v50  ;;  %v7976_v29 = vld [vmem:[#allocation6 + $0x49c] sm:$0xf]  ;;  %v5780_v35 = vor.u32 %v7904_v3, %v5777_v25  ;;  %v4233_v3 = vpop.f32.mrf.mxu2 }
 0x2f5   :  { %v6065_v12 = vld [vmem:[#allocation6 + $0x4b8] sm:$0xf0] }
 0x2f6   :  { %4485 = vmatpush.bf16.msra.mxu2 %v6132_v8  ;;  %4461 = vmatpush.bf16.msra.mxu0 %v5556_v39  ;;  %v8040_v30 = vld [vmem:[#allocation6 + $0x69c] sm:$0xf]  ;;  %v6068_v40 = vor.u32 %v7976_v29, %v6065_v12  ;;  %v4246_v12 = vpop.f32.mrf.mxu3 }
 0x2f7   :  { %v6321_v33 = vld [vmem:[#allocation6 + $0x6b8] sm:$0xf0] }
 0x2f8   :  { %4498 = vmatpush.bf16.msra.mxu3 %v6388_v13  ;;  %v7832_v34 = vld [vmem:[#allocation6 + $0x1c] sm:$0xf]  ;;  %4474 = vmatpush.bf16.msra.mxu1 %v5812_v20  ;;  %v6324_v53 = vor.u32 %v8040_v30, %v6321_v33 }
 0x2f9   :  { %v5745_v38 = vld [vmem:[#allocation6 + $0x238] sm:$0xf0]  ;;  %v5492_v59 = vor.u32 %v7832_v34, %v5489_v36 }
 0x2fa   :  { %4486 = vmatpush.bf16.msra.mxu2 %v6100_v24  ;;  %v8144_v41 = vld [vmem:[#allocation6 + $0x9dc] sm:$0xf]  ;;  %4462 = vmatpush.bf16.msra.mxu0 %v5524_v32  ;;  %v5748_v60 = vor.u32 %v7896_v37, %v5745_v38 }
 0x2fb   :  { %v6737_v42 = vld [vmem:[#allocation6 + $0x9f8] sm:$0xf0] }
 0x2fc   :  { %v8208_v47 = vld [vmem:[#allocation6 + $0xbdc] sm:$0xf]  ;;  %4499 = vmatpush.bf16.msra.mxu3 %v6356_v28  ;;  %4475 = vmatpush.bf16.msra.mxu1 %v5780_v35  ;;  %v6740_v62 = vor.u32 %v8144_v41, %v6737_v42 }
 0x2fd   :  { %v6993_v54 = vld [vmem:[#allocation6 + $0xbf8] sm:$0xf0] }
 0x2fe   :  { %v7968_v46 = vld [vmem:[#allocation6 + $0x45c] sm:$0xf]  ;;  %4487 = vmatpush.bf16.msra.mxu2 %v6068_v40  ;;  %v6996_v2 = vor.u32 %v8208_v47, %v6993_v54  ;;  %4463 = vmatpush.bf16.msra.mxu0 %v5492_v59 }
 0x2ff   :  { %v6033_v57 = vld [vmem:[#allocation6 + $0x478] sm:$0xf0] }
 0x300   :  { %v8032_v27 = vld [vmem:[#allocation6 + $0x65c] sm:$0xf]  ;;  %v6036_v1 = vor.u32 %v7968_v46, %v6033_v57  ;;  %4500 = vmatpush.bf16.msra.mxu3 %v6324_v53  ;;  %4476 = vmatpush.bf16.msra.mxu1 %v5748_v60 }
 0x301   :  { %v6289_v61 = vld [vmem:[#allocation6 + $0x678] sm:$0xf0]  ;;  %4464 = vmatmul.bf16.vlgmr.msra.gmra.mxu0 %v8656_v18 }
 0x302   :  { %v8136_v63 = vld [vmem:[#allocation6 + $0x99c] sm:$0xf]  ;;  %v6292_v8 = vor.u32 %v8032_v27, %v6289_v61  ;;  %4508 = vmatpush.bf16.msrb.mxu0 %v6740_v62  ;;  %4488 = vmatpush.bf16.msra.mxu2 %v6036_v1  ;;  %v8768_v61 = vpop.f32.mrf.mxu0 }
 0x303   :  { %v6705_v50 = vld [vmem:[#allocation6 + $0x9b8] sm:$0xf0]  ;;  %4477 = vmatmul.bf16.vlgmr.msra.gmra.mxu1 %v8659_v23 }
 0x304   :  { %v8200_v4 = vld [vmem:[#allocation6 + $0xb9c] sm:$0xf]  ;;  %v6708_v39 = vor.u32 %v8136_v63, %v6705_v50  ;;  %4521 = vmatpush.bf16.msrb.mxu1 %v6996_v2  ;;  %4501 = vmatpush.bf16.msra.mxu3 %v6292_v8  ;;  %v8770_v63 = vpop.f32.mrf.mxu1 }
 0x305   :  { %v6961_v5 = vld [vmem:[#allocation6 + $0xbb8] sm:$0xf0] }
 0x306   :  { %v7960_v6 = vld [vmem:[#allocation6 + $0x41c] sm:$0xf]  ;;  %v6964_v20 = vor.u32 %v8200_v4, %v6961_v5  ;;  %4509 = vmatpush.bf16.msrb.mxu0 %v6708_v39 }
 0x307   :  { %v6001_v9 = vld [vmem:[#allocation6 + $0x438] sm:$0xf0] }
 0x308   :  { %v8024_v11 = vld [vmem:[#allocation6 + $0x61c] sm:$0xf]  ;;  %v6004_v21 = vor.u32 %v7960_v6, %v6001_v9  ;;  %4522 = vmatpush.bf16.msrb.mxu1 %v6964_v20 }
 0x309   :  { %v6257_v13 = vld [vmem:[#allocation6 + $0x638] sm:$0xf0] }
 0x30a   :  { %v8272_v14 = vld [vmem:[#allocation6 + $0xddc] sm:$0xf]  ;;  %v6260_v25 = vor.u32 %v8024_v11, %v6257_v13  ;;  %4489 = vmatpush.bf16.msra.mxu2 %v6004_v21 }
 0x30b   :  { %v7249_v15 = vld [vmem:[#allocation6 + $0xdf8] sm:$0xf0] }
 0x30c   :  { %v8336_v17 = vld [vmem:[#allocation6 + $0xfdc] sm:$0xf]  ;;  %v7252_v26 = vor.u32 %v8272_v14, %v7249_v15  ;;  %4502 = vmatpush.bf16.msra.mxu3 %v6260_v25  ;;  %v4259_v25 = vpop.f32.mrf.mxu0  ;;  %v4272_v12 = vpop.f32.mrf.mxu1 }
 0x30d   :  { %v7505_v19 = vld [vmem:[#allocation6 + $0xff8] sm:$0xf0]  ;;  %4490 = vmatmul.bf16.vlgmr.msra.gmra.mxu2 %v8663_v44  ;;  %v8368_v25 = vld [vmem:[#allocation9 + $0xd8] sm:$0xff] }
 0x30e   :  { %v8128_v22 = vld [vmem:[#allocation6 + $0x95c] sm:$0xf]  ;;  %v7508_v31 = vor.u32 %v8336_v17, %v7505_v19  ;;  %4534 = vmatpush.bf16.msrb.mxu2 %v7252_v26 }
 0x30f   :  { %v6673_v24 = vld [vmem:[#allocation6 + $0x978] sm:$0xf0]  ;;  %4503 = vmatmul.bf16.vlgmr.msra.gmra.mxu3 %v8665_v51 }
 0x310   :  { %v8192_v28 = vld [vmem:[#allocation6 + $0xb5c] sm:$0xf]  ;;  %v6676_v33 = vor.u32 %v8128_v22, %v6673_v24  ;;  %4547 = vmatpush.bf16.msrb.mxu3 %v7508_v31 }
 0x311   :  { %v6929_v29 = vld [vmem:[#allocation6 + $0xb78] sm:$0xf0] }
 0x312   :  { %v8264_v32 = vld [vmem:[#allocation6 + $0xd9c] sm:$0xf]  ;;  %v6932_v36 = vor.u32 %v8192_v28, %v6929_v29  ;;  %4510 = vmatpush.bf16.msrb.mxu0 %v6676_v33 }
 0x313   :  { %v7217_v30 = vld [vmem:[#allocation6 + $0xdb8] sm:$0xf0] }
 0x314   :  { %v8328_v34 = vld [vmem:[#allocation6 + $0xf9c] sm:$0xf]  ;;  %v7220_v18 = vor.u32 %v8264_v32, %v7217_v30  ;;  %4523 = vmatpush.bf16.msrb.mxu1 %v6932_v36 }
 0x315   :  { %v7473_v35 = vld [vmem:[#allocation6 + $0xfb8] sm:$0xf0] }
 0x316   :  { %v8120_v37 = vld [vmem:[#allocation6 + $0x91c] sm:$0xf]  ;;  %v7476_v42 = vor.u32 %v8328_v34, %v7473_v35  ;;  %4535 = vmatpush.bf16.msrb.mxu2 %v7220_v18  ;;  %v8772_v18 = vpop.f32.mrf.mxu2 }
 0x317   :  { %v6641_v38 = vld [vmem:[#allocation6 + $0x938] sm:$0xf0] }
 0x318   :  { %v8184_v40 = vld [vmem:[#allocation6 + $0xb1c] sm:$0xf]  ;;  %v6644_v52 = vor.u32 %v8120_v37, %v6641_v38  ;;  %4548 = vmatpush.bf16.msrb.mxu3 %v7476_v42 }
 0x319   :  { %v6897_v41 = vld [vmem:[#allocation6 + $0xb38] sm:$0xf0] }
 0x31a   :  { %v8256_v23 = vld [vmem:[#allocation6 + $0xd5c] sm:$0xf]  ;;  %v6900_v46 = vor.u32 %v8184_v40, %v6897_v41  ;;  %4511 = vmatpush.bf16.msrb.mxu0 %v6644_v52 }
 0x31b   :  { %v7185_v47 = vld [vmem:[#allocation6 + $0xd78] sm:$0xf0] }
 0x31c   :  { %v8320_v53 = vld [vmem:[#allocation6 + $0xf5c] sm:$0xf]  ;;  %v7188_v58 = vor.u32 %v8256_v23, %v7185_v47  ;;  %4524 = vmatpush.bf16.msrb.mxu1 %v6900_v46  ;;  %v8774_v23 = vpop.f32.mrf.mxu3  ;;  %v8348_v46 = vld [vmem:[#allocation9 + $0x38] sm:$0xff] }
 0x31d   :  { %v7441_v54 = vld [vmem:[#allocation6 + $0xf78] sm:$0xf0] }
 0x31e   :  { %v8112_v57 = vld [vmem:[#allocation6 + $0x8dc] sm:$0xf]  ;;  %v7444_v60 = vor.u32 %v8320_v53, %v7441_v54  ;;  %4536 = vmatpush.bf16.msrb.mxu2 %v7188_v58 }
 0x31f   :  { %v6609_v56 = vld [vmem:[#allocation6 + $0x8f8] sm:$0xf0] }
 0x320   :  { %v8176_v59 = vld [vmem:[#allocation6 + $0xadc] sm:$0xf]  ;;  %v6612_v2 = vor.u32 %v8112_v57, %v6609_v56  ;;  %4549 = vmatpush.bf16.msrb.mxu3 %v7444_v60  ;;  %v8356_v57 = vld [vmem:[#allocation9 + $0x78] sm:$0xff] }
 0x321   :  { %v6865_v27 = vld [vmem:[#allocation6 + $0xaf8] sm:$0xf0] }
 0x322   :  { %v8248_v62 = vld [vmem:[#allocation6 + $0xd1c] sm:$0xf]  ;;  %v6868_v50 = vor.u32 %v8176_v59, %v6865_v27  ;;  %4512 = vmatpush.bf16.msrb.mxu0 %v6612_v2 }
 0x323   :  { %v7153_v44 = vld [vmem:[#allocation6 + $0xd38] sm:$0xf0] }
 0x324   :  { %v8312_v1 = vld [vmem:[#allocation6 + $0xf1c] sm:$0xf]  ;;  %v7156_v8 = vor.u32 %v8248_v62, %v7153_v44  ;;  %4525 = vmatpush.bf16.msrb.mxu1 %v6868_v50 }
 0x325   :  { %v7409_v51 = vld [vmem:[#allocation6 + $0xf38] sm:$0xf0] }
 0x326   :  { %v8104_v4 = vld [vmem:[#allocation6 + $0x89c] sm:$0xf]  ;;  %v7412_v11 = vor.u32 %v8312_v1, %v7409_v51  ;;  %4537 = vmatpush.bf16.msrb.mxu2 %v7156_v8  ;;  %v4285_v51 = vpop.f32.mrf.mxu2  ;;  %v8372_v8 = vld [vmem:[#allocation9 + $0xf8] sm:$0xff] }
 0x327   :  { %v6577_v5 = vld [vmem:[#allocation6 + $0x8b8] sm:$0xf0] }
 0x328   :  { %v8168_v6 = vld [vmem:[#allocation6 + $0xa9c] sm:$0xf]  ;;  %v6580_v15 = vor.u32 %v8104_v4, %v6577_v5  ;;  %4550 = vmatpush.bf16.msrb.mxu3 %v7412_v11  ;;  %v8364_v4 = vld [vmem:[#allocation9 + $0xb8] sm:$0xff]  ;;  %v4298_v5 = vpop.f32.mrf.mxu3 }
 0x329   :  { %v6833_v9 = vld [vmem:[#allocation6 + $0xab8] sm:$0xf0] }
 0x32a   :  { %v8240_v13 = vld [vmem:[#allocation6 + $0xcdc] sm:$0xf]  ;;  %v6836_v19 = vor.u32 %v8168_v6, %v6833_v9  ;;  %4513 = vmatpush.bf16.msrb.mxu0 %v6580_v15  ;;  %v8346_v6 = vld [vmem:[#allocation9 + $0x28] sm:$0xff]  ;;  %v8780_v15 = vpop.f32.mrf.mxu0 }
 0x32b   :  { %v7121_v14 = vld [vmem:[#allocation6 + $0xcf8] sm:$0xf0]  ;;  %v8354_v9 = vld [vmem:[#allocation9 + $0x68] sm:$0xff] }
 0x32c   :  { %v8304_v39 = vld [vmem:[#allocation6 + $0xedc] sm:$0xf]  ;;  %v7124_v22 = vor.u32 %v8240_v13, %v7121_v14  ;;  %4526 = vmatpush.bf16.msrb.mxu1 %v6836_v19  ;;  %v8353_v14 = vld [vmem:[#allocation9 + $0x60] sm:$0xff]  ;;  %v8344_v19 = vld [vmem:[#allocation9 + $0x18] sm:$0xff] }
 0x32d   :  { %v7377_v17 = vld [vmem:[#allocation6 + $0xef8] sm:$0xf0] }
 0x32e   :  { %v8096_v20 = vld [vmem:[#allocation6 + $0x85c] sm:$0xf]  ;;  %v7380_v26 = vor.u32 %v8304_v39, %v7377_v17  ;;  %4538 = vmatpush.bf16.msrb.mxu2 %v7124_v22  ;;  %v8370_v39 = vld [vmem:[#allocation9 + $0xe8] sm:$0xff]  ;;  %v8782_v17 = vpop.f32.mrf.mxu1 }
 0x32f   :  { %v6545_v21 = vld [vmem:[#allocation6 + $0x878] sm:$0xf0] }
 0x330   :  { %v8160_v24 = vld [vmem:[#allocation6 + $0xa5c] sm:$0xf]  ;;  %v6548_v31 = vor.u32 %v8096_v20, %v6545_v21  ;;  %4551 = vmatpush.bf16.msrb.mxu3 %v7380_v26  ;;  %v8352_v20 = vld [vmem:[#allocation9 + $0x58] sm:$0xff]  ;;  %v8369_v21 = vld [vmem:[#allocation9 + $0xe0] sm:$0xff] }
 0x331   :  { %v6801_v3 = vld [vmem:[#allocation6 + $0xa78] sm:$0xf0] }
 0x332   :  { %v8232_v28 = vld [vmem:[#allocation6 + $0xc9c] sm:$0xf]  ;;  %v6804_v33 = vor.u32 %v8160_v24, %v6801_v3  ;;  %4514 = vmatpush.bf16.msrb.mxu0 %v6548_v31  ;;  %v8360_v24 = vld [vmem:[#allocation9 + $0x98] sm:$0xff]  ;;  %v4311_v3 = vpop.f32.mrf.mxu0  ;;  %v8784_v31 = vpop.f32.mrf.mxu2 }
 0x333   :  { %v7089_v29 = vld [vmem:[#allocation6 + $0xcb8] sm:$0xf0]  ;;  %v8381_v3 = vld [vmem:[#allocation9 + $0x140] sm:$0xff] }
 0x334   :  { %v8296_v32 = vld [vmem:[#allocation6 + $0xe9c] sm:$0xf]  ;;  %v7092_v36 = vor.u32 %v8232_v28, %v7089_v29  ;;  %4527 = vmatpush.bf16.msrb.mxu1 %v6804_v33  ;;  %v8342_v28 = vld [vmem:[#allocation9 + $0x8] sm:$0xff]  ;;  %v8341_v33 = vld [vmem:[#allocation9] sm:$0xff] }
 0x335   :  { %v7345_v30 = vld [vmem:[#allocation6 + $0xeb8] sm:$0xf0]  ;;  %v8350_v29 = vld [vmem:[#allocation9 + $0x48] sm:$0xff] }
 0x336   :  { %v8088_v34 = vld [vmem:[#allocation6 + $0x81c] sm:$0xf]  ;;  %v7348_v40 = vor.u32 %v8296_v32, %v7345_v30  ;;  %4539 = vmatpush.bf16.msrb.mxu2 %v7092_v36  ;;  %v4324_v26 = vpop.f32.mrf.mxu1  ;;  %v8786_v30 = vpop.f32.mrf.mxu3 }
 0x337   :  { %v6513_v35 = vld [vmem:[#allocation6 + $0x838] sm:$0xf0]  ;;  %v8390_v26 = vld [vmem:[#allocation9 + $0x188] sm:$0xff] }
 0x338   :  { %v8152_v37 = vld [vmem:[#allocation6 + $0xa1c] sm:$0xf]  ;;  %v6516_v47 = vor.u32 %v8088_v34, %v6513_v35  ;;  %4552 = vmatpush.bf16.msrb.mxu3 %v7348_v40  ;;  %v4560_v34 = vmax.f32 %v8712_v16, 0.0  ;;  %v8789_v35 = vld [vmem:[#allocation7] sm:$0xff]  ;;  %v4561_v40 = vmax.f32 %v8718_v43, 0.0 }
 0x339   :  { %v6769_v38 = vld [vmem:[#allocation6 + $0xa38] sm:$0xf0]  ;;  %v1157_v36 = vperm.slane %v8789_v35, 5 }
 0x33a   :  { %v8224_v41 = vld [vmem:[#allocation6 + $0xc5c] sm:$0xf]  ;;  %v6772_v54 = vor.u32 %v8152_v37, %v6769_v38  ;;  %4515 = vmatpush.bf16.msrb.mxu0 %v6516_v47  ;;  %v8349_v37 = vld [vmem:[#allocation9 + $0x40] sm:$0xff]  ;;  %v8380_v38 = vld [vmem:[#allocation9 + $0x138] sm:$0xff]  ;;  %v4337_v43 = vpop.f32.mrf.mxu2  ;;  %v4361_v5 = vpop.f32.mrf.mxu0 }
 0x33b   :  { %v7057_v42 = vld [vmem:[#allocation6 + $0xc78] sm:$0xf0]  ;;  %v8366_v47 = vld [vmem:[#allocation9 + $0xc8] sm:$0xff] }
 0x33c   :  { %v8288_v52 = vld [vmem:[#allocation6 + $0xe5c] sm:$0xf]  ;;  %v7060_v56 = vor.u32 %v8224_v41, %v7057_v42  ;;  %4528 = vmatpush.bf16.msrb.mxu1 %v6772_v54  ;;  %v8388_v41 = vld [vmem:[#allocation9 + $0x178] sm:$0xff]  ;;  %v8358_v42 = vld [vmem:[#allocation9 + $0x88] sm:$0xff]  ;;  %v4569_v54 = vpack.c.bf16 %v4561_v40, %v4561_v40 }
 0x33d   :  { %v7313_v53 = vld [vmem:[#allocation6 + $0xe78] sm:$0xf0]  ;;  %4516 = vmatmul.bf16.vlgmr.msrb.gmra.mxu0 %v8672_v7  ;;  %v8345_v7 = vld [vmem:[#allocation9 + $0x20] sm:$0xff] }
 0x33e   :  { %v7316_v58 = vor.u32 %v8288_v52, %v7313_v53  ;;  %v8216_v59 = vld [vmem:[#allocation6 + $0xc1c] sm:$0xf]  ;;  %5092 = vmatpush.bf16.msra.mxu0 %v8348_v46  ;;  %4540 = vmatpush.bf16.msrb.mxu2 %v7060_v56  ;;  %v4568_v52 = vpack.c.bf16 %v4560_v34, %v4560_v34  ;;  %v4258_v53 = vadd.f32 %v8768_v61, %v1157_v36  ;;  %v4562_v56 = vmax.f32 %v8732_v49, 0.0 }
 0x33f   :  { %v7025_v27 = vld [vmem:[#allocation6 + $0xc38] sm:$0xf0]  ;;  %4529 = vmatmul.bf16.vlgmr.msrb.gmra.mxu1 %v8675_v10  ;;  %v8362_v10 = vld [vmem:[#allocation9 + $0xa8] sm:$0xff] }
 0x340   :  { %v8280_v60 = vld [vmem:[#allocation6 + $0xe1c] sm:$0xf]  ;;  %5105 = vmatpush.bf16.msra.mxu1 %v8356_v57  ;;  %v7028_v1 = vor.u32 %v8216_v59, %v7025_v27  ;;  %4553 = vmatpush.bf16.msrb.mxu3 %v7316_v58  ;;  %v8357_v57 = vld [vmem:[#allocation9 + $0x80] sm:$0xff]  ;;  %v8396_v59 = vld [vmem:[#allocation9 + $0x1b8] sm:$0xff]  ;;  %v4563_v27 = vmax.f32 %v8748_v55, 0.0  ;;  %v4271_v61 = vadd.f32 %v8770_v63, %v4258_v53 }
 0x341   :  { %v7281_v62 = vld [vmem:[#allocation6 + $0xe38] sm:$0xf0]  ;;  %v8365_v58 = vld [vmem:[#allocation9 + $0xc0] sm:$0xff]  ;;  %v8404_v53 = vld [vmem:[#allocation9 + $0x1f8] sm:$0xff] }
 0x342   :  { %v8347_v44 = vld [vmem:[#allocation9 + $0x30] sm:$0xff]  ;;  %v7284_v50 = vor.u32 %v8280_v60, %v7281_v62  ;;  %4541 = vmatpush.bf16.msrb.mxu2 %v7028_v1  ;;  %v4350_v60 = vpop.f32.mrf.mxu3  ;;  %v8378_v62 = vld [vmem:[#allocation9 + $0x128] sm:$0xff]  ;;  %v4284_v1 = vadd.f32 %v8772_v18, %v4271_v61  ;;  %v4571_v51 = vpack.c.bf16 %v4563_v27, %v4563_v27  ;;  %v8385_v55 = vld [vmem:[#allocation9 + $0x160] sm:$0xff] }
 0x343   :  { %v8355_v2 = vld [vmem:[#allocation9 + $0x70] sm:$0xff]  ;;  %5093 = vmatpush.bf16.msra.mxu0 %v8347_v44  ;;  %v8386_v44 = vld [vmem:[#allocation9 + $0x168] sm:$0xff]  ;;  %v8376_v18 = vld [vmem:[#allocation9 + $0x118] sm:$0xff] }
 0x344   :  { %5106 = vmatpush.bf16.msra.mxu1 %v8355_v2  ;;  %4554 = vmatpush.bf16.msrb.mxu3 %v7284_v50  ;;  %v8363_v11 = vld [vmem:[#allocation9 + $0xb0] sm:$0xff]  ;;  %v4570_v2 = vpack.c.bf16 %v4562_v56, %v4562_v56  ;;  %v8377_v50 = vld [vmem:[#allocation9 + $0x120] sm:$0xff]  ;;  %v4297_v63 = vadd.f32 %v8774_v23, %v4284_v1 }
 0x345   :  { %v8371_v13 = vld [vmem:[#allocation9 + $0xf0] sm:$0xff]  ;;  %4542 = vmatmul.bf16.vlgmr.msrb.gmra.mxu2 %v8679_v48  ;;  %v8361_v48 = vld [vmem:[#allocation9 + $0xa0] sm:$0xff] }
 0x346   :  { %5118 = vmatpush.bf16.msra.mxu2 %v8364_v4  ;;  %v8351_v22 = vld [vmem:[#allocation9 + $0x50] sm:$0xff]  ;;  %v8394_v4 = vld [vmem:[#allocation9 + $0x1a8] sm:$0xff]  ;;  %v8401_v60 = vld [vmem:[#allocation9 + $0x1e0] sm:$0xff] }
 0x347   :  { %5094 = vmatpush.bf16.msra.mxu0 %v8346_v6  ;;  %4555 = vmatmul.bf16.vlgmr.msrb.gmra.mxu3 %v8681_v45  ;;  %v8343_v45 = vld [vmem:[#allocation9 + $0x10] sm:$0xff]  ;;  %v4374_v6 = vpop.f32.mrf.mxu1 }
 0x348   :  { %5131 = vmatpush.bf16.msra.mxu3 %v8372_v8  ;;  %5107 = vmatpush.bf16.msra.mxu1 %v8354_v9  ;;  %v8359_v12 = vld [vmem:[#allocation9 + $0x90] sm:$0xff]  ;;  %v4310_v8 = vadd.f32 %v8780_v15, %v4297_v63  ;;  %v8384_v9 = vld [vmem:[#allocation9 + $0x158] sm:$0xff]  ;;  %v8374_v15 = vld [vmem:[#allocation9 + $0x108] sm:$0xff] }
 0x349   :  { %v8367_v32 = vld [vmem:[#allocation9 + $0xd0] sm:$0xff]  ;;  %v8397_v63 = vld [vmem:[#allocation9 + $0x1c0] sm:$0xff] }
 0x34a   :  { %5119 = vmatpush.bf16.msra.mxu2 %v8363_v11  ;;  %v8379_v16 = vld [vmem:[#allocation9 + $0x130] sm:$0xff]  ;;  %v8393_v11 = vld [vmem:[#allocation9 + $0x1a0] sm:$0xff] }
 0x34b   :  { %5095 = vmatpush.bf16.msra.mxu0 %v8345_v7  ;;  %v8387_v46 = vld [vmem:[#allocation9 + $0x170] sm:$0xff] }
 0x34c   :  { %5132 = vmatpush.bf16.msra.mxu3 %v8371_v13  ;;  %5108 = vmatpush.bf16.msra.mxu1 %v8353_v14  ;;  %v8395_v49 = vld [vmem:[#allocation9 + $0x1b0] sm:$0xff]  ;;  %v4323_v13 = vadd.f32 %v8782_v17, %v4310_v8  ;;  %v4400_v17 = vpop.f32.mrf.mxu3 }
 0x34d   :  { %v8375_v7 = vld [vmem:[#allocation9 + $0x110] sm:$0xff] }
 0x34e   :  { %5120 = vmatpush.bf16.msra.mxu2 %v8362_v10  ;;  %v8383_v14 = vld [vmem:[#allocation9 + $0x150] sm:$0xff]  ;;  %v4336_v23 = vadd.f32 %v8784_v31, %v4323_v13  ;;  %v8392_v10 = vld [vmem:[#allocation9 + $0x198] sm:$0xff]  ;;  %v1158_v31 = vperm.slane %v8789_v35, 6 }
 0x34f   :  { %5096 = vmatpush.bf16.msra.mxu0 %v8344_v19  ;;  %v4376_v19 = vpop.f32.mrf.mxu1  ;;  %v8403_v56 = vld [vmem:[#allocation9 + $0x1f0] sm:$0xff] }
 0x350   :  { %5133 = vmatpush.bf16.msra.mxu3 %v8370_v39  ;;  %5109 = vmatpush.bf16.msra.mxu1 %v8352_v20  ;;  %v4363_v39 = vpop.f32.mrf.mxu0  ;;  %v8382_v20 = vld [vmem:[#allocation9 + $0x148] sm:$0xff] }
 0x352   :  { %5121 = vmatpush.bf16.msra.mxu2 %v8361_v48  ;;  %v4349_v48 = vadd.f32 %v8786_v30, %v4336_v23 }
 0x353   :  { %5097 = vmatpush.bf16.msra.mxu0 %v8343_v45  ;;  %v4387_v45 = vpop.f32.mrf.mxu2 }
 0x354   :  { %5134 = vmatpush.bf16.msra.mxu3 %v8369_v21  ;;  %5110 = vmatpush.bf16.msra.mxu1 %v8351_v22  ;;  %v8391_v21 = vld [vmem:[#allocation9 + $0x190] sm:$0xff]  ;;  %v8373_v22 = vld [vmem:[#allocation9 + $0x100] sm:$0xff]  ;;  %v4402_v30 = vpop.f32.mrf.mxu3 }
 0x356   :  { %5122 = vmatpush.bf16.msra.mxu2 %v8360_v24  ;;  %v4564_v24 = vmax.f32 %v8762_v0, 0.0 }
 0x357   :  { %5098 = vmatpush.bf16.msra.mxu0 %v8342_v28 }
 0x358   :  { %5135 = vmatpush.bf16.msra.mxu3 %v8368_v25  ;;  %5111 = vmatpush.bf16.msra.mxu1 %v8350_v29  ;;  %v4565_v25 = vmax.f32 %v4349_v48, 0.0  ;;  %v4572_v28 = vpack.c.bf16 %v4564_v24, %v4564_v24 }
 0x35a   :  { %5123 = vmatpush.bf16.msra.mxu2 %v8359_v12  ;;  %v4573_v29 = vpack.c.bf16 %v4565_v25, %v4565_v25  ;;  %v8389_v12 = vld [vmem:[#allocation9 + $0x180] sm:$0xff] }
 0x35b   :  { %5099 = vmatpush.bf16.msra.mxu0 %v8341_v33  ;;  %v4362_v33 = vadd.f32 %v4361_v5, %v1158_v31 }
 0x35c   :  { %5136 = vmatpush.bf16.msra.mxu3 %v8367_v32  ;;  %5112 = vmatpush.bf16.msra.mxu1 %v8349_v37  ;;  %v4389_v32 = vpop.f32.mrf.mxu2 }
 0x35d   :  { %v4375_v0 = vadd.f32 %v4374_v6, %v4362_v33 }
 0x35e   :  { %5124 = vmatpush.bf16.msra.mxu2 %v8358_v42  ;;  %5100 = vmatmul.bf16.vlgmr.msra.gmra.mxu0 %v4568_v52  ;;  %v4413_v34 = vpop.f32.mrf.mxu0 }
 0x35f   :  { %5144 = vmatpush.bf16.msrb.mxu0 %v8380_v38  ;;  %5113 = vmatmul.bf16.vlgmr.msra.gmra.mxu1 %v4569_v54  ;;  %v4388_v36 = vadd.f32 %v4387_v45, %v4375_v0 }
 0x360   :  { %5157 = vmatpush.bf16.msrb.mxu1 %v8388_v41  ;;  %5137 = vmatpush.bf16.msra.mxu3 %v8366_v47  ;;  %v4426_v37 = vpop.f32.mrf.mxu1 }
 0x361   :  { %v4401_v38 = vadd.f32 %v4400_v17, %v4388_v36 }
 0x362   :  { %5125 = vmatpush.bf16.msra.mxu2 %v8357_v57 }
 0x363   :  { %5145 = vmatpush.bf16.msrb.mxu0 %v8379_v16  ;;  %v4414_v40 = vadd.f32 %v4413_v34, %v4401_v38 }
 0x364   :  { %5158 = vmatpush.bf16.msrb.mxu1 %v8387_v46  ;;  %5138 = vmatpush.bf16.msra.mxu3 %v8365_v58 }
 0x365   :  { %5126 = vmatmul.bf16.vlgmr.msra.gmra.mxu2 %v4570_v2  ;;  %v4427_v47 = vadd.f32 %v4426_v37, %v4414_v40  ;;  %v8399_v2 = vld [vmem:[#allocation9 + $0x1d0] sm:$0xff] }
 0x366   :  { %5170 = vmatpush.bf16.msrb.mxu2 %v8396_v59  ;;  %v4415_v41 = vpop.f32.mrf.mxu0  ;;  %v8402_v59 = vld [vmem:[#allocation9 + $0x1e8] sm:$0xff] }
 0x367   :  { %5146 = vmatpush.bf16.msrb.mxu0 %v8378_v62  ;;  %5139 = vmatmul.bf16.vlgmr.msra.gmra.mxu3 %v4571_v51  ;;  %v8400_v62 = vld [vmem:[#allocation9 + $0x1d8] sm:$0xff]  ;;  %v8398_v51 = vld [vmem:[#allocation9 + $0x1c8] sm:$0xff] }
 0x368   :  { %5159 = vmatpush.bf16.msrb.mxu1 %v8386_v44  ;;  %v4428_v42 = vpop.f32.mrf.mxu1  ;;  %5183 = vmatpush.bf16.msrb.mxu3 %v8404_v53 }
 0x36a   :  { %5171 = vmatpush.bf16.msrb.mxu2 %v8395_v49 }
 0x36b   :  { %5147 = vmatpush.bf16.msrb.mxu0 %v8377_v50 }
 0x36c   :  { %5160 = vmatpush.bf16.msrb.mxu1 %v8385_v55  ;;  %v4439_v52 = vpop.f32.mrf.mxu2  ;;  %5184 = vmatpush.bf16.msrb.mxu3 %v8403_v56 }
 0x36d   :  { %v4440_v16 = vadd.f32 %v4439_v52, %v4427_v47 }
 0x36e   :  { %5172 = vmatpush.bf16.msrb.mxu2 %v8394_v4  ;;  %v4452_v54 = vpop.f32.mrf.mxu3  ;;  %v1159_v4 = vperm.slane %v8789_v35, 7 }
 0x36f   :  { %5148 = vmatpush.bf16.msrb.mxu0 %v8376_v18  ;;  %v4453_v46 = vadd.f32 %v4452_v54, %v4440_v16 }
 0x370   :  { %5161 = vmatpush.bf16.msrb.mxu1 %v8384_v9  ;;  %5185 = vmatpush.bf16.msrb.mxu3 %v8402_v59 }
 0x371   :  { %v4566_v57 = vmax.f32 %v4453_v46, 0.0 }
 0x372   :  { %5173 = vmatpush.bf16.msrb.mxu2 %v8393_v11 }
 0x373   :  { %5149 = vmatpush.bf16.msrb.mxu0 %v8375_v7  ;;  %v4574_v43 = vpack.c.bf16 %v4566_v57, %v4566_v57 }
 0x374   :  { %5162 = vmatpush.bf16.msrb.mxu1 %v8383_v14  ;;  %v4441_v58 = vpop.f32.mrf.mxu2  ;;  %5186 = vmatpush.bf16.msrb.mxu3 %v8401_v60 }
 0x376   :  { %5174 = vmatpush.bf16.msrb.mxu2 %v8392_v10  ;;  %v4454_v27 = vpop.f32.mrf.mxu3 }
 0x377   :  { %5150 = vmatpush.bf16.msrb.mxu0 %v8374_v15 }
 0x378   :  { %5163 = vmatpush.bf16.msrb.mxu1 %v8382_v20  ;;  %5187 = vmatpush.bf16.msrb.mxu3 %v8400_v62 }
 0x37a   :  { %5175 = vmatpush.bf16.msrb.mxu2 %v8391_v21 }
 0x37b   :  { %5151 = vmatpush.bf16.msrb.mxu0 %v8373_v22  ;;  %v8415_v22 = vld [vmem:[#allocation10] ss:$0 sm:$0xff] }
 0x37c   :  { %5164 = vmatpush.bf16.msrb.mxu1 %v8381_v3  ;;  %5188 = vmatpush.bf16.msrb.mxu3 %v8399_v2 }
 0x37e   :  { %5176 = vmatpush.bf16.msrb.mxu2 %v8390_v26  ;;  %5152 = vmatmul.bf16.vlgmr.msrb.gmra.mxu0 %v4572_v28  ;;  %v4465_v61 = vpop.f32.mrf.mxu0 }
 0x37f   :  { %5165 = vmatmul.bf16.vlgmr.msrb.gmra.mxu1 %v4573_v29  ;;  %v4466_v6 = vadd.f32 %v4465_v61, %v1159_v4 }
 0x380   :  { %v4478_v44 = vpop.f32.mrf.mxu1  ;;  %5189 = vmatpush.bf16.msrb.mxu3 %v8398_v51 }
 0x381   :  { %v4479_v18 = vadd.f32 %v4478_v44, %v4466_v6 }
 0x382   :  { %5177 = vmatpush.bf16.msrb.mxu2 %v8389_v12 }
 0x384   :  { %5190 = vmatpush.bf16.msrb.mxu3 %v8397_v63 }
 0x385   :  { %5178 = vmatmul.bf16.vlgmr.msrb.gmra.mxu2 %v4574_v43 }
 0x386   :  { %v4467_v1 = vpop.f32.mrf.mxu0 }
 0x388   :  { %v4480_v49 = vpop.f32.mrf.mxu1 }
 0x390   :  { %v4491_v50 = vpop.f32.mrf.mxu2 }
 0x391   :  { %v4492_v11 = vadd.f32 %v4491_v50, %v4479_v18 }
 0x392   :  { %v4504_v55 = vpop.f32.mrf.mxu3 }
 0x393   :  { %v4505_v7 = vadd.f32 %v4504_v55, %v4492_v11 }
 0x398   :  { %v4493_v5 = vpop.f32.mrf.mxu2 }
 0x39a   :  { %v4506_v8 = vpop.f32.mrf.mxu3 }
 0x3ba   :  { %v4517_v9 = vpop.f32.mrf.mxu0 }
 0x3bb   :  { %v4518_v14 = vadd.f32 %v4517_v9, %v4505_v7 }
 0x3bc   :  { %v4530_v13 = vpop.f32.mrf.mxu1 }
 0x3bd   :  { %v4531_v39 = vadd.f32 %v4530_v13, %v4518_v14 }
 0x3c2   :  { %v4519_v23 = vpop.f32.mrf.mxu0 }
 0x3c4   :  { %v4532_v10 = vpop.f32.mrf.mxu1 }
 0x3c8   :  { %v4543_v19 = vpop.f32.mrf.mxu2 }
 0x3c9   :  { %v4544_v15 = vadd.f32 %v4543_v19, %v4531_v39 }
 0x3ca   :  { %v4556_v20 = vpop.f32.mrf.mxu3 }
 0x3cb   :  { %v4557_v48 = vadd.f32 %v4556_v20, %v4544_v15 }
 0x3cd   :  { %v4567_v21 = vmax.f32 %v4557_v48, 0.0 }
 0x3cf   :  { %v4575_v45 = vpack.c.bf16 %v4567_v21, %v4567_v21 }
 0x3d0   :  { %v4545_v17 = vpop.f32.mrf.mxu2 }
 0x3d1   :  { %5191 = vmatmul.bf16.vlgmr.msrb.gmra.mxu3 %v4575_v45 }
 0x3d2   :  { %v4558_v35 = vpop.f32.mrf.mxu3 }
 0x3db   :  { %v5101_v24 = vpop.f32.mrf.mxu0 }
 0x3dc   :  { %v5102_v3 = vadd.f32 %v8415_v22, %v5101_v24  ;;  %v5114_v25 = vpop.f32.mrf.mxu1 }
 0x3de   :  { %v5115_v26 = vadd.f32 %v5114_v25, %v5102_v3 }
 0x3e3   :  { %v5103_v28 = vpop.f32.mrf.mxu0 }
 0x3e4   :  { %v5116_v29 = vpop.f32.mrf.mxu1 }
 0x3e8   :  { %v5127_v12 = vpop.f32.mrf.mxu2 }
 0x3e9   :  { %v5128_v31 = vadd.f32 %v5127_v12, %v5115_v26 }
 0x3ea   :  { %v5140_v32 = vpop.f32.mrf.mxu3 }
 0x3eb   :  { %v5141_v30 = vadd.f32 %v5140_v32, %v5128_v31 }
 0x3f0   :  { %v5129_v33 = vpop.f32.mrf.mxu2 }
 0x3f2   :  { %v5142_v0 = vpop.f32.mrf.mxu3 }
 0x3fb   :  { %v5153_v34 = vpop.f32.mrf.mxu0 }
 0x3fc   :  { %v5154_v36 = vadd.f32 %v5153_v34, %v5141_v30  ;;  %v5166_v37 = vpop.f32.mrf.mxu1 }
 0x3fe   :  { %v5167_v38 = vadd.f32 %v5166_v37, %v5154_v36 }
 0x403   :  { %v5155_v40 = vpop.f32.mrf.mxu0 }
 0x404   :  { %v5168_v41 = vpop.f32.mrf.mxu1 }
 0x408   :  { %v5179_v42 = vpop.f32.mrf.mxu2 }
 0x409   :  { %v5180_v52 = vadd.f32 %v5179_v42, %v5167_v38 }
 0x410   :  { %v5181_v47 = vpop.f32.mrf.mxu2 }
 0x454   :  { %v5192_v53 = vpop.f32.mrf.mxu3 }
 0x455   :  { %v5193_v16 = vadd.f32 %v5192_v53, %v5180_v52 }
 0x457   :  { %5196 = vst [vmem:[%s8816_s7] sm:$0xff] %v5193_v16 }
 0x45c   :  { %v5194_v54 = vpop.f32.mrf.mxu3 }
 0x45d   :  { %5201 = vsyncpa [#allocation3], 1 }
 0x45e   :  { %5202 = vsyncpa [#allocation5], 1 }
 0x45f   :  { %5203 = vsyncpa [#allocation8], 1 }
 0x460   :  { %5204 = vsyncpa [#allocation11], 1 }

</bundles_post_ra>
